<compile_context>
chip_gen: v5e
topology: v5e:2x2
jax: 0.10.0
libtpu: 0.0.40
codegen_flags: <defaults>
</compile_context>

<pallas_src>
import math
import functools

import jax
import jax.numpy as jnp
from jax import lax
from jax.experimental import pallas as pl
from jax.experimental.pallas import tpu as pltpu


_VMEM = pl.BlockSpec(memory_space=pltpu.MemorySpace.VMEM)


# ----------------------------------------------------------------------------
# Fused kernel builder (config is static / baked in at trace time)
# ----------------------------------------------------------------------------
def _build_kernel(*, T, Bp, H, in_size, num_layers, bidirectional):
    D = 2 if bidirectional else 1
    DH = D * H
    G = 4 * DH  # fused gate width: [i_f i_b | f_f f_b | g_f g_b | o_f o_b]

    # Unroll bounded by the live per-step footprint (z + h + c), not just T, so the
    # fully unrolled recurrence does not spill the 64-vreg file at production sizes.
    step_live_elems = Bp * (G + 2 * DH)
    if T <= 32 and step_live_elems <= 16 * 1024:
        unroll = True
    elif step_live_elems <= 64 * 1024:
        unroll = min(T, 4)
    else:
        unroll = 2

    def kernel(*refs):
        it = iter(refs)
        # ---- inputs ----
        x_ref = next(it)                              # (T, Bp, in_size) natural order
        layers = []
        for _ in range(num_layers):
            w_nat = next(it)                          # (F_in, G): natural-order cols
            w_rev = next(it) if bidirectional else None   # (F_in, G): reversed-order cols
            bias = next(it)                           # (1, G) fused bias
            whh = next(it)                            # (DH, G) fused recurrent weight
            layers.append((w_nat, w_rev, bias, whh))
        cls_w_ref = next(it)                          # (DH, C)
        cls_b_ref = next(it)                          # (1, C)
        # ---- outputs ----
        out_ref = next(it)                            # (Bp, C)
        # ---- scratch ----
        gin_ref = next(it)                            # (T, Bp, G) fused gate inputs
        seq_ref = next(it) if num_layers > 1 else None  # (T, Bp, DH) step-ordered h_new

        def hoist(layer_idx, in2d):
            """x @ W_ih + b for all timesteps at once (big MXU matmuls, off the serial
            chain).  Writes the fused, lane-dense gate-input buffer with full-width
            slab stores; the backward direction's time reversal is a slab re-index."""
            w_nat, w_rev, bias, _ = layers[layer_idx]
            b = bias[...]
            gnat = jnp.dot(in2d, w_nat[...], preferred_element_type=jnp.float32)
            if bidirectional:
                grev = jnp.dot(in2d, w_rev[...], preferred_element_type=jnp.float32)
                for s in range(T):
                    gin_ref[s] = (gnat[s * Bp:(s + 1) * Bp, :]
                                  + grev[(T - 1 - s) * Bp:(T - s) * Bp, :] + b)
            else:
                gin_ref[...] = (gnat + b).reshape(T, Bp, G)

        def recurrence(layer_idx, is_last):
            """Serial time loop: ONE h @ W_hh_fused matmul per step, gate activations
            and the state update; one full-width sequence store per step."""
            whh = layers[layer_idx][3][...]

            def step(s, carry):
                h, c = carry                                       # (Bp, DH) each
                z = gin_ref[s] + jnp.dot(h, whh,
                                         preferred_element_type=jnp.float32)
                ig = jax.nn.sigmoid(z[:, 0 * DH:1 * DH])
                fg = jax.nn.sigmoid(z[:, 1 * DH:2 * DH])
                gg = jnp.tanh(z[:, 2 * DH:3 * DH])
                og = jax.nn.sigmoid(z[:, 3 * DH:4 * DH])
                c_new = fg * c + ig * gg
                h_new = og * jnp.tanh(c_new)
                if not is_last:
                    seq_ref[s] = h_new        # single full vst; de-interleave is done
                return (h_new, c_new)         # by the next layer's hoist (off-chain)

            zeros = jnp.zeros((Bp, DH), jnp.float32)
            h_fin, _ = lax.fori_loop(0, T, step, (zeros, zeros), unroll=unroll)
            return h_fin

        # ---------------- layer 0 ----------------
        x2d = x_ref[...].reshape(T * Bp, in_size)
        hoist(0, x2d)
        h_last = recurrence(0, is_last=(num_layers == 1))

        # ---------------- layers 1 .. L-1 ----------------
        for l in range(1, num_layers):
            seq2d = seq_ref[...].reshape(T * Bp, DH)   # read before it is overwritten
            hoist(l, seq2d)
            h_last = recurrence(l, is_last=(l == num_layers - 1))

        # ---------------- classifier (Dropout = identity in eval) ----------------
        out_ref[...] = (jnp.dot(h_last, cls_w_ref[...],
                                preferred_element_type=jnp.float32) + cls_b_ref[...])

    return kernel


# ----------------------------------------------------------------------------
# Wrapper
# ----------------------------------------------------------------------------
def video_lstm_forward(x, params, *, hidden_size, num_layers, bidirectional,
                       num_classes):
    """x: (B, T, input_size) batch-first, matching nn.LSTM(batch_first=True)."""
    B, T, in_size = x.shape
    H = hidden_size
    D = 2 if bidirectional else 1
    DH = D * H
    G = 4 * DH
    Bp = ((B + 7) // 8) * 8                       # pad batch to full sublanes

    x_tm = jnp.transpose(x, (1, 0, 2)).astype(jnp.float32)        # (T, B, I)
    if Bp != B:
        x_tm = jnp.pad(x_tm, ((0, 0), (0, Bp - B), (0, 0)))

    inputs = [x_tm]
    for layer in params["layers"]:
        inputs.append(layer["w_nat"])
        if bidirectional:
            inputs.append(layer["w_rev"])
        inputs.append(layer["bias"])
        inputs.append(layer["whh"])
    inputs.append(params["cls_w"])
    inputs.append(params["cls_b"])

    scratch = [pltpu.VMEM((T, Bp, G), jnp.float32)]
    if num_layers > 1:
        scratch.append(pltpu.VMEM((T, Bp, DH), jnp.float32))

    # VMEM budget: whole-array residency of inputs + output + scratch, with headroom.
    resident = sum(int(a.size) * 4 for a in inputs) + Bp * num_classes * 4
    resident += T * Bp * G * 4 + (T * Bp * DH * 4 if num_layers > 1 else 0)
    vmem_limit = int(min(100 << 20, max(8 << 20, 3 * resident)))

    kernel = _build_kernel(T=T, Bp=Bp, H=H, in_size=in_size,
                           num_layers=num_layers, bidirectional=bidirectional)

    out = pl.pallas_call(
        kernel,
        out_shape=jax.ShapeDtypeStruct((Bp, num_classes), jnp.float32),
        in_specs=[_VMEM] * len(inputs),
        out_specs=_VMEM,
        scratch_shapes=scratch,
        compiler_params=pltpu.CompilerParams(vmem_limit_bytes=vmem_limit),
    )(*inputs)
    return out[:B]


# ----------------------------------------------------------------------------
# PyTorch-style parameter init + conversion to kernel layout
# ----------------------------------------------------------------------------
def init_torch_params(key, input_size, hidden_size, num_layers, bidirectional,
                      num_classes):
    """PyTorch-layout params: per layer per dir (w_ih(4H,F), w_hh(4H,H), b_ih, b_hh)."""
    D = 2 if bidirectional else 1
    H = hidden_size
    k = 1.0 / math.sqrt(H)
    lstm = []
    for layer in range(num_layers):
        fin = input_size if layer == 0 else D * H
        dirs = []
        for _ in range(D):
            key, k1, k2, k3, k4 = jax.random.split(key, 5)
            w_ih = jax.random.uniform(k1, (4 * H, fin), jnp.float32, -k, k)
            w_hh = jax.random.uniform(k2, (4 * H, H), jnp.float32, -k, k)
            b_ih = jax.random.uniform(k3, (4 * H,), jnp.float32, -k, k)
            b_hh = jax.random.uniform(k4, (4 * H,), jnp.float32, -k, k)
            dirs.append((w_ih, w_hh, b_ih, b_hh))
        lstm.append(dirs)
    feat = D * H
    kc = 1.0 / math.sqrt(feat)
    key, k5, k6 = jax.random.split(key, 3)
    cls_w = jax.random.uniform(k5, (num_classes, feat), jnp.float32, -kc, kc)
    cls_b = jax.random.uniform(k6, (num_classes,), jnp.float32, -kc, kc)
    return {"lstm": lstm, "cls_w": cls_w, "cls_b": cls_b}


def to_kernel_params(tp, input_size, hidden_size, bidirectional):
    """Kernel layout (all permutation done host-side):
      * fused gate column order  [i_f i_b | f_f f_b | g_f g_b | o_f o_b]  (width 4*DH)
      * w_nat : (F_in, 4*DH) input weights applied to the NATURAL-order sequence
      * w_rev : (F_in, 4*DH) input weights applied at the time-REVERSED slab index
      * bias  : (1, 4*DH) combined b_ih + b_hh in fused order
      * whh   : (DH, 4*DH) fused recurrent weight (rows 0:H act on h_fwd, H:DH on h_bwd)
    """
    H = hidden_size
    D = 2 if bidirectional else 1
    DH = D * H
    G = 4 * DH
    layers = []
    for li, dirs in enumerate(tp["lstm"]):
        fin = input_size if li == 0 else DH
        if D == 1:
            w_ih, w_hh, b_ih, b_hh = dirs[0]
            layers.append({"w_nat": jnp.transpose(w_ih),            # (fin, 4H)
                           "w_rev": None,
                           "bias": (b_ih + b_hh)[None, :],          # (1, 4H)
                           "whh": jnp.transpose(w_hh)})             # (H, 4H)
            continue
        (wf_ih, wf_hh, bf_ih, bf_hh) = dirs[0]
        (wb_ih, wb_hh, bb_ih, bb_hh) = dirs[1]
        w_nat = jnp.zeros((fin, G), jnp.float32)
        w_rev = jnp.zeros((fin, G), jnp.float32)
        bias = jnp.zeros((1, G), jnp.float32)
        whh = jnp.zeros((DH, G), jnp.float32)
        for g in range(4):
            rf = slice(g * H, (g + 1) * H)           # gate-g rows in PyTorch weights
            cf = slice(g * DH, g * DH + H)           # fused fwd columns of gate g
            cb = slice(g * DH + H, (g + 1) * DH)     # fused bwd columns of gate g
            bias = bias.at[0, cf].set(bf_ih[rf] + bf_hh[rf])
            bias = bias.at[0, cb].set(bb_ih[rf] + bb_hh[rf])
            whh = whh.at[0:H, cf].set(jnp.transpose(wf_hh[rf, :]))
            whh = whh.at[H:DH, cb].set(jnp.transpose(wb_hh[rf, :]))
            if li == 0:
                # layer 0: fwd consumes x(t) (natural), bwd consumes x(T-1-t) (reversed)
                w_nat = w_nat.at[:, cf].set(jnp.transpose(wf_ih[rf, :]))
                w_rev = w_rev.at[:, cb].set(jnp.transpose(wb_ih[rf, :]))
            else:
                # layer >=1: seq scratch slab s holds [h_f(s) | h_b(T-1-s)].
                w_nat = w_nat.at[0:H, cf].set(jnp.transpose(wf_ih[rf, 0:H]))
                w_nat = w_nat.at[H:DH, cb].set(jnp.transpose(wb_ih[rf, H:DH]))
                w_rev = w_rev.at[H:DH, cf].set(jnp.transpose(wf_ih[rf, H:DH]))
                w_rev = w_rev.at[0:H, cb].set(jnp.transpose(wb_ih[rf, 0:H]))
        layers.append({"w_nat": w_nat, "w_rev": w_rev, "bias": bias, "whh": whh})
    return {"layers": layers,
            "cls_w": jnp.transpose(tp["cls_w"]),              # (DH, C)
            "cls_b": tp["cls_b"][None, :]}                    # (1, C)


# ----------------------------------------------------------------------------
# Pure-JAX reference (for a correctness cross-check)
# ----------------------------------------------------------------------------
def reference_forward(x, tp, hidden_size, bidirectional):
    H = hidden_size
    B = x.shape[0]
    hp = lax.Precision.HIGHEST

    def run_dir(x_seq, w_ih, w_hh, b):
        def step(carry, xt):
            h, c = carry
            gates = (jnp.dot(xt, w_ih.T, precision=hp)
                     + jnp.dot(h, w_hh.T, precision=hp) + b)
            i = jax.nn.sigmoid(gates[:, 0 * H:1 * H])
            f = jax.nn.sigmoid(gates[:, 1 * H:2 * H])
            g = jnp.tanh(gates[:, 2 * H:3 * H])
            o = jax.nn.sigmoid(gates[:, 3 * H:4 * H])
            c = f * c + i * g
            h = o * jnp.tanh(c)
            return (h, c), h
        init = (jnp.zeros((B, H), jnp.float32), jnp.zeros((B, H), jnp.float32))
        (h_fin, _), outs = lax.scan(step, init, jnp.swapaxes(x_seq, 0, 1))
        return jnp.swapaxes(outs, 0, 1), h_fin

    layer_in = x.astype(jnp.float32)
    h_last = None
    for dirs in tp["lstm"]:
        w_ih, w_hh, b_ih, b_hh = dirs[0]
        out_f, h_f = run_dir(layer_in, w_ih, w_hh, b_ih + b_hh)
        if bidirectional:
            w_ih, w_hh, b_ih, b_hh = dirs[1]
            out_b_rev, h_b = run_dir(layer_in[:, ::-1], w_ih, w_hh, b_ih + b_hh)
            out_b = out_b_rev[:, ::-1]
            layer_in = jnp.concatenate([out_f, out_b], axis=-1)
            h_last = jnp.concatenate([h_f, h_b], axis=-1)
        else:
            layer_in = out_f
            h_last = h_f
    return jnp.dot(h_last, tp["cls_w"].T, precision=hp) + tp["cls_b"]


# ----------------------------------------------------------------------------
if __name__ == "__main__":
    INPUT_SIZE = 16
    HIDDEN_SIZE = 32
    NUM_LAYERS = 2
    BIDIRECTIONAL = True
    NUM_CLASSES = 2
    BATCH = 2
    SEQ = 8

    key = jax.random.PRNGKey(0)
    key, xkey, pkey = jax.random.split(key, 3)
    x = jax.random.normal(xkey, (BATCH, SEQ, INPUT_SIZE), jnp.float32)

    torch_params = init_torch_params(pkey, INPUT_SIZE, HIDDEN_SIZE, NUM_LAYERS,
                                     BIDIRECTIONAL, NUM_CLASSES)
    kernel_params = to_kernel_params(torch_params, INPUT_SIZE, HIDDEN_SIZE,
                                     BIDIRECTIONAL)

    fwd = jax.jit(functools.partial(
        video_lstm_forward,
        hidden_size=HIDDEN_SIZE, num_layers=NUM_LAYERS,
        bidirectional=BIDIRECTIONAL, num_classes=NUM_CLASSES))

    logits = fwd(x, kernel_params)
    jax.block_until_ready(logits)

    assert logits.shape == (BATCH, NUM_CLASSES), logits.shape
    assert bool(jnp.all(jnp.isfinite(logits)))

    ref = reference_forward(x, torch_params, HIDDEN_SIZE, BIDIRECTIONAL)
    # f32 MXU default precision vs HIGHEST-precision reference; observed error is
    # far smaller than this bound in practice.
    assert jnp.allclose(logits, ref, atol=2e-2, rtol=2e-2), (logits, ref)

    print("KERNEL_OK")
</pallas_src>

<mosaic_0001>
module attributes {stable_mosaic.version = 11 : i64} {
  func.func @kernel(%arg0: memref<8x8x16xf32, #tpu.memory_space<vmem>>, %arg1: memref<16x256xf32, #tpu.memory_space<vmem>>, %arg2: memref<16x256xf32, #tpu.memory_space<vmem>>, %arg3: memref<1x256xf32, #tpu.memory_space<vmem>>, %arg4: memref<64x256xf32, #tpu.memory_space<vmem>>, %arg5: memref<64x256xf32, #tpu.memory_space<vmem>>, %arg6: memref<64x256xf32, #tpu.memory_space<vmem>>, %arg7: memref<1x256xf32, #tpu.memory_space<vmem>>, %arg8: memref<64x256xf32, #tpu.memory_space<vmem>>, %arg9: memref<64x2xf32, #tpu.memory_space<vmem>>, %arg10: memref<1x2xf32, #tpu.memory_space<vmem>>, %arg11: memref<8x2xf32, #tpu.memory_space<vmem>>, %arg12: memref<8x8x256xf32, #tpu.memory_space<vmem>>, %arg13: memref<8x8x64xf32, #tpu.memory_space<vmem>>) attributes {dimension_semantics = [], scalar_prefetch = 0 : i64, scratch_operands = 2 : i64, tpu.core_type = #tpu.core_type<tc>} {
    %c0 = arith.constant 0 : index
    %c0_0 = arith.constant 0 : index
    %c0_1 = arith.constant 0 : index
    %0 = vector.load %arg0[%c0, %c0_0, %c0_1] : memref<8x8x16xf32, #tpu.memory_space<vmem>>, vector<8x8x16xf32>
    %1 = vector.shape_cast %0 : vector<8x8x16xf32> to vector<64x16xf32>
    %c0_2 = arith.constant 0 : index
    %c0_3 = arith.constant 0 : index
    %2 = vector.load %arg3[%c0_2, %c0_3] : memref<1x256xf32, #tpu.memory_space<vmem>>, vector<1x256xf32>
    %c0_4 = arith.constant 0 : index
    %c0_5 = arith.constant 0 : index
    %3 = vector.load %arg1[%c0_4, %c0_5] : memref<16x256xf32, #tpu.memory_space<vmem>>, vector<16x256xf32>
    %cst = arith.constant dense<0.000000e+00> : vector<64x256xf32>
    %4 = tpu.matmul %1, %3, %cst {dimension_numbers = #tpu.dot_dimension_numbers<[1], [0], [0], [1], [0, 0, 1, 1], [], []>} : vector<64x16xf32>, vector<16x256xf32>, vector<64x256xf32> -> vector<64x256xf32>
    %c0_6 = arith.constant 0 : index
    %c0_7 = arith.constant 0 : index
    %5 = vector.load %arg2[%c0_6, %c0_7] : memref<16x256xf32, #tpu.memory_space<vmem>>, vector<16x256xf32>
    %cst_8 = arith.constant dense<0.000000e+00> : vector<64x256xf32>
    %6 = tpu.matmul %1, %5, %cst_8 {dimension_numbers = #tpu.dot_dimension_numbers<[1], [0], [0], [1], [0, 0, 1, 1], [], []>} : vector<64x16xf32>, vector<16x256xf32>, vector<64x256xf32> -> vector<64x256xf32>
    %7 = vector.extract_strided_slice %4 {offsets = [0, 0], sizes = [8, 256], strides = [1, 1]} : vector<64x256xf32> to vector<8x256xf32>
    %8 = vector.extract_strided_slice %6 {offsets = [56, 0], sizes = [8, 256], strides = [1, 1]} : vector<64x256xf32> to vector<8x256xf32>
    %9 = arith.addf %7, %8 : vector<8x256xf32>
    %10 = vector.broadcast %2 : vector<1x256xf32> to vector<8x256xf32>
    %11 = arith.addf %9, %10 : vector<8x256xf32>
    %c0_9 = arith.constant 0 : index
    %c0_10 = arith.constant 0 : index
    %c0_11 = arith.constant 0 : index
    %12 = vector.load %arg12[%c0_9, %c0_10, %c0_11] : memref<8x8x256xf32, #tpu.memory_space<vmem>>, vector<1x8x256xf32>
    %13 = vector.shape_cast %12 : vector<1x8x256xf32> to vector<8x256xf32>
    %14 = vector.shape_cast %11 : vector<8x256xf32> to vector<1x8x256xf32>
    tpu.vector_store %arg12[%c0_9, %c0_10, %c0_11], %14 {strides = array<i32>} : memref<8x8x256xf32, #tpu.memory_space<vmem>>, vector<1x8x256xf32>,
    %15 = vector.extract_strided_slice %4 {offsets = [8, 0], sizes = [8, 256], strides = [1, 1]} : vector<64x256xf32> to vector<8x256xf32>
    %16 = vector.extract_strided_slice %6 {offsets = [48, 0], sizes = [8, 256], strides = [1, 1]} : vector<64x256xf32> to vector<8x256xf32>
    %17 = arith.addf %15, %16 : vector<8x256xf32>
    %18 = vector.broadcast %2 : vector<1x256xf32> to vector<8x256xf32>
    %19 = arith.addf %17, %18 : vector<8x256xf32>
    %c1 = arith.constant 1 : index
    %c0_12 = arith.constant 0 : index
    %c0_13 = arith.constant 0 : index
    %20 = vector.load %arg12[%c1, %c0_12, %c0_13] : memref<8x8x256xf32, #tpu.memory_space<vmem>>, vector<1x8x256xf32>
    %21 = vector.shape_cast %20 : vector<1x8x256xf32> to vector<8x256xf32>
    %22 = vector.shape_cast %19 : vector<8x256xf32> to vector<1x8x256xf32>
    tpu.vector_store %arg12[%c1, %c0_12, %c0_13], %22 {strides = array<i32>} : memref<8x8x256xf32, #tpu.memory_space<vmem>>, vector<1x8x256xf32>,
    %23 = vector.extract_strided_slice %4 {offsets = [16, 0], sizes = [8, 256], strides = [1, 1]} : vector<64x256xf32> to vector<8x256xf32>
    %24 = vector.extract_strided_slice %6 {offsets = [40, 0], sizes = [8, 256], strides = [1, 1]} : vector<64x256xf32> to vector<8x256xf32>
    %25 = arith.addf %23, %24 : vector<8x256xf32>
    %26 = vector.broadcast %2 : vector<1x256xf32> to vector<8x256xf32>
    %27 = arith.addf %25, %26 : vector<8x256xf32>
    %c2 = arith.constant 2 : index
    %c0_14 = arith.constant 0 : index
    %c0_15 = arith.constant 0 : index
    %28 = vector.load %arg12[%c2, %c0_14, %c0_15] : memref<8x8x256xf32, #tpu.memory_space<vmem>>, vector<1x8x256xf32>
    %29 = vector.shape_cast %28 : vector<1x8x256xf32> to vector<8x256xf32>
    %30 = vector.shape_cast %27 : vector<8x256xf32> to vector<1x8x256xf32>
    tpu.vector_store %arg12[%c2, %c0_14, %c0_15], %30 {strides = array<i32>} : memref<8x8x256xf32, #tpu.memory_space<vmem>>, vector<1x8x256xf32>,
    %31 = vector.extract_strided_slice %4 {offsets = [24, 0], sizes = [8, 256], strides = [1, 1]} : vector<64x256xf32> to vector<8x256xf32>
    %32 = vector.extract_strided_slice %6 {offsets = [32, 0], sizes = [8, 256], strides = [1, 1]} : vector<64x256xf32> to vector<8x256xf32>
    %33 = arith.addf %31, %32 : vector<8x256xf32>
    %34 = vector.broadcast %2 : vector<1x256xf32> to vector<8x256xf32>
    %35 = arith.addf %33, %34 : vector<8x256xf32>
    %c3 = arith.constant 3 : index
    %c0_16 = arith.constant 0 : index
    %c0_17 = arith.constant 0 : index
    %36 = vector.load %arg12[%c3, %c0_16, %c0_17] : memref<8x8x256xf32, #tpu.memory_space<vmem>>, vector<1x8x256xf32>
    %37 = vector.shape_cast %36 : vector<1x8x256xf32> to vector<8x256xf32>
    %38 = vector.shape_cast %35 : vector<8x256xf32> to vector<1x8x256xf32>
    tpu.vector_store %arg12[%c3, %c0_16, %c0_17], %38 {strides = array<i32>} : memref<8x8x256xf32, #tpu.memory_space<vmem>>, vector<1x8x256xf32>,
    %39 = vector.extract_strided_slice %4 {offsets = [32, 0], sizes = [8, 256], strides = [1, 1]} : vector<64x256xf32> to vector<8x256xf32>
    %40 = vector.extract_strided_slice %6 {offsets = [24, 0], sizes = [8, 256], strides = [1, 1]} : vector<64x256xf32> to vector<8x256xf32>
    %41 = arith.addf %39, %40 : vector<8x256xf32>
    %42 = vector.broadcast %2 : vector<1x256xf32> to vector<8x256xf32>
    %43 = arith.addf %41, %42 : vector<8x256xf32>
    %c4 = arith.constant 4 : index
    %c0_18 = arith.constant 0 : index
    %c0_19 = arith.constant 0 : index
    %44 = vector.load %arg12[%c4, %c0_18, %c0_19] : memref<8x8x256xf32, #tpu.memory_space<vmem>>, vector<1x8x256xf32>
    %45 = vector.shape_cast %44 : vector<1x8x256xf32> to vector<8x256xf32>
    %46 = vector.shape_cast %43 : vector<8x256xf32> to vector<1x8x256xf32>
    tpu.vector_store %arg12[%c4, %c0_18, %c0_19], %46 {strides = array<i32>} : memref<8x8x256xf32, #tpu.memory_space<vmem>>, vector<1x8x256xf32>,
    %47 = vector.extract_strided_slice %4 {offsets = [40, 0], sizes = [8, 256], strides = [1, 1]} : vector<64x256xf32> to vector<8x256xf32>
    %48 = vector.extract_strided_slice %6 {offsets = [16, 0], sizes = [8, 256], strides = [1, 1]} : vector<64x256xf32> to vector<8x256xf32>
    %49 = arith.addf %47, %48 : vector<8x256xf32>
    %50 = vector.broadcast %2 : vector<1x256xf32> to vector<8x256xf32>
    %51 = arith.addf %49, %50 : vector<8x256xf32>
    %c5 = arith.constant 5 : index
    %c0_20 = arith.constant 0 : index
    %c0_21 = arith.constant 0 : index
    %52 = vector.load %arg12[%c5, %c0_20, %c0_21] : memref<8x8x256xf32, #tpu.memory_space<vmem>>, vector<1x8x256xf32>
    %53 = vector.shape_cast %52 : vector<1x8x256xf32> to vector<8x256xf32>
    %54 = vector.shape_cast %51 : vector<8x256xf32> to vector<1x8x256xf32>
    tpu.vector_store %arg12[%c5, %c0_20, %c0_21], %54 {strides = array<i32>} : memref<8x8x256xf32, #tpu.memory_space<vmem>>, vector<1x8x256xf32>,
    %55 = vector.extract_strided_slice %4 {offsets = [48, 0], sizes = [8, 256], strides = [1, 1]} : vector<64x256xf32> to vector<8x256xf32>
    %56 = vector.extract_strided_slice %6 {offsets = [8, 0], sizes = [8, 256], strides = [1, 1]} : vector<64x256xf32> to vector<8x256xf32>
    %57 = arith.addf %55, %56 : vector<8x256xf32>
    %58 = vector.broadcast %2 : vector<1x256xf32> to vector<8x256xf32>
    %59 = arith.addf %57, %58 : vector<8x256xf32>
    %c6 = arith.constant 6 : index
    %c0_22 = arith.constant 0 : index
    %c0_23 = arith.constant 0 : index
    %60 = vector.load %arg12[%c6, %c0_22, %c0_23] : memref<8x8x256xf32, #tpu.memory_space<vmem>>, vector<1x8x256xf32>
    %61 = vector.shape_cast %60 : vector<1x8x256xf32> to vector<8x256xf32>
    %62 = vector.shape_cast %59 : vector<8x256xf32> to vector<1x8x256xf32>
    tpu.vector_store %arg12[%c6, %c0_22, %c0_23], %62 {strides = array<i32>} : memref<8x8x256xf32, #tpu.memory_space<vmem>>, vector<1x8x256xf32>,
    %63 = vector.extract_strided_slice %4 {offsets = [56, 0], sizes = [8, 256], strides = [1, 1]} : vector<64x256xf32> to vector<8x256xf32>
    %64 = vector.extract_strided_slice %6 {offsets = [0, 0], sizes = [8, 256], strides = [1, 1]} : vector<64x256xf32> to vector<8x256xf32>
    %65 = arith.addf %63, %64 : vector<8x256xf32>
    %66 = vector.broadcast %2 : vector<1x256xf32> to vector<8x256xf32>
    %67 = arith.addf %65, %66 : vector<8x256xf32>
    %c7 = arith.constant 7 : index
    %c0_24 = arith.constant 0 : index
    %c0_25 = arith.constant 0 : index
    %68 = vector.load %arg12[%c7, %c0_24, %c0_25] : memref<8x8x256xf32, #tpu.memory_space<vmem>>, vector<1x8x256xf32>
    %69 = vector.shape_cast %68 : vector<1x8x256xf32> to vector<8x256xf32>
    %70 = vector.shape_cast %67 : vector<8x256xf32> to vector<1x8x256xf32>
    tpu.vector_store %arg12[%c7, %c0_24, %c0_25], %70 {strides = array<i32>} : memref<8x8x256xf32, #tpu.memory_space<vmem>>, vector<1x8x256xf32>,
    %c0_26 = arith.constant 0 : index
    %c0_27 = arith.constant 0 : index
    %71 = vector.load %arg4[%c0_26, %c0_27] : memref<64x256xf32, #tpu.memory_space<vmem>>, vector<64x256xf32>
    %cst_28 = arith.constant 0.000000e+00 : f32
    %72 = vector.broadcast %cst_28 : f32 to vector<8x64xf32>
    %c0_i32 = arith.constant 0 : i32
    %73 = arith.index_cast %c0_i32 : i32 to index
    %c0_29 = arith.constant 0 : index
    %c0_30 = arith.constant 0 : index
    %74 = vector.load %arg12[%73, %c0_29, %c0_30] : memref<8x8x256xf32, #tpu.memory_space<vmem>>, vector<1x8x256xf32>
    %75 = vector.shape_cast %74 : vector<1x8x256xf32> to vector<8x256xf32>
    %cst_31 = arith.constant dense<0.000000e+00> : vector<8x256xf32>
    %76 = tpu.matmul %72, %71, %cst_31 {dimension_numbers = #tpu.dot_dimension_numbers<[1], [0], [0], [1], [0, 0, 1, 1], [], []>} : vector<8x64xf32>, vector<64x256xf32>, vector<8x256xf32> -> vector<8x256xf32>
    %77 = arith.addf %75, %76 : vector<8x256xf32>
    %78 = vector.extract_strided_slice %77 {offsets = [0, 0], sizes = [8, 64], strides = [1, 1]} : vector<8x256xf32> to vector<8x64xf32>
    %79 = arith.negf %78 : vector<8x64xf32>
    %80 = math.exp %79 : vector<8x64xf32>
    %cst_32 = arith.constant 1.000000e+00 : f32
    %81 = vector.broadcast %cst_32 : f32 to vector<8x64xf32>
    %82 = arith.addf %81, %80 : vector<8x64xf32>
    %83 = arith.divf %81, %82 : vector<8x64xf32>
    %84 = vector.extract_strided_slice %77 {offsets = [0, 64], sizes = [8, 64], strides = [1, 1]} : vector<8x256xf32> to vector<8x64xf32>
    %85 = arith.negf %84 : vector<8x64xf32>
    %86 = math.exp %85 : vector<8x64xf32>
    %cst_33 = arith.constant 1.000000e+00 : f32
    %87 = vector.broadcast %cst_33 : f32 to vector<8x64xf32>
    %88 = arith.addf %87, %86 : vector<8x64xf32>
    %89 = arith.divf %87, %88 : vector<8x64xf32>
    %90 = vector.extract_strided_slice %77 {offsets = [0, 128], sizes = [8, 64], strides = [1, 1]} : vector<8x256xf32> to vector<8x64xf32>
    %91 = math.tanh %90 : vector<8x64xf32>
    %92 = vector.extract_strided_slice %77 {offsets = [0, 192], sizes = [8, 64], strides = [1, 1]} : vector<8x256xf32> to vector<8x64xf32>
    %93 = arith.negf %92 : vector<8x64xf32>
    %94 = math.exp %93 : vector<8x64xf32>
    %cst_34 = arith.constant 1.000000e+00 : f32
    %95 = vector.broadcast %cst_34 : f32 to vector<8x64xf32>
    %96 = arith.addf %95, %94 : vector<8x64xf32>
    %97 = arith.divf %95, %96 : vector<8x64xf32>
    %98 = arith.mulf %89, %72 : vector<8x64xf32>
    %99 = arith.mulf %83, %91 : vector<8x64xf32>
    %100 = arith.addf %98, %99 : vector<8x64xf32>
    %101 = math.tanh %100 : vector<8x64xf32>
    %102 = arith.mulf %97, %101 : vector<8x64xf32>
    %103 = arith.index_cast %c0_i32 : i32 to index
    %c0_35 = arith.constant 0 : index
    %c0_36 = arith.constant 0 : index
    %104 = vector.load %arg13[%103, %c0_35, %c0_36] : memref<8x8x64xf32, #tpu.memory_space<vmem>>, vector<1x8x64xf32>
    %105 = vector.shape_cast %104 : vector<1x8x64xf32> to vector<8x64xf32>
    %106 = vector.shape_cast %102 : vector<8x64xf32> to vector<1x8x64xf32>
    tpu.vector_store %arg13[%103, %c0_35, %c0_36], %106 {strides = array<i32>} : memref<8x8x64xf32, #tpu.memory_space<vmem>>, vector<1x8x64xf32>,
    %c1_i32 = arith.constant 1 : i32
    %107 = arith.index_cast %c1_i32 : i32 to index
    %c0_37 = arith.constant 0 : index
    %c0_38 = arith.constant 0 : index
    %108 = vector.load %arg12[%107, %c0_37, %c0_38] : memref<8x8x256xf32, #tpu.memory_space<vmem>>, vector<1x8x256xf32>
    %109 = vector.shape_cast %108 : vector<1x8x256xf32> to vector<8x256xf32>
    %cst_39 = arith.constant dense<0.000000e+00> : vector<8x256xf32>
    %110 = tpu.matmul %102, %71, %cst_39 {dimension_numbers = #tpu.dot_dimension_numbers<[1], [0], [0], [1], [0, 0, 1, 1], [], []>} : vector<8x64xf32>, vector<64x256xf32>, vector<8x256xf32> -> vector<8x256xf32>
    %111 = arith.addf %109, %110 : vector<8x256xf32>
    %112 = vector.extract_strided_slice %111 {offsets = [0, 0], sizes = [8, 64], strides = [1, 1]} : vector<8x256xf32> to vector<8x64xf32>
    %113 = arith.negf %112 : vector<8x64xf32>
    %114 = math.exp %113 : vector<8x64xf32>
    %cst_40 = arith.constant 1.000000e+00 : f32
    %115 = vector.broadcast %cst_40 : f32 to vector<8x64xf32>
    %116 = arith.addf %115, %114 : vector<8x64xf32>
    %117 = arith.divf %115, %116 : vector<8x64xf32>
    %118 = vector.extract_strided_slice %111 {offsets = [0, 64], sizes = [8, 64], strides = [1, 1]} : vector<8x256xf32> to vector<8x64xf32>
    %119 = arith.negf %118 : vector<8x64xf32>
    %120 = math.exp %119 : vector<8x64xf32>
    %cst_41 = arith.constant 1.000000e+00 : f32
    %121 = vector.broadcast %cst_41 : f32 to vector<8x64xf32>
    %122 = arith.addf %121, %120 : vector<8x64xf32>
    %123 = arith.divf %121, %122 : vector<8x64xf32>
    %124 = vector.extract_strided_slice %111 {offsets = [0, 128], sizes = [8, 64], strides = [1, 1]} : vector<8x256xf32> to vector<8x64xf32>
    %125 = math.tanh %124 : vector<8x64xf32>
    %126 = vector.extract_strided_slice %111 {offsets = [0, 192], sizes = [8, 64], strides = [1, 1]} : vector<8x256xf32> to vector<8x64xf32>
    %127 = arith.negf %126 : vector<8x64xf32>
    %128 = math.exp %127 : vector<8x64xf32>
    %cst_42 = arith.constant 1.000000e+00 : f32
    %129 = vector.broadcast %cst_42 : f32 to vector<8x64xf32>
    %130 = arith.addf %129, %128 : vector<8x64xf32>
    %131 = arith.divf %129, %130 : vector<8x64xf32>
    %132 = arith.mulf %123, %100 : vector<8x64xf32>
    %133 = arith.mulf %117, %125 : vector<8x64xf32>
    %134 = arith.addf %132, %133 : vector<8x64xf32>
    %135 = math.tanh %134 : vector<8x64xf32>
    %136 = arith.mulf %131, %135 : vector<8x64xf32>
    %137 = arith.index_cast %c1_i32 : i32 to index
    %c0_43 = arith.constant 0 : index
    %c0_44 = arith.constant 0 : index
    %138 = vector.load %arg13[%137, %c0_43, %c0_44] : memref<8x8x64xf32, #tpu.memory_space<vmem>>, vector<1x8x64xf32>
    %139 = vector.shape_cast %138 : vector<1x8x64xf32> to vector<8x64xf32>
    %140 = vector.shape_cast %136 : vector<8x64xf32> to vector<1x8x64xf32>
    tpu.vector_store %arg13[%137, %c0_43, %c0_44], %140 {strides = array<i32>} : memref<8x8x64xf32, #tpu.memory_space<vmem>>, vector<1x8x64xf32>,
    %c2_i32 = arith.constant 2 : i32
    %141 = arith.index_cast %c2_i32 : i32 to index
    %c0_45 = arith.constant 0 : index
    %c0_46 = arith.constant 0 : index
    %142 = vector.load %arg12[%141, %c0_45, %c0_46] : memref<8x8x256xf32, #tpu.memory_space<vmem>>, vector<1x8x256xf32>
    %143 = vector.shape_cast %142 : vector<1x8x256xf32> to vector<8x256xf32>
    %cst_47 = arith.constant dense<0.000000e+00> : vector<8x256xf32>
    %144 = tpu.matmul %136, %71, %cst_47 {dimension_numbers = #tpu.dot_dimension_numbers<[1], [0], [0], [1], [0, 0, 1, 1], [], []>} : vector<8x64xf32>, vector<64x256xf32>, vector<8x256xf32> -> vector<8x256xf32>
    %145 = arith.addf %143, %144 : vector<8x256xf32>
    %146 = vector.extract_strided_slice %145 {offsets = [0, 0], sizes = [8, 64], strides = [1, 1]} : vector<8x256xf32> to vector<8x64xf32>
    %147 = arith.negf %146 : vector<8x64xf32>
    %148 = math.exp %147 : vector<8x64xf32>
    %cst_48 = arith.constant 1.000000e+00 : f32
    %149 = vector.broadcast %cst_48 : f32 to vector<8x64xf32>
    %150 = arith.addf %149, %148 : vector<8x64xf32>
    %151 = arith.divf %149, %150 : vector<8x64xf32>
    %152 = vector.extract_strided_slice %145 {offsets = [0, 64], sizes = [8, 64], strides = [1, 1]} : vector<8x256xf32> to vector<8x64xf32>
    %153 = arith.negf %152 : vector<8x64xf32>
    %154 = math.exp %153 : vector<8x64xf32>
    %cst_49 = arith.constant 1.000000e+00 : f32
    %155 = vector.broadcast %cst_49 : f32 to vector<8x64xf32>
    %156 = arith.addf %155, %154 : vector<8x64xf32>
    %157 = arith.divf %155, %156 : vector<8x64xf32>
    %158 = vector.extract_strided_slice %145 {offsets = [0, 128], sizes = [8, 64], strides = [1, 1]} : vector<8x256xf32> to vector<8x64xf32>
    %159 = math.tanh %158 : vector<8x64xf32>
    %160 = vector.extract_strided_slice %145 {offsets = [0, 192], sizes = [8, 64], strides = [1, 1]} : vector<8x256xf32> to vector<8x64xf32>
    %161 = arith.negf %160 : vector<8x64xf32>
    %162 = math.exp %161 : vector<8x64xf32>
    %cst_50 = arith.constant 1.000000e+00 : f32
    %163 = vector.broadcast %cst_50 : f32 to vector<8x64xf32>
    %164 = arith.addf %163, %162 : vector<8x64xf32>
    %165 = arith.divf %163, %164 : vector<8x64xf32>
    %166 = arith.mulf %157, %134 : vector<8x64xf32>
    %167 = arith.mulf %151, %159 : vector<8x64xf32>
    %168 = arith.addf %166, %167 : vector<8x64xf32>
    %169 = math.tanh %168 : vector<8x64xf32>
    %170 = arith.mulf %165, %169 : vector<8x64xf32>
    %171 = arith.index_cast %c2_i32 : i32 to index
    %c0_51 = arith.constant 0 : index
    %c0_52 = arith.constant 0 : index
    %172 = vector.load %arg13[%171, %c0_51, %c0_52] : memref<8x8x64xf32, #tpu.memory_space<vmem>>, vector<1x8x64xf32>
    %173 = vector.shape_cast %172 : vector<1x8x64xf32> to vector<8x64xf32>
    %174 = vector.shape_cast %170 : vector<8x64xf32> to vector<1x8x64xf32>
    tpu.vector_store %arg13[%171, %c0_51, %c0_52], %174 {strides = array<i32>} : memref<8x8x64xf32, #tpu.memory_space<vmem>>, vector<1x8x64xf32>,
    %c3_i32 = arith.constant 3 : i32
    %175 = arith.index_cast %c3_i32 : i32 to index
    %c0_53 = arith.constant 0 : index
    %c0_54 = arith.constant 0 : index
    %176 = vector.load %arg12[%175, %c0_53, %c0_54] : memref<8x8x256xf32, #tpu.memory_space<vmem>>, vector<1x8x256xf32>
    %177 = vector.shape_cast %176 : vector<1x8x256xf32> to vector<8x256xf32>
    %cst_55 = arith.constant dense<0.000000e+00> : vector<8x256xf32>
    %178 = tpu.matmul %170, %71, %cst_55 {dimension_numbers = #tpu.dot_dimension_numbers<[1], [0], [0], [1], [0, 0, 1, 1], [], []>} : vector<8x64xf32>, vector<64x256xf32>, vector<8x256xf32> -> vector<8x256xf32>
    %179 = arith.addf %177, %178 : vector<8x256xf32>
    %180 = vector.extract_strided_slice %179 {offsets = [0, 0], sizes = [8, 64], strides = [1, 1]} : vector<8x256xf32> to vector<8x64xf32>
    %181 = arith.negf %180 : vector<8x64xf32>
    %182 = math.exp %181 : vector<8x64xf32>
    %cst_56 = arith.constant 1.000000e+00 : f32
    %183 = vector.broadcast %cst_56 : f32 to vector<8x64xf32>
    %184 = arith.addf %183, %182 : vector<8x64xf32>
    %185 = arith.divf %183, %184 : vector<8x64xf32>
    %186 = vector.extract_strided_slice %179 {offsets = [0, 64], sizes = [8, 64], strides = [1, 1]} : vector<8x256xf32> to vector<8x64xf32>
    %187 = arith.negf %186 : vector<8x64xf32>
    %188 = math.exp %187 : vector<8x64xf32>
    %cst_57 = arith.constant 1.000000e+00 : f32
    %189 = vector.broadcast %cst_57 : f32 to vector<8x64xf32>
    %190 = arith.addf %189, %188 : vector<8x64xf32>
    %191 = arith.divf %189, %190 : vector<8x64xf32>
    %192 = vector.extract_strided_slice %179 {offsets = [0, 128], sizes = [8, 64], strides = [1, 1]} : vector<8x256xf32> to vector<8x64xf32>
    %193 = math.tanh %192 : vector<8x64xf32>
    %194 = vector.extract_strided_slice %179 {offsets = [0, 192], sizes = [8, 64], strides = [1, 1]} : vector<8x256xf32> to vector<8x64xf32>
    %195 = arith.negf %194 : vector<8x64xf32>
    %196 = math.exp %195 : vector<8x64xf32>
    %cst_58 = arith.constant 1.000000e+00 : f32
    %197 = vector.broadcast %cst_58 : f32 to vector<8x64xf32>
    %198 = arith.addf %197, %196 : vector<8x64xf32>
    %199 = arith.divf %197, %198 : vector<8x64xf32>
    %200 = arith.mulf %191, %168 : vector<8x64xf32>
    %201 = arith.mulf %185, %193 : vector<8x64xf32>
    %202 = arith.addf %200, %201 : vector<8x64xf32>
    %203 = math.tanh %202 : vector<8x64xf32>
    %204 = arith.mulf %199, %203 : vector<8x64xf32>
    %205 = arith.index_cast %c3_i32 : i32 to index
    %c0_59 = arith.constant 0 : index
    %c0_60 = arith.constant 0 : index
    %206 = vector.load %arg13[%205, %c0_59, %c0_60] : memref<8x8x64xf32, #tpu.memory_space<vmem>>, vector<1x8x64xf32>
    %207 = vector.shape_cast %206 : vector<1x8x64xf32> to vector<8x64xf32>
    %208 = vector.shape_cast %204 : vector<8x64xf32> to vector<1x8x64xf32>
    tpu.vector_store %arg13[%205, %c0_59, %c0_60], %208 {strides = array<i32>} : memref<8x8x64xf32, #tpu.memory_space<vmem>>, vector<1x8x64xf32>,
    %c4_i32 = arith.constant 4 : i32
    %209 = arith.index_cast %c4_i32 : i32 to index
    %c0_61 = arith.constant 0 : index
    %c0_62 = arith.constant 0 : index
    %210 = vector.load %arg12[%209, %c0_61, %c0_62] : memref<8x8x256xf32, #tpu.memory_space<vmem>>, vector<1x8x256xf32>
    %211 = vector.shape_cast %210 : vector<1x8x256xf32> to vector<8x256xf32>
    %cst_63 = arith.constant dense<0.000000e+00> : vector<8x256xf32>
    %212 = tpu.matmul %204, %71, %cst_63 {dimension_numbers = #tpu.dot_dimension_numbers<[1], [0], [0], [1], [0, 0, 1, 1], [], []>} : vector<8x64xf32>, vector<64x256xf32>, vector<8x256xf32> -> vector<8x256xf32>
    %213 = arith.addf %211, %212 : vector<8x256xf32>
    %214 = vector.extract_strided_slice %213 {offsets = [0, 0], sizes = [8, 64], strides = [1, 1]} : vector<8x256xf32> to vector<8x64xf32>
    %215 = arith.negf %214 : vector<8x64xf32>
    %216 = math.exp %215 : vector<8x64xf32>
    %cst_64 = arith.constant 1.000000e+00 : f32
    %217 = vector.broadcast %cst_64 : f32 to vector<8x64xf32>
    %218 = arith.addf %217, %216 : vector<8x64xf32>
    %219 = arith.divf %217, %218 : vector<8x64xf32>
    %220 = vector.extract_strided_slice %213 {offsets = [0, 64], sizes = [8, 64], strides = [1, 1]} : vector<8x256xf32> to vector<8x64xf32>
    %221 = arith.negf %220 : vector<8x64xf32>
    %222 = math.exp %221 : vector<8x64xf32>
    %cst_65 = arith.constant 1.000000e+00 : f32
    %223 = vector.broadcast %cst_65 : f32 to vector<8x64xf32>
    %224 = arith.addf %223, %222 : vector<8x64xf32>
    %225 = arith.divf %223, %224 : vector<8x64xf32>
    %226 = vector.extract_strided_slice %213 {offsets = [0, 128], sizes = [8, 64], strides = [1, 1]} : vector<8x256xf32> to vector<8x64xf32>
    %227 = math.tanh %226 : vector<8x64xf32>
    %228 = vector.extract_strided_slice %213 {offsets = [0, 192], sizes = [8, 64], strides = [1, 1]} : vector<8x256xf32> to vector<8x64xf32>
    %229 = arith.negf %228 : vector<8x64xf32>
    %230 = math.exp %229 : vector<8x64xf32>
    %cst_66 = arith.constant 1.000000e+00 : f32
    %231 = vector.broadcast %cst_66 : f32 to vector<8x64xf32>
    %232 = arith.addf %231, %230 : vector<8x64xf32>
    %233 = arith.divf %231, %232 : vector<8x64xf32>
    %234 = arith.mulf %225, %202 : vector<8x64xf32>
    %235 = arith.mulf %219, %227 : vector<8x64xf32>
    %236 = arith.addf %234, %235 : vector<8x64xf32>
    %237 = math.tanh %236 : vector<8x64xf32>
    %238 = arith.mulf %233, %237 : vector<8x64xf32>
    %239 = arith.index_cast %c4_i32 : i32 to index
    %c0_67 = arith.constant 0 : index
    %c0_68 = arith.constant 0 : index
    %240 = vector.load %arg13[%239, %c0_67, %c0_68] : memref<8x8x64xf32, #tpu.memory_space<vmem>>, vector<1x8x64xf32>
    %241 = vector.shape_cast %240 : vector<1x8x64xf32> to vector<8x64xf32>
    %242 = vector.shape_cast %238 : vector<8x64xf32> to vector<1x8x64xf32>
    tpu.vector_store %arg13[%239, %c0_67, %c0_68], %242 {strides = array<i32>} : memref<8x8x64xf32, #tpu.memory_space<vmem>>, vector<1x8x64xf32>,
    %c5_i32 = arith.constant 5 : i32
    %243 = arith.index_cast %c5_i32 : i32 to index
    %c0_69 = arith.constant 0 : index
    %c0_70 = arith.constant 0 : index
    %244 = vector.load %arg12[%243, %c0_69, %c0_70] : memref<8x8x256xf32, #tpu.memory_space<vmem>>, vector<1x8x256xf32>
    %245 = vector.shape_cast %244 : vector<1x8x256xf32> to vector<8x256xf32>
    %cst_71 = arith.constant dense<0.000000e+00> : vector<8x256xf32>
    %246 = tpu.matmul %238, %71, %cst_71 {dimension_numbers = #tpu.dot_dimension_numbers<[1], [0], [0], [1], [0, 0, 1, 1], [], []>} : vector<8x64xf32>, vector<64x256xf32>, vector<8x256xf32> -> vector<8x256xf32>
    %247 = arith.addf %245, %246 : vector<8x256xf32>
    %248 = vector.extract_strided_slice %247 {offsets = [0, 0], sizes = [8, 64], strides = [1, 1]} : vector<8x256xf32> to vector<8x64xf32>
    %249 = arith.negf %248 : vector<8x64xf32>
    %250 = math.exp %249 : vector<8x64xf32>
    %cst_72 = arith.constant 1.000000e+00 : f32
    %251 = vector.broadcast %cst_72 : f32 to vector<8x64xf32>
    %252 = arith.addf %251, %250 : vector<8x64xf32>
    %253 = arith.divf %251, %252 : vector<8x64xf32>
    %254 = vector.extract_strided_slice %247 {offsets = [0, 64], sizes = [8, 64], strides = [1, 1]} : vector<8x256xf32> to vector<8x64xf32>
    %255 = arith.negf %254 : vector<8x64xf32>
    %256 = math.exp %255 : vector<8x64xf32>
    %cst_73 = arith.constant 1.000000e+00 : f32
    %257 = vector.broadcast %cst_73 : f32 to vector<8x64xf32>
    %258 = arith.addf %257, %256 : vector<8x64xf32>
    %259 = arith.divf %257, %258 : vector<8x64xf32>
    %260 = vector.extract_strided_slice %247 {offsets = [0, 128], sizes = [8, 64], strides = [1, 1]} : vector<8x256xf32> to vector<8x64xf32>
    %261 = math.tanh %260 : vector<8x64xf32>
    %262 = vector.extract_strided_slice %247 {offsets = [0, 192], sizes = [8, 64], strides = [1, 1]} : vector<8x256xf32> to vector<8x64xf32>
    %263 = arith.negf %262 : vector<8x64xf32>
    %264 = math.exp %263 : vector<8x64xf32>
    %cst_74 = arith.constant 1.000000e+00 : f32
    %265 = vector.broadcast %cst_74 : f32 to vector<8x64xf32>
    %266 = arith.addf %265, %264 : vector<8x64xf32>
    %267 = arith.divf %265, %266 : vector<8x64xf32>
    %268 = arith.mulf %259, %236 : vector<8x64xf32>
    %269 = arith.mulf %253, %261 : vector<8x64xf32>
    %270 = arith.addf %268, %269 : vector<8x64xf32>
    %271 = math.tanh %270 : vector<8x64xf32>
    %272 = arith.mulf %267, %271 : vector<8x64xf32>
    %273 = arith.index_cast %c5_i32 : i32 to index
    %c0_75 = arith.constant 0 : index
    %c0_76 = arith.constant 0 : index
    %274 = vector.load %arg13[%273, %c0_75, %c0_76] : memref<8x8x64xf32, #tpu.memory_space<vmem>>, vector<1x8x64xf32>
    %275 = vector.shape_cast %274 : vector<1x8x64xf32> to vector<8x64xf32>
    %276 = vector.shape_cast %272 : vector<8x64xf32> to vector<1x8x64xf32>
    tpu.vector_store %arg13[%273, %c0_75, %c0_76], %276 {strides = array<i32>} : memref<8x8x64xf32, #tpu.memory_space<vmem>>, vector<1x8x64xf32>,
    %c6_i32 = arith.constant 6 : i32
    %277 = arith.index_cast %c6_i32 : i32 to index
    %c0_77 = arith.constant 0 : index
    %c0_78 = arith.constant 0 : index
    %278 = vector.load %arg12[%277, %c0_77, %c0_78] : memref<8x8x256xf32, #tpu.memory_space<vmem>>, vector<1x8x256xf32>
    %279 = vector.shape_cast %278 : vector<1x8x256xf32> to vector<8x256xf32>
    %cst_79 = arith.constant dense<0.000000e+00> : vector<8x256xf32>
    %280 = tpu.matmul %272, %71, %cst_79 {dimension_numbers = #tpu.dot_dimension_numbers<[1], [0], [0], [1], [0, 0, 1, 1], [], []>} : vector<8x64xf32>, vector<64x256xf32>, vector<8x256xf32> -> vector<8x256xf32>
    %281 = arith.addf %279, %280 : vector<8x256xf32>
    %282 = vector.extract_strided_slice %281 {offsets = [0, 0], sizes = [8, 64], strides = [1, 1]} : vector<8x256xf32> to vector<8x64xf32>
    %283 = arith.negf %282 : vector<8x64xf32>
    %284 = math.exp %283 : vector<8x64xf32>
    %cst_80 = arith.constant 1.000000e+00 : f32
    %285 = vector.broadcast %cst_80 : f32 to vector<8x64xf32>
    %286 = arith.addf %285, %284 : vector<8x64xf32>
    %287 = arith.divf %285, %286 : vector<8x64xf32>
    %288 = vector.extract_strided_slice %281 {offsets = [0, 64], sizes = [8, 64], strides = [1, 1]} : vector<8x256xf32> to vector<8x64xf32>
    %289 = arith.negf %288 : vector<8x64xf32>
    %290 = math.exp %289 : vector<8x64xf32>
    %cst_81 = arith.constant 1.000000e+00 : f32
    %291 = vector.broadcast %cst_81 : f32 to vector<8x64xf32>
    %292 = arith.addf %291, %290 : vector<8x64xf32>
    %293 = arith.divf %291, %292 : vector<8x64xf32>
    %294 = vector.extract_strided_slice %281 {offsets = [0, 128], sizes = [8, 64], strides = [1, 1]} : vector<8x256xf32> to vector<8x64xf32>
    %295 = math.tanh %294 : vector<8x64xf32>
    %296 = vector.extract_strided_slice %281 {offsets = [0, 192], sizes = [8, 64], strides = [1, 1]} : vector<8x256xf32> to vector<8x64xf32>
    %297 = arith.negf %296 : vector<8x64xf32>
    %298 = math.exp %297 : vector<8x64xf32>
    %cst_82 = arith.constant 1.000000e+00 : f32
    %299 = vector.broadcast %cst_82 : f32 to vector<8x64xf32>
    %300 = arith.addf %299, %298 : vector<8x64xf32>
    %301 = arith.divf %299, %300 : vector<8x64xf32>
    %302 = arith.mulf %293, %270 : vector<8x64xf32>
    %303 = arith.mulf %287, %295 : vector<8x64xf32>
    %304 = arith.addf %302, %303 : vector<8x64xf32>
    %305 = math.tanh %304 : vector<8x64xf32>
    %306 = arith.mulf %301, %305 : vector<8x64xf32>
    %307 = arith.index_cast %c6_i32 : i32 to index
    %c0_83 = arith.constant 0 : index
    %c0_84 = arith.constant 0 : index
    %308 = vector.load %arg13[%307, %c0_83, %c0_84] : memref<8x8x64xf32, #tpu.memory_space<vmem>>, vector<1x8x64xf32>
    %309 = vector.shape_cast %308 : vector<1x8x64xf32> to vector<8x64xf32>
    %310 = vector.shape_cast %306 : vector<8x64xf32> to vector<1x8x64xf32>
    tpu.vector_store %arg13[%307, %c0_83, %c0_84], %310 {strides = array<i32>} : memref<8x8x64xf32, #tpu.memory_space<vmem>>, vector<1x8x64xf32>,
    %c7_i32 = arith.constant 7 : i32
    %311 = arith.index_cast %c7_i32 : i32 to index
    %c0_85 = arith.constant 0 : index
    %c0_86 = arith.constant 0 : index
    %312 = vector.load %arg12[%311, %c0_85, %c0_86] : memref<8x8x256xf32, #tpu.memory_space<vmem>>, vector<1x8x256xf32>
    %313 = vector.shape_cast %312 : vector<1x8x256xf32> to vector<8x256xf32>
    %cst_87 = arith.constant dense<0.000000e+00> : vector<8x256xf32>
    %314 = tpu.matmul %306, %71, %cst_87 {dimension_numbers = #tpu.dot_dimension_numbers<[1], [0], [0], [1], [0, 0, 1, 1], [], []>} : vector<8x64xf32>, vector<64x256xf32>, vector<8x256xf32> -> vector<8x256xf32>
    %315 = arith.addf %313, %314 : vector<8x256xf32>
    %316 = vector.extract_strided_slice %315 {offsets = [0, 0], sizes = [8, 64], strides = [1, 1]} : vector<8x256xf32> to vector<8x64xf32>
    %317 = arith.negf %316 : vector<8x64xf32>
    %318 = math.exp %317 : vector<8x64xf32>
    %cst_88 = arith.constant 1.000000e+00 : f32
    %319 = vector.broadcast %cst_88 : f32 to vector<8x64xf32>
    %320 = arith.addf %319, %318 : vector<8x64xf32>
    %321 = arith.divf %319, %320 : vector<8x64xf32>
    %322 = vector.extract_strided_slice %315 {offsets = [0, 64], sizes = [8, 64], strides = [1, 1]} : vector<8x256xf32> to vector<8x64xf32>
    %323 = arith.negf %322 : vector<8x64xf32>
    %324 = math.exp %323 : vector<8x64xf32>
    %cst_89 = arith.constant 1.000000e+00 : f32
    %325 = vector.broadcast %cst_89 : f32 to vector<8x64xf32>
    %326 = arith.addf %325, %324 : vector<8x64xf32>
    %327 = arith.divf %325, %326 : vector<8x64xf32>
    %328 = vector.extract_strided_slice %315 {offsets = [0, 128], sizes = [8, 64], strides = [1, 1]} : vector<8x256xf32> to vector<8x64xf32>
    %329 = math.tanh %328 : vector<8x64xf32>
    %330 = vector.extract_strided_slice %315 {offsets = [0, 192], sizes = [8, 64], strides = [1, 1]} : vector<8x256xf32> to vector<8x64xf32>
    %331 = arith.negf %330 : vector<8x64xf32>
    %332 = math.exp %331 : vector<8x64xf32>
    %cst_90 = arith.constant 1.000000e+00 : f32
    %333 = vector.broadcast %cst_90 : f32 to vector<8x64xf32>
    %334 = arith.addf %333, %332 : vector<8x64xf32>
    %335 = arith.divf %333, %334 : vector<8x64xf32>
    %336 = arith.mulf %327, %304 : vector<8x64xf32>
    %337 = arith.mulf %321, %329 : vector<8x64xf32>
    %338 = arith.addf %336, %337 : vector<8x64xf32>
    %339 = math.tanh %338 : vector<8x64xf32>
    %340 = arith.mulf %335, %339 : vector<8x64xf32>
    %341 = arith.index_cast %c7_i32 : i32 to index
    %c0_91 = arith.constant 0 : index
    %c0_92 = arith.constant 0 : index
    %342 = vector.load %arg13[%341, %c0_91, %c0_92] : memref<8x8x64xf32, #tpu.memory_space<vmem>>, vector<1x8x64xf32>
    %343 = vector.shape_cast %342 : vector<1x8x64xf32> to vector<8x64xf32>
    %344 = vector.shape_cast %340 : vector<8x64xf32> to vector<1x8x64xf32>
    tpu.vector_store %arg13[%341, %c0_91, %c0_92], %344 {strides = array<i32>} : memref<8x8x64xf32, #tpu.memory_space<vmem>>, vector<1x8x64xf32>,
    %c8_i32 = arith.constant 8 : i32
    %c0_93 = arith.constant 0 : index
    %c0_94 = arith.constant 0 : index
    %c0_95 = arith.constant 0 : index
    %345 = vector.load %arg13[%c0_93, %c0_94, %c0_95] : memref<8x8x64xf32, #tpu.memory_space<vmem>>, vector<8x8x64xf32>
    %346 = vector.shape_cast %345 : vector<8x8x64xf32> to vector<64x64xf32>
    %c0_96 = arith.constant 0 : index
    %c0_97 = arith.constant 0 : index
    %347 = vector.load %arg7[%c0_96, %c0_97] : memref<1x256xf32, #tpu.memory_space<vmem>>, vector<1x256xf32>
    %c0_98 = arith.constant 0 : index
    %c0_99 = arith.constant 0 : index
    %348 = vector.load %arg5[%c0_98, %c0_99] : memref<64x256xf32, #tpu.memory_space<vmem>>, vector<64x256xf32>
    %cst_100 = arith.constant dense<0.000000e+00> : vector<64x256xf32>
    %349 = tpu.matmul %346, %348, %cst_100 {dimension_numbers = #tpu.dot_dimension_numbers<[1], [0], [0], [1], [0, 0, 1, 1], [], []>} : vector<64x64xf32>, vector<64x256xf32>, vector<64x256xf32> -> vector<64x256xf32>
    %c0_101 = arith.constant 0 : index
    %c0_102 = arith.constant 0 : index
    %350 = vector.load %arg6[%c0_101, %c0_102] : memref<64x256xf32, #tpu.memory_space<vmem>>, vector<64x256xf32>
    %cst_103 = arith.constant dense<0.000000e+00> : vector<64x256xf32>
    %351 = tpu.matmul %346, %350, %cst_103 {dimension_numbers = #tpu.dot_dimension_numbers<[1], [0], [0], [1], [0, 0, 1, 1], [], []>} : vector<64x64xf32>, vector<64x256xf32>, vector<64x256xf32> -> vector<64x256xf32>
    %352 = vector.extract_strided_slice %349 {offsets = [0, 0], sizes = [8, 256], strides = [1, 1]} : vector<64x256xf32> to vector<8x256xf32>
    %353 = vector.extract_strided_slice %351 {offsets = [56, 0], sizes = [8, 256], strides = [1, 1]} : vector<64x256xf32> to vector<8x256xf32>
    %354 = arith.addf %352, %353 : vector<8x256xf32>
    %355 = vector.broadcast %347 : vector<1x256xf32> to vector<8x256xf32>
    %356 = arith.addf %354, %355 : vector<8x256xf32>
    %c0_104 = arith.constant 0 : index
    %c0_105 = arith.constant 0 : index
    %c0_106 = arith.constant 0 : index
    %357 = vector.load %arg12[%c0_104, %c0_105, %c0_106] : memref<8x8x256xf32, #tpu.memory_space<vmem>>, vector<1x8x256xf32>
    %358 = vector.shape_cast %357 : vector<1x8x256xf32> to vector<8x256xf32>
    %359 = vector.shape_cast %356 : vector<8x256xf32> to vector<1x8x256xf32>
    tpu.vector_store %arg12[%c0_104, %c0_105, %c0_106], %359 {strides = array<i32>} : memref<8x8x256xf32, #tpu.memory_space<vmem>>, vector<1x8x256xf32>,
    %360 = vector.extract_strided_slice %349 {offsets = [8, 0], sizes = [8, 256], strides = [1, 1]} : vector<64x256xf32> to vector<8x256xf32>
    %361 = vector.extract_strided_slice %351 {offsets = [48, 0], sizes = [8, 256], strides = [1, 1]} : vector<64x256xf32> to vector<8x256xf32>
    %362 = arith.addf %360, %361 : vector<8x256xf32>
    %363 = vector.broadcast %347 : vector<1x256xf32> to vector<8x256xf32>
    %364 = arith.addf %362, %363 : vector<8x256xf32>
    %c1_107 = arith.constant 1 : index
    %c0_108 = arith.constant 0 : index
    %c0_109 = arith.constant 0 : index
    %365 = vector.load %arg12[%c1_107, %c0_108, %c0_109] : memref<8x8x256xf32, #tpu.memory_space<vmem>>, vector<1x8x256xf32>
    %366 = vector.shape_cast %365 : vector<1x8x256xf32> to vector<8x256xf32>
    %367 = vector.shape_cast %364 : vector<8x256xf32> to vector<1x8x256xf32>
    tpu.vector_store %arg12[%c1_107, %c0_108, %c0_109], %367 {strides = array<i32>} : memref<8x8x256xf32, #tpu.memory_space<vmem>>, vector<1x8x256xf32>,
    %368 = vector.extract_strided_slice %349 {offsets = [16, 0], sizes = [8, 256], strides = [1, 1]} : vector<64x256xf32> to vector<8x256xf32>
    %369 = vector.extract_strided_slice %351 {offsets = [40, 0], sizes = [8, 256], strides = [1, 1]} : vector<64x256xf32> to vector<8x256xf32>
    %370 = arith.addf %368, %369 : vector<8x256xf32>
    %371 = vector.broadcast %347 : vector<1x256xf32> to vector<8x256xf32>
    %372 = arith.addf %370, %371 : vector<8x256xf32>
    %c2_110 = arith.constant 2 : index
    %c0_111 = arith.constant 0 : index
    %c0_112 = arith.constant 0 : index
    %373 = vector.load %arg12[%c2_110, %c0_111, %c0_112] : memref<8x8x256xf32, #tpu.memory_space<vmem>>, vector<1x8x256xf32>
    %374 = vector.shape_cast %373 : vector<1x8x256xf32> to vector<8x256xf32>
    %375 = vector.shape_cast %372 : vector<8x256xf32> to vector<1x8x256xf32>
    tpu.vector_store %arg12[%c2_110, %c0_111, %c0_112], %375 {strides = array<i32>} : memref<8x8x256xf32, #tpu.memory_space<vmem>>, vector<1x8x256xf32>,
    %376 = vector.extract_strided_slice %349 {offsets = [24, 0], sizes = [8, 256], strides = [1, 1]} : vector<64x256xf32> to vector<8x256xf32>
    %377 = vector.extract_strided_slice %351 {offsets = [32, 0], sizes = [8, 256], strides = [1, 1]} : vector<64x256xf32> to vector<8x256xf32>
    %378 = arith.addf %376, %377 : vector<8x256xf32>
    %379 = vector.broadcast %347 : vector<1x256xf32> to vector<8x256xf32>
    %380 = arith.addf %378, %379 : vector<8x256xf32>
    %c3_113 = arith.constant 3 : index
    %c0_114 = arith.constant 0 : index
    %c0_115 = arith.constant 0 : index
    %381 = vector.load %arg12[%c3_113, %c0_114, %c0_115] : memref<8x8x256xf32, #tpu.memory_space<vmem>>, vector<1x8x256xf32>
    %382 = vector.shape_cast %381 : vector<1x8x256xf32> to vector<8x256xf32>
    %383 = vector.shape_cast %380 : vector<8x256xf32> to vector<1x8x256xf32>
    tpu.vector_store %arg12[%c3_113, %c0_114, %c0_115], %383 {strides = array<i32>} : memref<8x8x256xf32, #tpu.memory_space<vmem>>, vector<1x8x256xf32>,
    %384 = vector.extract_strided_slice %349 {offsets = [32, 0], sizes = [8, 256], strides = [1, 1]} : vector<64x256xf32> to vector<8x256xf32>
    %385 = vector.extract_strided_slice %351 {offsets = [24, 0], sizes = [8, 256], strides = [1, 1]} : vector<64x256xf32> to vector<8x256xf32>
    %386 = arith.addf %384, %385 : vector<8x256xf32>
    %387 = vector.broadcast %347 : vector<1x256xf32> to vector<8x256xf32>
    %388 = arith.addf %386, %387 : vector<8x256xf32>
    %c4_116 = arith.constant 4 : index
    %c0_117 = arith.constant 0 : index
    %c0_118 = arith.constant 0 : index
    %389 = vector.load %arg12[%c4_116, %c0_117, %c0_118] : memref<8x8x256xf32, #tpu.memory_space<vmem>>, vector<1x8x256xf32>
    %390 = vector.shape_cast %389 : vector<1x8x256xf32> to vector<8x256xf32>
    %391 = vector.shape_cast %388 : vector<8x256xf32> to vector<1x8x256xf32>
    tpu.vector_store %arg12[%c4_116, %c0_117, %c0_118], %391 {strides = array<i32>} : memref<8x8x256xf32, #tpu.memory_space<vmem>>, vector<1x8x256xf32>,
    %392 = vector.extract_strided_slice %349 {offsets = [40, 0], sizes = [8, 256], strides = [1, 1]} : vector<64x256xf32> to vector<8x256xf32>
    %393 = vector.extract_strided_slice %351 {offsets = [16, 0], sizes = [8, 256], strides = [1, 1]} : vector<64x256xf32> to vector<8x256xf32>
    %394 = arith.addf %392, %393 : vector<8x256xf32>
    %395 = vector.broadcast %347 : vector<1x256xf32> to vector<8x256xf32>
    %396 = arith.addf %394, %395 : vector<8x256xf32>
    %c5_119 = arith.constant 5 : index
    %c0_120 = arith.constant 0 : index
    %c0_121 = arith.constant 0 : index
    %397 = vector.load %arg12[%c5_119, %c0_120, %c0_121] : memref<8x8x256xf32, #tpu.memory_space<vmem>>, vector<1x8x256xf32>
    %398 = vector.shape_cast %397 : vector<1x8x256xf32> to vector<8x256xf32>
    %399 = vector.shape_cast %396 : vector<8x256xf32> to vector<1x8x256xf32>
    tpu.vector_store %arg12[%c5_119, %c0_120, %c0_121], %399 {strides = array<i32>} : memref<8x8x256xf32, #tpu.memory_space<vmem>>, vector<1x8x256xf32>,
    %400 = vector.extract_strided_slice %349 {offsets = [48, 0], sizes = [8, 256], strides = [1, 1]} : vector<64x256xf32> to vector<8x256xf32>
    %401 = vector.extract_strided_slice %351 {offsets = [8, 0], sizes = [8, 256], strides = [1, 1]} : vector<64x256xf32> to vector<8x256xf32>
    %402 = arith.addf %400, %401 : vector<8x256xf32>
    %403 = vector.broadcast %347 : vector<1x256xf32> to vector<8x256xf32>
    %404 = arith.addf %402, %403 : vector<8x256xf32>
    %c6_122 = arith.constant 6 : index
    %c0_123 = arith.constant 0 : index
    %c0_124 = arith.constant 0 : index
    %405 = vector.load %arg12[%c6_122, %c0_123, %c0_124] : memref<8x8x256xf32, #tpu.memory_space<vmem>>, vector<1x8x256xf32>
    %406 = vector.shape_cast %405 : vector<1x8x256xf32> to vector<8x256xf32>
    %407 = vector.shape_cast %404 : vector<8x256xf32> to vector<1x8x256xf32>
    tpu.vector_store %arg12[%c6_122, %c0_123, %c0_124], %407 {strides = array<i32>} : memref<8x8x256xf32, #tpu.memory_space<vmem>>, vector<1x8x256xf32>,
    %408 = vector.extract_strided_slice %349 {offsets = [56, 0], sizes = [8, 256], strides = [1, 1]} : vector<64x256xf32> to vector<8x256xf32>
    %409 = vector.extract_strided_slice %351 {offsets = [0, 0], sizes = [8, 256], strides = [1, 1]} : vector<64x256xf32> to vector<8x256xf32>
    %410 = arith.addf %408, %409 : vector<8x256xf32>
    %411 = vector.broadcast %347 : vector<1x256xf32> to vector<8x256xf32>
    %412 = arith.addf %410, %411 : vector<8x256xf32>
    %c7_125 = arith.constant 7 : index
    %c0_126 = arith.constant 0 : index
    %c0_127 = arith.constant 0 : index
    %413 = vector.load %arg12[%c7_125, %c0_126, %c0_127] : memref<8x8x256xf32, #tpu.memory_space<vmem>>, vector<1x8x256xf32>
    %414 = vector.shape_cast %413 : vector<1x8x256xf32> to vector<8x256xf32>
    %415 = vector.shape_cast %412 : vector<8x256xf32> to vector<1x8x256xf32>
    tpu.vector_store %arg12[%c7_125, %c0_126, %c0_127], %415 {strides = array<i32>} : memref<8x8x256xf32, #tpu.memory_space<vmem>>, vector<1x8x256xf32>,
    %c0_128 = arith.constant 0 : index
    %c0_129 = arith.constant 0 : index
    %416 = vector.load %arg8[%c0_128, %c0_129] : memref<64x256xf32, #tpu.memory_space<vmem>>, vector<64x256xf32>
    %cst_130 = arith.constant 0.000000e+00 : f32
    %417 = vector.broadcast %cst_130 : f32 to vector<8x64xf32>
    %c0_i32_131 = arith.constant 0 : i32
    %418 = arith.index_cast %c0_i32_131 : i32 to index
    %c0_132 = arith.constant 0 : index
    %c0_133 = arith.constant 0 : index
    %419 = vector.load %arg12[%418, %c0_132, %c0_133] : memref<8x8x256xf32, #tpu.memory_space<vmem>>, vector<1x8x256xf32>
    %420 = vector.shape_cast %419 : vector<1x8x256xf32> to vector<8x256xf32>
    %cst_134 = arith.constant dense<0.000000e+00> : vector<8x256xf32>
    %421 = tpu.matmul %417, %416, %cst_134 {dimension_numbers = #tpu.dot_dimension_numbers<[1], [0], [0], [1], [0, 0, 1, 1], [], []>} : vector<8x64xf32>, vector<64x256xf32>, vector<8x256xf32> -> vector<8x256xf32>
    %422 = arith.addf %420, %421 : vector<8x256xf32>
    %423 = vector.extract_strided_slice %422 {offsets = [0, 0], sizes = [8, 64], strides = [1, 1]} : vector<8x256xf32> to vector<8x64xf32>
    %424 = arith.negf %423 : vector<8x64xf32>
    %425 = math.exp %424 : vector<8x64xf32>
    %cst_135 = arith.constant 1.000000e+00 : f32
    %426 = vector.broadcast %cst_135 : f32 to vector<8x64xf32>
    %427 = arith.addf %426, %425 : vector<8x64xf32>
    %428 = arith.divf %426, %427 : vector<8x64xf32>
    %429 = vector.extract_strided_slice %422 {offsets = [0, 64], sizes = [8, 64], strides = [1, 1]} : vector<8x256xf32> to vector<8x64xf32>
    %430 = arith.negf %429 : vector<8x64xf32>
    %431 = math.exp %430 : vector<8x64xf32>
    %cst_136 = arith.constant 1.000000e+00 : f32
    %432 = vector.broadcast %cst_136 : f32 to vector<8x64xf32>
    %433 = arith.addf %432, %431 : vector<8x64xf32>
    %434 = arith.divf %432, %433 : vector<8x64xf32>
    %435 = vector.extract_strided_slice %422 {offsets = [0, 128], sizes = [8, 64], strides = [1, 1]} : vector<8x256xf32> to vector<8x64xf32>
    %436 = math.tanh %435 : vector<8x64xf32>
    %437 = vector.extract_strided_slice %422 {offsets = [0, 192], sizes = [8, 64], strides = [1, 1]} : vector<8x256xf32> to vector<8x64xf32>
    %438 = arith.negf %437 : vector<8x64xf32>
    %439 = math.exp %438 : vector<8x64xf32>
    %cst_137 = arith.constant 1.000000e+00 : f32
    %440 = vector.broadcast %cst_137 : f32 to vector<8x64xf32>
    %441 = arith.addf %440, %439 : vector<8x64xf32>
    %442 = arith.divf %440, %441 : vector<8x64xf32>
    %443 = arith.mulf %434, %417 : vector<8x64xf32>
    %444 = arith.mulf %428, %436 : vector<8x64xf32>
    %445 = arith.addf %443, %444 : vector<8x64xf32>
    %446 = math.tanh %445 : vector<8x64xf32>
    %447 = arith.mulf %442, %446 : vector<8x64xf32>
    %c1_i32_138 = arith.constant 1 : i32
    %448 = arith.index_cast %c1_i32_138 : i32 to index
    %c0_139 = arith.constant 0 : index
    %c0_140 = arith.constant 0 : index
    %449 = vector.load %arg12[%448, %c0_139, %c0_140] : memref<8x8x256xf32, #tpu.memory_space<vmem>>, vector<1x8x256xf32>
    %450 = vector.shape_cast %449 : vector<1x8x256xf32> to vector<8x256xf32>
    %cst_141 = arith.constant dense<0.000000e+00> : vector<8x256xf32>
    %451 = tpu.matmul %447, %416, %cst_141 {dimension_numbers = #tpu.dot_dimension_numbers<[1], [0], [0], [1], [0, 0, 1, 1], [], []>} : vector<8x64xf32>, vector<64x256xf32>, vector<8x256xf32> -> vector<8x256xf32>
    %452 = arith.addf %450, %451 : vector<8x256xf32>
    %453 = vector.extract_strided_slice %452 {offsets = [0, 0], sizes = [8, 64], strides = [1, 1]} : vector<8x256xf32> to vector<8x64xf32>
    %454 = arith.negf %453 : vector<8x64xf32>
    %455 = math.exp %454 : vector<8x64xf32>
    %cst_142 = arith.constant 1.000000e+00 : f32
    %456 = vector.broadcast %cst_142 : f32 to vector<8x64xf32>
    %457 = arith.addf %456, %455 : vector<8x64xf32>
    %458 = arith.divf %456, %457 : vector<8x64xf32>
    %459 = vector.extract_strided_slice %452 {offsets = [0, 64], sizes = [8, 64], strides = [1, 1]} : vector<8x256xf32> to vector<8x64xf32>
    %460 = arith.negf %459 : vector<8x64xf32>
    %461 = math.exp %460 : vector<8x64xf32>
    %cst_143 = arith.constant 1.000000e+00 : f32
    %462 = vector.broadcast %cst_143 : f32 to vector<8x64xf32>
    %463 = arith.addf %462, %461 : vector<8x64xf32>
    %464 = arith.divf %462, %463 : vector<8x64xf32>
    %465 = vector.extract_strided_slice %452 {offsets = [0, 128], sizes = [8, 64], strides = [1, 1]} : vector<8x256xf32> to vector<8x64xf32>
    %466 = math.tanh %465 : vector<8x64xf32>
    %467 = vector.extract_strided_slice %452 {offsets = [0, 192], sizes = [8, 64], strides = [1, 1]} : vector<8x256xf32> to vector<8x64xf32>
    %468 = arith.negf %467 : vector<8x64xf32>
    %469 = math.exp %468 : vector<8x64xf32>
    %cst_144 = arith.constant 1.000000e+00 : f32
    %470 = vector.broadcast %cst_144 : f32 to vector<8x64xf32>
    %471 = arith.addf %470, %469 : vector<8x64xf32>
    %472 = arith.divf %470, %471 : vector<8x64xf32>
    %473 = arith.mulf %464, %445 : vector<8x64xf32>
    %474 = arith.mulf %458, %466 : vector<8x64xf32>
    %475 = arith.addf %473, %474 : vector<8x64xf32>
    %476 = math.tanh %475 : vector<8x64xf32>
    %477 = arith.mulf %472, %476 : vector<8x64xf32>
    %c2_i32_145 = arith.constant 2 : i32
    %478 = arith.index_cast %c2_i32_145 : i32 to index
    %c0_146 = arith.constant 0 : index
    %c0_147 = arith.constant 0 : index
    %479 = vector.load %arg12[%478, %c0_146, %c0_147] : memref<8x8x256xf32, #tpu.memory_space<vmem>>, vector<1x8x256xf32>
    %480 = vector.shape_cast %479 : vector<1x8x256xf32> to vector<8x256xf32>
    %cst_148 = arith.constant dense<0.000000e+00> : vector<8x256xf32>
    %481 = tpu.matmul %477, %416, %cst_148 {dimension_numbers = #tpu.dot_dimension_numbers<[1], [0], [0], [1], [0, 0, 1, 1], [], []>} : vector<8x64xf32>, vector<64x256xf32>, vector<8x256xf32> -> vector<8x256xf32>
    %482 = arith.addf %480, %481 : vector<8x256xf32>
    %483 = vector.extract_strided_slice %482 {offsets = [0, 0], sizes = [8, 64], strides = [1, 1]} : vector<8x256xf32> to vector<8x64xf32>
    %484 = arith.negf %483 : vector<8x64xf32>
    %485 = math.exp %484 : vector<8x64xf32>
    %cst_149 = arith.constant 1.000000e+00 : f32
    %486 = vector.broadcast %cst_149 : f32 to vector<8x64xf32>
    %487 = arith.addf %486, %485 : vector<8x64xf32>
    %488 = arith.divf %486, %487 : vector<8x64xf32>
    %489 = vector.extract_strided_slice %482 {offsets = [0, 64], sizes = [8, 64], strides = [1, 1]} : vector<8x256xf32> to vector<8x64xf32>
    %490 = arith.negf %489 : vector<8x64xf32>
    %491 = math.exp %490 : vector<8x64xf32>
    %cst_150 = arith.constant 1.000000e+00 : f32
    %492 = vector.broadcast %cst_150 : f32 to vector<8x64xf32>
    %493 = arith.addf %492, %491 : vector<8x64xf32>
    %494 = arith.divf %492, %493 : vector<8x64xf32>
    %495 = vector.extract_strided_slice %482 {offsets = [0, 128], sizes = [8, 64], strides = [1, 1]} : vector<8x256xf32> to vector<8x64xf32>
    %496 = math.tanh %495 : vector<8x64xf32>
    %497 = vector.extract_strided_slice %482 {offsets = [0, 192], sizes = [8, 64], strides = [1, 1]} : vector<8x256xf32> to vector<8x64xf32>
    %498 = arith.negf %497 : vector<8x64xf32>
    %499 = math.exp %498 : vector<8x64xf32>
    %cst_151 = arith.constant 1.000000e+00 : f32
    %500 = vector.broadcast %cst_151 : f32 to vector<8x64xf32>
    %501 = arith.addf %500, %499 : vector<8x64xf32>
    %502 = arith.divf %500, %501 : vector<8x64xf32>
    %503 = arith.mulf %494, %475 : vector<8x64xf32>
    %504 = arith.mulf %488, %496 : vector<8x64xf32>
    %505 = arith.addf %503, %504 : vector<8x64xf32>
    %506 = math.tanh %505 : vector<8x64xf32>
    %507 = arith.mulf %502, %506 : vector<8x64xf32>
    %c3_i32_152 = arith.constant 3 : i32
    %508 = arith.index_cast %c3_i32_152 : i32 to index
    %c0_153 = arith.constant 0 : index
    %c0_154 = arith.constant 0 : index
    %509 = vector.load %arg12[%508, %c0_153, %c0_154] : memref<8x8x256xf32, #tpu.memory_space<vmem>>, vector<1x8x256xf32>
    %510 = vector.shape_cast %509 : vector<1x8x256xf32> to vector<8x256xf32>
    %cst_155 = arith.constant dense<0.000000e+00> : vector<8x256xf32>
    %511 = tpu.matmul %507, %416, %cst_155 {dimension_numbers = #tpu.dot_dimension_numbers<[1], [0], [0], [1], [0, 0, 1, 1], [], []>} : vector<8x64xf32>, vector<64x256xf32>, vector<8x256xf32> -> vector<8x256xf32>
    %512 = arith.addf %510, %511 : vector<8x256xf32>
    %513 = vector.extract_strided_slice %512 {offsets = [0, 0], sizes = [8, 64], strides = [1, 1]} : vector<8x256xf32> to vector<8x64xf32>
    %514 = arith.negf %513 : vector<8x64xf32>
    %515 = math.exp %514 : vector<8x64xf32>
    %cst_156 = arith.constant 1.000000e+00 : f32
    %516 = vector.broadcast %cst_156 : f32 to vector<8x64xf32>
    %517 = arith.addf %516, %515 : vector<8x64xf32>
    %518 = arith.divf %516, %517 : vector<8x64xf32>
    %519 = vector.extract_strided_slice %512 {offsets = [0, 64], sizes = [8, 64], strides = [1, 1]} : vector<8x256xf32> to vector<8x64xf32>
    %520 = arith.negf %519 : vector<8x64xf32>
    %521 = math.exp %520 : vector<8x64xf32>
    %cst_157 = arith.constant 1.000000e+00 : f32
    %522 = vector.broadcast %cst_157 : f32 to vector<8x64xf32>
    %523 = arith.addf %522, %521 : vector<8x64xf32>
    %524 = arith.divf %522, %523 : vector<8x64xf32>
    %525 = vector.extract_strided_slice %512 {offsets = [0, 128], sizes = [8, 64], strides = [1, 1]} : vector<8x256xf32> to vector<8x64xf32>
    %526 = math.tanh %525 : vector<8x64xf32>
    %527 = vector.extract_strided_slice %512 {offsets = [0, 192], sizes = [8, 64], strides = [1, 1]} : vector<8x256xf32> to vector<8x64xf32>
    %528 = arith.negf %527 : vector<8x64xf32>
    %529 = math.exp %528 : vector<8x64xf32>
    %cst_158 = arith.constant 1.000000e+00 : f32
    %530 = vector.broadcast %cst_158 : f32 to vector<8x64xf32>
    %531 = arith.addf %530, %529 : vector<8x64xf32>
    %532 = arith.divf %530, %531 : vector<8x64xf32>
    %533 = arith.mulf %524, %505 : vector<8x64xf32>
    %534 = arith.mulf %518, %526 : vector<8x64xf32>
    %535 = arith.addf %533, %534 : vector<8x64xf32>
    %536 = math.tanh %535 : vector<8x64xf32>
    %537 = arith.mulf %532, %536 : vector<8x64xf32>
    %c4_i32_159 = arith.constant 4 : i32
    %538 = arith.index_cast %c4_i32_159 : i32 to index
    %c0_160 = arith.constant 0 : index
    %c0_161 = arith.constant 0 : index
    %539 = vector.load %arg12[%538, %c0_160, %c0_161] : memref<8x8x256xf32, #tpu.memory_space<vmem>>, vector<1x8x256xf32>
    %540 = vector.shape_cast %539 : vector<1x8x256xf32> to vector<8x256xf32>
    %cst_162 = arith.constant dense<0.000000e+00> : vector<8x256xf32>
    %541 = tpu.matmul %537, %416, %cst_162 {dimension_numbers = #tpu.dot_dimension_numbers<[1], [0], [0], [1], [0, 0, 1, 1], [], []>} : vector<8x64xf32>, vector<64x256xf32>, vector<8x256xf32> -> vector<8x256xf32>
    %542 = arith.addf %540, %541 : vector<8x256xf32>
    %543 = vector.extract_strided_slice %542 {offsets = [0, 0], sizes = [8, 64], strides = [1, 1]} : vector<8x256xf32> to vector<8x64xf32>
    %544 = arith.negf %543 : vector<8x64xf32>
    %545 = math.exp %544 : vector<8x64xf32>
    %cst_163 = arith.constant 1.000000e+00 : f32
    %546 = vector.broadcast %cst_163 : f32 to vector<8x64xf32>
    %547 = arith.addf %546, %545 : vector<8x64xf32>
    %548 = arith.divf %546, %547 : vector<8x64xf32>
    %549 = vector.extract_strided_slice %542 {offsets = [0, 64], sizes = [8, 64], strides = [1, 1]} : vector<8x256xf32> to vector<8x64xf32>
    %550 = arith.negf %549 : vector<8x64xf32>
    %551 = math.exp %550 : vector<8x64xf32>
    %cst_164 = arith.constant 1.000000e+00 : f32
    %552 = vector.broadcast %cst_164 : f32 to vector<8x64xf32>
    %553 = arith.addf %552, %551 : vector<8x64xf32>
    %554 = arith.divf %552, %553 : vector<8x64xf32>
    %555 = vector.extract_strided_slice %542 {offsets = [0, 128], sizes = [8, 64], strides = [1, 1]} : vector<8x256xf32> to vector<8x64xf32>
    %556 = math.tanh %555 : vector<8x64xf32>
    %557 = vector.extract_strided_slice %542 {offsets = [0, 192], sizes = [8, 64], strides = [1, 1]} : vector<8x256xf32> to vector<8x64xf32>
    %558 = arith.negf %557 : vector<8x64xf32>
    %559 = math.exp %558 : vector<8x64xf32>
    %cst_165 = arith.constant 1.000000e+00 : f32
    %560 = vector.broadcast %cst_165 : f32 to vector<8x64xf32>
    %561 = arith.addf %560, %559 : vector<8x64xf32>
    %562 = arith.divf %560, %561 : vector<8x64xf32>
    %563 = arith.mulf %554, %535 : vector<8x64xf32>
    %564 = arith.mulf %548, %556 : vector<8x64xf32>
    %565 = arith.addf %563, %564 : vector<8x64xf32>
    %566 = math.tanh %565 : vector<8x64xf32>
    %567 = arith.mulf %562, %566 : vector<8x64xf32>
    %c5_i32_166 = arith.constant 5 : i32
    %568 = arith.index_cast %c5_i32_166 : i32 to index
    %c0_167 = arith.constant 0 : index
    %c0_168 = arith.constant 0 : index
    %569 = vector.load %arg12[%568, %c0_167, %c0_168] : memref<8x8x256xf32, #tpu.memory_space<vmem>>, vector<1x8x256xf32>
    %570 = vector.shape_cast %569 : vector<1x8x256xf32> to vector<8x256xf32>
    %cst_169 = arith.constant dense<0.000000e+00> : vector<8x256xf32>
    %571 = tpu.matmul %567, %416, %cst_169 {dimension_numbers = #tpu.dot_dimension_numbers<[1], [0], [0], [1], [0, 0, 1, 1], [], []>} : vector<8x64xf32>, vector<64x256xf32>, vector<8x256xf32> -> vector<8x256xf32>
    %572 = arith.addf %570, %571 : vector<8x256xf32>
    %573 = vector.extract_strided_slice %572 {offsets = [0, 0], sizes = [8, 64], strides = [1, 1]} : vector<8x256xf32> to vector<8x64xf32>
    %574 = arith.negf %573 : vector<8x64xf32>
    %575 = math.exp %574 : vector<8x64xf32>
    %cst_170 = arith.constant 1.000000e+00 : f32
    %576 = vector.broadcast %cst_170 : f32 to vector<8x64xf32>
    %577 = arith.addf %576, %575 : vector<8x64xf32>
    %578 = arith.divf %576, %577 : vector<8x64xf32>
    %579 = vector.extract_strided_slice %572 {offsets = [0, 64], sizes = [8, 64], strides = [1, 1]} : vector<8x256xf32> to vector<8x64xf32>
    %580 = arith.negf %579 : vector<8x64xf32>
    %581 = math.exp %580 : vector<8x64xf32>
    %cst_171 = arith.constant 1.000000e+00 : f32
    %582 = vector.broadcast %cst_171 : f32 to vector<8x64xf32>
    %583 = arith.addf %582, %581 : vector<8x64xf32>
    %584 = arith.divf %582, %583 : vector<8x64xf32>
    %585 = vector.extract_strided_slice %572 {offsets = [0, 128], sizes = [8, 64], strides = [1, 1]} : vector<8x256xf32> to vector<8x64xf32>
    %586 = math.tanh %585 : vector<8x64xf32>
    %587 = vector.extract_strided_slice %572 {offsets = [0, 192], sizes = [8, 64], strides = [1, 1]} : vector<8x256xf32> to vector<8x64xf32>
    %588 = arith.negf %587 : vector<8x64xf32>
    %589 = math.exp %588 : vector<8x64xf32>
    %cst_172 = arith.constant 1.000000e+00 : f32
    %590 = vector.broadcast %cst_172 : f32 to vector<8x64xf32>
    %591 = arith.addf %590, %589 : vector<8x64xf32>
    %592 = arith.divf %590, %591 : vector<8x64xf32>
    %593 = arith.mulf %584, %565 : vector<8x64xf32>
    %594 = arith.mulf %578, %586 : vector<8x64xf32>
    %595 = arith.addf %593, %594 : vector<8x64xf32>
    %596 = math.tanh %595 : vector<8x64xf32>
    %597 = arith.mulf %592, %596 : vector<8x64xf32>
    %c6_i32_173 = arith.constant 6 : i32
    %598 = arith.index_cast %c6_i32_173 : i32 to index
    %c0_174 = arith.constant 0 : index
    %c0_175 = arith.constant 0 : index
    %599 = vector.load %arg12[%598, %c0_174, %c0_175] : memref<8x8x256xf32, #tpu.memory_space<vmem>>, vector<1x8x256xf32>
    %600 = vector.shape_cast %599 : vector<1x8x256xf32> to vector<8x256xf32>
    %cst_176 = arith.constant dense<0.000000e+00> : vector<8x256xf32>
    %601 = tpu.matmul %597, %416, %cst_176 {dimension_numbers = #tpu.dot_dimension_numbers<[1], [0], [0], [1], [0, 0, 1, 1], [], []>} : vector<8x64xf32>, vector<64x256xf32>, vector<8x256xf32> -> vector<8x256xf32>
    %602 = arith.addf %600, %601 : vector<8x256xf32>
    %603 = vector.extract_strided_slice %602 {offsets = [0, 0], sizes = [8, 64], strides = [1, 1]} : vector<8x256xf32> to vector<8x64xf32>
    %604 = arith.negf %603 : vector<8x64xf32>
    %605 = math.exp %604 : vector<8x64xf32>
    %cst_177 = arith.constant 1.000000e+00 : f32
    %606 = vector.broadcast %cst_177 : f32 to vector<8x64xf32>
    %607 = arith.addf %606, %605 : vector<8x64xf32>
    %608 = arith.divf %606, %607 : vector<8x64xf32>
    %609 = vector.extract_strided_slice %602 {offsets = [0, 64], sizes = [8, 64], strides = [1, 1]} : vector<8x256xf32> to vector<8x64xf32>
    %610 = arith.negf %609 : vector<8x64xf32>
    %611 = math.exp %610 : vector<8x64xf32>
    %cst_178 = arith.constant 1.000000e+00 : f32
    %612 = vector.broadcast %cst_178 : f32 to vector<8x64xf32>
    %613 = arith.addf %612, %611 : vector<8x64xf32>
    %614 = arith.divf %612, %613 : vector<8x64xf32>
    %615 = vector.extract_strided_slice %602 {offsets = [0, 128], sizes = [8, 64], strides = [1, 1]} : vector<8x256xf32> to vector<8x64xf32>
    %616 = math.tanh %615 : vector<8x64xf32>
    %617 = vector.extract_strided_slice %602 {offsets = [0, 192], sizes = [8, 64], strides = [1, 1]} : vector<8x256xf32> to vector<8x64xf32>
    %618 = arith.negf %617 : vector<8x64xf32>
    %619 = math.exp %618 : vector<8x64xf32>
    %cst_179 = arith.constant 1.000000e+00 : f32
    %620 = vector.broadcast %cst_179 : f32 to vector<8x64xf32>
    %621 = arith.addf %620, %619 : vector<8x64xf32>
    %622 = arith.divf %620, %621 : vector<8x64xf32>
    %623 = arith.mulf %614, %595 : vector<8x64xf32>
    %624 = arith.mulf %608, %616 : vector<8x64xf32>
    %625 = arith.addf %623, %624 : vector<8x64xf32>
    %626 = math.tanh %625 : vector<8x64xf32>
    %627 = arith.mulf %622, %626 : vector<8x64xf32>
    %c7_i32_180 = arith.constant 7 : i32
    %628 = arith.index_cast %c7_i32_180 : i32 to index
    %c0_181 = arith.constant 0 : index
    %c0_182 = arith.constant 0 : index
    %629 = vector.load %arg12[%628, %c0_181, %c0_182] : memref<8x8x256xf32, #tpu.memory_space<vmem>>, vector<1x8x256xf32>
    %630 = vector.shape_cast %629 : vector<1x8x256xf32> to vector<8x256xf32>
    %cst_183 = arith.constant dense<0.000000e+00> : vector<8x256xf32>
    %631 = tpu.matmul %627, %416, %cst_183 {dimension_numbers = #tpu.dot_dimension_numbers<[1], [0], [0], [1], [0, 0, 1, 1], [], []>} : vector<8x64xf32>, vector<64x256xf32>, vector<8x256xf32> -> vector<8x256xf32>
    %632 = arith.addf %630, %631 : vector<8x256xf32>
    %633 = vector.extract_strided_slice %632 {offsets = [0, 0], sizes = [8, 64], strides = [1, 1]} : vector<8x256xf32> to vector<8x64xf32>
    %634 = arith.negf %633 : vector<8x64xf32>
    %635 = math.exp %634 : vector<8x64xf32>
    %cst_184 = arith.constant 1.000000e+00 : f32
    %636 = vector.broadcast %cst_184 : f32 to vector<8x64xf32>
    %637 = arith.addf %636, %635 : vector<8x64xf32>
    %638 = arith.divf %636, %637 : vector<8x64xf32>
    %639 = vector.extract_strided_slice %632 {offsets = [0, 64], sizes = [8, 64], strides = [1, 1]} : vector<8x256xf32> to vector<8x64xf32>
    %640 = arith.negf %639 : vector<8x64xf32>
    %641 = math.exp %640 : vector<8x64xf32>
    %cst_185 = arith.constant 1.000000e+00 : f32
    %642 = vector.broadcast %cst_185 : f32 to vector<8x64xf32>
    %643 = arith.addf %642, %641 : vector<8x64xf32>
    %644 = arith.divf %642, %643 : vector<8x64xf32>
    %645 = vector.extract_strided_slice %632 {offsets = [0, 128], sizes = [8, 64], strides = [1, 1]} : vector<8x256xf32> to vector<8x64xf32>
    %646 = math.tanh %645 : vector<8x64xf32>
    %647 = vector.extract_strided_slice %632 {offsets = [0, 192], sizes = [8, 64], strides = [1, 1]} : vector<8x256xf32> to vector<8x64xf32>
    %648 = arith.negf %647 : vector<8x64xf32>
    %649 = math.exp %648 : vector<8x64xf32>
    %cst_186 = arith.constant 1.000000e+00 : f32
    %650 = vector.broadcast %cst_186 : f32 to vector<8x64xf32>
    %651 = arith.addf %650, %649 : vector<8x64xf32>
    %652 = arith.divf %650, %651 : vector<8x64xf32>
    %653 = arith.mulf %644, %625 : vector<8x64xf32>
    %654 = arith.mulf %638, %646 : vector<8x64xf32>
    %655 = arith.addf %653, %654 : vector<8x64xf32>
    %656 = math.tanh %655 : vector<8x64xf32>
    %657 = arith.mulf %652, %656 : vector<8x64xf32>
    %c8_i32_187 = arith.constant 8 : i32
    %c0_188 = arith.constant 0 : index
    %c0_189 = arith.constant 0 : index
    %658 = vector.load %arg9[%c0_188, %c0_189] : memref<64x2xf32, #tpu.memory_space<vmem>>, vector<64x2xf32>
    %cst_190 = arith.constant dense<0.000000e+00> : vector<8x2xf32>
    %659 = tpu.matmul %657, %658, %cst_190 {dimension_numbers = #tpu.dot_dimension_numbers<[1], [0], [0], [1], [0, 0, 1, 1], [], []>} : vector<8x64xf32>, vector<64x2xf32>, vector<8x2xf32> -> vector<8x2xf32>
    %c0_191 = arith.constant 0 : index
    %c0_192 = arith.constant 0 : index
    %660 = vector.load %arg10[%c0_191, %c0_192] : memref<1x2xf32, #tpu.memory_space<vmem>>, vector<1x2xf32>
    %661 = vector.broadcast %660 : vector<1x2xf32> to vector<8x2xf32>
    %662 = arith.addf %659, %661 : vector<8x2xf32>
    %c0_193 = arith.constant 0 : index
    %c0_194 = arith.constant 0 : index
    %663 = vector.load %arg11[%c0_193, %c0_194] : memref<8x2xf32, #tpu.memory_space<vmem>>, vector<8x2xf32>
    tpu.vector_store %arg11[%c0_193, %c0_194], %662 {strides = array<i32>} : memref<8x2xf32, #tpu.memory_space<vmem>>, vector<8x2xf32>,
    return
  }
}

</mosaic_0001>

<bundles_post_ra>
// kernel: video_lstm_forward.1
= control target key start
LH: loop header
LB: loop body
LE: loop exit
PB: predicated region body
PF: predicated region fallthrough
CT: control target
= control target key end

     0   :  { %16 = vsyncpa [#allocation5], 0  ;;  %s3617_s0 = inlined_call_operand.vmem [shape: f32[8,8,16], index: 0, kind: input, shape index: {}]   ;;  %s3618_s1 = inlined_call_operand.vmem [shape: f32[16,256], index: 1, kind: input, shape index: {}]   ;;  %s3619_s2 = inlined_call_operand.hbm [shape: f32[16,256], index: 2, kind: input, shape index: {}]   ;;  %s3620_s3 = inlined_call_operand.vmem [shape: f32[1,256], index: 3, kind: input, shape index: {}]   ;;  %s3621_s4 = inlined_call_operand.vmem [shape: f32[64,256], index: 4, kind: input, shape index: {}]   ;;  %s3622_s5 = inlined_call_operand.hbm [shape: f32[64,256], index: 5, kind: input, shape index: {}]   ;;  %s3623_s6 = inlined_call_operand.hbm [shape: f32[64,256], index: 6, kind: input, shape index: {}]   ;;  %s3624_s7 = inlined_call_operand.vmem [shape: f32[1,256], index: 7, kind: input, shape index: {}]   ;;  %s3625_s8 = inlined_call_operand.hbm [shape: f32[64,256], index: 8, kind: input, shape index: {}]   ;;  %s3626_s9 = inlined_call_operand.vmem [shape: f32[64,2], index: 9, kind: input, shape index: {}]   ;;  %s3627_s10 = inlined_call_operand.vmem [shape: f32[1,2], index: 10, kind: input, shape index: {}]   ;;  %s3628_s11 = inlined_call_operand.vmem [shape: f32[8,2], index: 11, kind: output, shape index: {}]  }
   0x1   :  { %17 = vsyncpa [#allocation7], 0 }
   0x2   :  { %18 = vsyncpa [#allocation10], 0  ;;  %s44_s19 = sshll.u32 %s3622_s5, 4  ;;  %s2729_s20 = smov [#allocation6]   ;;  %s45_s19 = int_to_ptr.hbm [resolvable:$true] %s44_s19 }
   0x3   :  { %s46_s21 = sshll.u32 %s2729_s20, 4  ;;  %s27_s24 = sshll.u32 %s3619_s2, 4  ;;  %s47_s21 = int_to_ptr.vmem [resolvable:$true] %s46_s21  ;;  %s28_s24 = int_to_ptr.hbm [resolvable:$true] %s27_s24 }
   0x4   :  { %s2730_s25 = smov 256   ;;  %s2731_s26 = smov 16  }
   0x5   :  { %52 = dma.hbm_to_vmem [thread:$0]  %s45_s19, 2048, %s47_s21, [#allocation7], %s2730_s25, %s2730_s25, %s2731_s26  }
   0x6   :  { %s2732_s27 = smov [#allocation4]   ;;  %s57_s12 = sshll.u32 %s3623_s6, 4  ;;  %s58_s12 = int_to_ptr.hbm [resolvable:$true] %s57_s12 }
   0x7   :  { %s29_s28 = sshll.u32 %s2732_s27, 4  ;;  %s72_s14 = sshll.u32 %s3625_s8, 4  ;;  %s30_s28 = int_to_ptr.vmem [resolvable:$true] %s29_s28  ;;  %s73_s14 = int_to_ptr.hbm [resolvable:$true] %s72_s14 }
   0x8   :  { %35 = dma.hbm_to_vmem [thread:$0]  %s28_s24, 512, %s30_s28, [#allocation5], %s2730_s25, %s2730_s25, %s2731_s26  }
   0x9   :  { %s2733_s15 = smov [#allocation8]   ;;  %s2734_s2 = smov [#allocation9]  }
   0xa   :  { %s59_s16 = sshll.u32 %s2733_s15, 4  ;;  %s74_s17 = sshll.u32 %s2734_s2, 4  ;;  %s60_s16 = int_to_ptr.vmem [resolvable:$true] %s59_s16  ;;  %s75_s17 = int_to_ptr.vmem [resolvable:$true] %s74_s17 }
   0xb   :  { %65 = dma.hbm_to_vmem [thread:$0]  %s58_s12, 2048, %s60_s16, [#allocation7], %s2730_s25, %s2730_s25, %s2731_s26  }
   0xc   :  { %80 = dma.hbm_to_vmem [thread:$0]  %s73_s14, 2048, %s75_s17, [#allocation10], %s2730_s25, %s2730_s25, %s2731_s26  }
   0xd   :  { %2723 = dma.done.wait [#allocation5], 512  }
   0xe   :  { %2724 = vsyncadd [#allocation5], 4294966784 }
   0xf   :  { %2725 = dma.done.wait [#allocation7], 4096  }
  0x10   :  { %2726 = vsyncadd [#allocation7], 4294963200 }
  0x11   :  { %2727 = dma.done.wait [#allocation10], 2048  }
  0x12   :  { %2728 = vsyncadd [#allocation10], 4294965248  ;;  %v112_v0 = vld [vmem:[%s3618_s1 + $0x10] sm:$0xff]  ;;  %v224_v2 = vld [vmem:[#allocation4 + $0x18] sm:$0xff]  ;;  %vm114_vm0 = vcmask 130048   ;;  %v2735_v32 = vmov 0.0  }
  0x13   :  { %v223_v1 = vld [vmem:[#allocation4 + $0x10] sm:$0xff]  ;;  %153 = vmatpush.msra.mxu0 %v112_v0  ;;  %2424 = vmatpush.msra.mxu1 %v112_v0  ;;  %v110_v3 = vld [vmem:[%s3618_s1] sm:$0xff]  ;;  %v222_v5 = vld [vmem:[#allocation4 + $0x8] sm:$0xff]  ;;  %vm385_vm9 = vcmask 523264  }
  0x14   :  { %v221_v4 = vld [vmem:[#allocation4] sm:$0xff]  ;;  %239 = vmatpush.msra.mxu2 %v223_v1  ;;  %280 = vmatpush.msra.mxu3 %v224_v2  ;;  %v2821_v7 = vld [vmem:[%s3617_s0 + $0x38] sm:$0xff]  ;;  %v2829_v9 = vld [vmem:[%s3621_s4 + $0x70] sm:$0xff] }
  0x15   :  { %v101_v6 = vld [vmem:[%s3617_s0] sm:$0xff]  ;;  %154 = vmatpush.msra.mxu0 %v110_v3  ;;  %2425 = vmatpush.msra.mxu1 %v110_v3  ;;  %v113_v8 = vld [vmem:[%s3618_s1 + $0x18] sm:$0xff]  ;;  %v111_v10 = vld [vmem:[%s3618_s1 + $0x8] sm:$0xff] }
  0x16   :  { %240 = vmatpush.msra.mxu2 %v221_v4  ;;  %281 = vmatpush.msra.mxu3 %v222_v5  ;;  %v2842_v11 = vld [vmem:[%s3621_s4 + $0x60] sm:$0xff]  ;;  %v2848_v12 = vld [vmem:[%s3621_s4 + $0x78] sm:$0xff]  ;;  %v2853_v13 = vld [vmem:[%s3621_s4 + $0x50] sm:$0xff] }
  0x17   :  { %2299 = vmatmul.msk.f32.vlgmr.msra.gmra.mxu0 %vm114_vm0, %v101_v6  ;;  %2306 = vmatmul.msk.f32.vlgmr.msra.gmra.mxu1 %vm114_vm0, %v2821_v7  ;;  %v2861_v14 = vld [vmem:[%s3621_s4 + $0x68] sm:$0xff]  ;;  %v2873_v16 = vld [vmem:[%s3621_s4 + $0x40] sm:$0xff]  ;;  %v2879_v17 = vld [vmem:[%s3621_s4 + $0x58] sm:$0xff] }
  0x18   :  { %2315 = vmatmul.msk.f32.vlgmr.msra.gmra.mxu2 %vm114_vm0, %v101_v6  ;;  %2323 = vmatmul.msk.f32.vlgmr.msra.gmra.mxu3 %vm114_vm0, %v101_v6  ;;  %v102_v15 = vld [vmem:[%s3617_s0 + $0x8] sm:$0xff]  ;;  %v2889_v18 = vld [vmem:[%s3621_s4 + $0x30] sm:$0xff]  ;;  %v2901_v20 = vld [vmem:[%s3621_s4 + $0x20] sm:$0xff] }
  0x19   :  { %194 = vmatpush.msrb.mxu1 %v113_v8  ;;  %397 = vmatpush.msrb.mxu0 %v2829_v9  ;;  %v2894_v19 = vld [vmem:[%s3621_s4 + $0x48] sm:$0xff]  ;;  %v103_v21 = vld [vmem:[%s3617_s0 + $0x10] sm:$0xff]  ;;  %v2926_v23 = vld [vmem:[%s3621_s4 + $0x38] sm:$0xff] }
  0x1a   :  { %496 = vmatpush.msrb.mxu2 %v2829_v9  ;;  %516 = vmatpush.msrb.mxu3 %v2848_v12  ;;  %v2921_v22 = vld [vmem:[%s3621_s4 + $0x10] sm:$0xff]  ;;  %v104_v24 = vld [vmem:[%s3617_s0 + $0x18] sm:$0xff]  ;;  %v2942_v25 = vld [vmem:[%s3621_s4] sm:$0xff] }
  0x1b   :  { %195 = vmatpush.msrb.mxu1 %v111_v10  ;;  %398 = vmatpush.msrb.mxu0 %v2842_v11  ;;  %v2947_v26 = vld [vmem:[%s3621_s4 + $0x28] sm:$0xff]  ;;  %v105_v27 = vld [vmem:[%s3617_s0 + $0x20] sm:$0xff]  ;;  %v2965_v28 = vld [vmem:[%s3621_s4 + $0x18] sm:$0xff] }
  0x1c   :  { %497 = vmatpush.msrb.mxu2 %v2842_v11  ;;  %517 = vmatpush.msrb.mxu3 %v2861_v14  ;;  %v2972_v29 = vld [vmem:[%s3621_s4 + $0x8] sm:$0xff]  ;;  %v107_v31 = vld [vmem:[%s3617_s0 + $0x30] sm:$0xff]  ;;  %v109_v35 = vld [vmem:[%s3620_s3] sm:$0x3]  ;;  %s2736_s3 = smov 64  }
  0x1d   :  { %417 = vmatpush.msra.mxu1 %v2848_v12  ;;  %399 = vmatpush.msrb.mxu0 %v2853_v13  ;;  %v106_v30 = vld [vmem:[%s3617_s0 + $0x28] sm:$0xff]  ;;  %v310_v36 = vperm.slane %v109_v35, 0  ;;  %v311_v57 = vperm.slane %v109_v35, 1 }
  0x1e   :  { %498 = vmatpush.msrb.mxu2 %v2853_v13  ;;  %518 = vmatpush.msrb.mxu3 %v2879_v17 }
  0x1f   :  { %418 = vmatpush.msra.mxu1 %v2861_v14  ;;  %2300 = vmatmul.msk.f32.gmra.mxu0 %vm114_vm0, %v102_v15 }
  0x20   :  { %2307 = vmatmul.msk.f32.vlgmr.msrb.gmra.mxu1 %vm114_vm0, %v101_v6  ;;  %2316 = vmatmul.msk.f32.gmra.mxu2 %vm114_vm0, %v102_v15 }
  0x21   :  { %2324 = vmatmul.msk.f32.gmra.mxu3 %vm114_vm0, %v102_v15  ;;  %400 = vmatpush.msrb.mxu0 %v2873_v16 }
  0x22   :  { %419 = vmatpush.msra.mxu1 %v2879_v17  ;;  %499 = vmatpush.msrb.mxu2 %v2873_v16 }
  0x23   :  { %401 = vmatpush.msrb.mxu0 %v2889_v18  ;;  %519 = vmatpush.msrb.mxu3 %v2894_v19 }
  0x24   :  { %420 = vmatpush.msra.mxu1 %v2894_v19  ;;  %500 = vmatpush.msrb.mxu2 %v2889_v18 }
  0x25   :  { %402 = vmatpush.msrb.mxu0 %v2901_v20  ;;  %520 = vmatpush.msrb.mxu3 %v2926_v23 }
  0x26   :  { %501 = vmatpush.msrb.mxu2 %v2901_v20  ;;  %421 = vmatpush.msra.mxu1 %v2926_v23 }
  0x27   :  { %2301 = vmatmul.msk.f32.gmra.mxu0 %vm114_vm0, %v103_v21  ;;  %521 = vmatpush.msrb.mxu3 %v2947_v26 }
  0x28   :  { %2308 = vmatmul.msk.f32.gmra.mxu1 %vm114_vm0, %v102_v15  ;;  %2317 = vmatmul.msk.f32.gmra.mxu2 %vm114_vm0, %v103_v21 }
  0x29   :  { %2325 = vmatmul.msk.f32.gmra.mxu3 %vm114_vm0, %v103_v21  ;;  %403 = vmatpush.msrb.mxu0 %v2921_v22 }
  0x2a   :  { %502 = vmatpush.msrb.mxu2 %v2921_v22  ;;  %422 = vmatpush.msra.mxu1 %v2947_v26 }
  0x2b   :  { %404 = vmatpush.msrb.mxu0 %v2942_v25  ;;  %522 = vmatpush.msrb.mxu3 %v2965_v28 }
  0x2c   :  { %503 = vmatpush.msrb.mxu2 %v2942_v25  ;;  %423 = vmatpush.msra.mxu1 %v2965_v28 }
  0x2d   :  { %596 = vmatpush.msra.mxu0 %v2829_v9  ;;  %523 = vmatpush.msrb.mxu3 %v2972_v29 }
  0x2e   :  { %696 = vmatpush.msra.mxu2 %v2829_v9  ;;  %424 = vmatpush.msra.mxu1 %v2972_v29 }
  0x2f   :  { %2302 = vmatmul.msk.f32.gmra.mxu0 %vm114_vm0, %v104_v24  ;;  %716 = vmatpush.msra.mxu3 %v2848_v12 }
  0x30   :  { %2309 = vmatmul.msk.f32.gmra.mxu1 %vm114_vm0, %v103_v21  ;;  %2318 = vmatmul.msk.f32.gmra.mxu2 %vm114_vm0, %v104_v24 }
  0x31   :  { %2326 = vmatmul.msk.f32.gmra.mxu3 %vm114_vm0, %v104_v24  ;;  %597 = vmatpush.msra.mxu0 %v2842_v11 }
  0x32   :  { %697 = vmatpush.msra.mxu2 %v2842_v11  ;;  %616 = vmatpush.msrb.mxu1 %v2848_v12 }
  0x33   :  { %598 = vmatpush.msra.mxu0 %v2853_v13  ;;  %717 = vmatpush.msra.mxu3 %v2861_v14 }
  0x34   :  { %698 = vmatpush.msra.mxu2 %v2853_v13  ;;  %617 = vmatpush.msrb.mxu1 %v2861_v14 }
  0x35   :  { %599 = vmatpush.msra.mxu0 %v2873_v16  ;;  %718 = vmatpush.msra.mxu3 %v2879_v17 }
  0x36   :  { %699 = vmatpush.msra.mxu2 %v2873_v16  ;;  %618 = vmatpush.msrb.mxu1 %v2879_v17 }
  0x37   :  { %2303 = vmatmul.msk.f32.gmra.mxu0 %vm114_vm0, %v105_v27  ;;  %719 = vmatpush.msra.mxu3 %v2894_v19 }
  0x38   :  { %2310 = vmatmul.msk.f32.gmra.mxu1 %vm114_vm0, %v104_v24  ;;  %2319 = vmatmul.msk.f32.gmra.mxu2 %vm114_vm0, %v105_v27 }
  0x39   :  { %2327 = vmatmul.msk.f32.gmra.mxu3 %vm114_vm0, %v105_v27  ;;  %600 = vmatpush.msra.mxu0 %v2889_v18 }
  0x3a   :  { %700 = vmatpush.msra.mxu2 %v2889_v18  ;;  %619 = vmatpush.msrb.mxu1 %v2894_v19 }
  0x3b   :  { %601 = vmatpush.msra.mxu0 %v2901_v20  ;;  %720 = vmatpush.msra.mxu3 %v2926_v23 }
  0x3c   :  { %701 = vmatpush.msra.mxu2 %v2901_v20  ;;  %620 = vmatpush.msrb.mxu1 %v2926_v23 }
  0x3d   :  { %602 = vmatpush.msra.mxu0 %v2921_v22  ;;  %721 = vmatpush.msra.mxu3 %v2947_v26 }
  0x3e   :  { %702 = vmatpush.msra.mxu2 %v2921_v22  ;;  %621 = vmatpush.msrb.mxu1 %v2947_v26 }
  0x3f   :  { %2304 = vmatmul.msk.f32.gmra.mxu0 %vm114_vm0, %v106_v30  ;;  %722 = vmatpush.msra.mxu3 %v2965_v28 }
  0x40   :  { %2311 = vmatmul.msk.f32.gmra.mxu1 %vm114_vm0, %v105_v27  ;;  %2320 = vmatmul.msk.f32.gmra.mxu2 %vm114_vm0, %v106_v30 }
  0x41   :  { %2328 = vmatmul.msk.f32.gmra.mxu3 %vm114_vm0, %v106_v30  ;;  %603 = vmatpush.msra.mxu0 %v2942_v25 }
  0x42   :  { %703 = vmatpush.msra.mxu2 %v2942_v25  ;;  %622 = vmatpush.msrb.mxu1 %v2965_v28 }
  0x43   :  { %723 = vmatpush.msra.mxu3 %v2972_v29 }
  0x44   :  { %623 = vmatpush.msrb.mxu1 %v2972_v29 }
  0x47   :  { %2305 = vmatmul.msk.f32.gmra.mxu0 %vm114_vm0, %v107_v31 }
  0x48   :  { %2312 = vmatmul.msk.f32.gmra.mxu1 %vm114_vm0, %v106_v30  ;;  %2321 = vmatmul.msk.f32.gmra.mxu2 %vm114_vm0, %v107_v31 }
  0x49   :  { %2329 = vmatmul.msk.f32.gmra.mxu3 %vm114_vm0, %v107_v31 }
  0x4f   :  { %405 = vmatmul.f32.vlgmr.msrb.gmra.mxu0 %v2735_v32 }
  0x50   :  { %2313 = vmatmul.msk.f32.gmra.mxu1 %vm114_vm0, %v107_v31  ;;  %2322 = vmatmul.msk.f32.gmra.mxu2 %vm114_vm0, %v2821_v7 }
  0x51   :  { %2330 = vmatmul.msk.f32.gmra.mxu3 %vm114_vm0, %v2821_v7  ;;  %796 = vmatpush.msrb.mxu0 %v2829_v9 }
  0x53   :  { %797 = vmatpush.msrb.mxu0 %v2842_v11 }
  0x55   :  { %798 = vmatpush.msrb.mxu0 %v2853_v13 }
  0x57   :  { %799 = vmatpush.msrb.mxu0 %v2873_v16 }
  0x58   :  { %2314 = vmatmul.msk.f32.gmra.mxu1 %vm114_vm0, %v2821_v7 }
  0x59   :  { %800 = vmatpush.msrb.mxu0 %v2889_v18 }
  0x5b   :  { %801 = vmatpush.msrb.mxu0 %v2901_v20 }
  0x5d   :  { %802 = vmatpush.msrb.mxu0 %v2921_v22 }
  0x5f   :  { %803 = vmatpush.msrb.mxu0 %v2942_v25 }
  0x60   :  { %425 = vmatmul.f32.vlgmr.msra.gmra.mxu1 %v2735_v32 }
  0x61   :  { %816 = vmatpush.msra.mxu1 %v2848_v12 }
  0x63   :  { %817 = vmatpush.msra.mxu1 %v2861_v14 }
  0x65   :  { %818 = vmatpush.msra.mxu1 %v2879_v17 }
  0x67   :  { %819 = vmatpush.msra.mxu1 %v2894_v19 }
  0x69   :  { %820 = vmatpush.msra.mxu1 %v2926_v23 }
  0x6b   :  { %821 = vmatpush.msra.mxu1 %v2947_v26 }
  0x6d   :  { %822 = vmatpush.msra.mxu1 %v2965_v28 }
  0x6f   :  { %823 = vmatpush.msra.mxu1 %v2972_v29 }
  0x94   :  { %v156_v33 = vpop.f32.mrf.mxu0  ;;  %v177_v34 = vpop.f32.mrf.mxu1 }
  0x9b   :  { %v242_v37 = vpop.f32.mrf.mxu2  ;;  %v283_v38 = vpop.f32.mrf.mxu3 }
  0x9c   :  { %v360_v39 = vadd.f32 %v242_v37, %v177_v34  ;;  %v159_v40 = vpop.f32.mrf.mxu0 }
  0x9d   :  { %v3048_v41 = vpop.f32.mrf.mxu1 }
  0x9e   :  { %v3050_v42 = vadd.f32 %v360_v39, %v310_v36 }
  0xa3   :  { %v245_v43 = vpop.f32.mrf.mxu2 }
  0xa4   :  { %v286_v44 = vpop.f32.mrf.mxu3  ;;  %v162_v45 = vpop.f32.mrf.mxu0 }
  0xa5   :  { %v200_v46 = vpop.f32.mrf.mxu1 }
  0xab   :  { %v248_v47 = vpop.f32.mrf.mxu2 }
  0xac   :  { %v289_v48 = vpop.f32.mrf.mxu3  ;;  %v165_v49 = vpop.f32.mrf.mxu0 }
  0xad   :  { %v203_v50 = vpop.f32.mrf.mxu1 }
  0xb3   :  { %v251_v51 = vpop.f32.mrf.mxu2 }
  0xb4   :  { %v292_v52 = vpop.f32.mrf.mxu3  ;;  %v168_v53 = vpop.f32.mrf.mxu0 }
  0xb5   :  { %v206_v54 = vpop.f32.mrf.mxu1  ;;  %v339_v55 = vadd.f32 %v251_v51, %v168_v53 }
  0xb7   :  { %v3052_v56 = vadd.f32 %v339_v55, %v310_v36 }
  0xbb   :  { %v254_v58 = vpop.f32.mrf.mxu2 }
  0xbc   :  { %v295_v59 = vpop.f32.mrf.mxu3  ;;  %v332_v60 = vadd.f32 %v254_v58, %v165_v49  ;;  %v171_v62 = vpop.f32.mrf.mxu0 }
  0xbd   :  { %v333_v61 = vadd.f32 %v295_v59, %v206_v54  ;;  %v209_v63 = vpop.f32.mrf.mxu1  ;;  %v346_v0 = vadd.f32 %v248_v47, %v171_v62 }
  0xbe   :  { %v340_v1 = vadd.f32 %v292_v52, %v209_v63  ;;  %v3054_v2 = vadd.f32 %v332_v60, %v310_v36 }
  0xbf   :  { %v3056_v3 = vadd.f32 %v333_v61, %v311_v57  ;;  %v3060_v5 = vadd.f32 %v346_v0, %v310_v36 }
  0xc0   :  { %v3058_v4 = vadd.f32 %v340_v1, %v311_v57 }
  0xc3   :  { %v257_v6 = vpop.f32.mrf.mxu2 }
  0xc4   :  { %v298_v7 = vpop.f32.mrf.mxu3  ;;  %v325_v8 = vadd.f32 %v257_v6, %v162_v45  ;;  %v174_v15 = vpop.f32.mrf.mxu0 }
  0xc5   :  { %v326_v10 = vadd.f32 %v298_v7, %v203_v50  ;;  %v212_v21 = vpop.f32.mrf.mxu1  ;;  %v353_v24 = vadd.f32 %v245_v43, %v174_v15 }
  0xc6   :  { %v347_v27 = vadd.f32 %v289_v48, %v212_v21  ;;  %v3062_v30 = vadd.f32 %v325_v8, %v310_v36 }
  0xc7   :  { %v3064_v31 = vadd.f32 %v326_v10, %v311_v57  ;;  %v3068_v35 = vadd.f32 %v353_v24, %v310_v36 }
  0xc8   :  { %v3066_v34 = vadd.f32 %v347_v27, %v311_v57 }
  0xcb   :  { %v260_v37 = vpop.f32.mrf.mxu2 }
  0xcc   :  { %v301_v39 = vpop.f32.mrf.mxu3  ;;  %v318_v47 = vadd.f32 %v260_v37, %v159_v40  ;;  %v406_v58 = vpop.f32.mrf.mxu0 }
  0xcd   :  { %v319_v49 = vadd.f32 %v301_v39, %v200_v46  ;;  %v215_v51 = vpop.f32.mrf.mxu1 }
  0xce   :  { %v354_v52 = vadd.f32 %v286_v44, %v215_v51  ;;  %v3070_v45 = vadd.f32 %v318_v47, %v310_v36 }
  0xcf   :  { %v3072_v50 = vadd.f32 %v319_v49, %v311_v57 }
  0xd0   :  { %v3074_v43 = vadd.f32 %v354_v52, %v311_v57 }
  0xd3   :  { %v263_v48 = vpop.f32.mrf.mxu2 }
  0xd4   :  { %v307_v53 = vadd.f32 %v263_v48, %v156_v33  ;;  %v304_v46 = vpop.f32.mrf.mxu3 }
  0xd5   :  { %v218_v54 = vpop.f32.mrf.mxu1  ;;  %v308_v63 = vadd.f32 %v304_v46, %v3048_v41 }
  0xd6   :  { %v361_v55 = vadd.f32 %v283_v38, %v218_v54  ;;  %v314_v59 = vadd.f32 %v310_v36, %v307_v53 }
  0xd7   :  { %v315_v1 = vadd.f32 %v311_v57, %v308_v63 }
  0xd8   :  { %v3076_v60 = vadd.f32 %v361_v55, %v311_v57  ;;  %v429_v61 = vadd.f32 %v406_v58, %v314_v59 }
  0xda   :  { %v2331_v62 = vmul.f32 -1.442695, %v429_v61 }
  0xdc   :  { %2435 = vpow2.f32 %v2331_v62 }
  0xdd   :  { %v426_v0 = vpop.f32.mrf.mxu1 }
  0xde   :  { %v430_v7 = vadd.f32 %v426_v0, %v315_v1 }
  0xe0   :  { %v2332_v57 = vmul.f32 -1.442695, %v430_v7 }
  0xe2   :  { %v2436_v40 = vpop.eup %2435 }
  0xe3   :  { %v434_v44 = vadd.f32 1.0, %v2436_v40 }
  0xe5   :  { %2437 = vrcp.f32 %v434_v44  ;;  %v446_v38 = vand.u32 2147483648, %v434_v44  ;;  %v444_v10 = vand.u32 2147483647, %v434_v44  ;;  %vm440_vm2 = vweird.f32 %v434_v44 }
  0xe6   :  { %2439 = vtanh.f32 %v430_v7 }
  0xe7   :  { %v447_v21 = vor.u32 1.1754944e-38, %v446_v38  ;;  %vm445_vm4 = vcmp.eq.f32.partialorder %v444_v10, 8.507059e+37  ;;  %2441 = vpow2.f32 %v2332_v57 }
  0xeb   :  { %v2438_v6 = vpop.eup %2437 }
  0xec   :  { %v436_v33 = vmul.f32 %v2438_v6, %v434_v44  ;;  %vm441_vm1 = vweird.f32 %v2438_v6  ;;  %v2440_v27 = vpop.eup %2439 }
  0xed   :  { %vm442_vm3 = vmor %vm440_vm2, %vm441_vm1  ;;  %v2442_v39 = vpop.eup %2441 }
  0xee   :  { %v437_v8 = vsub.f32 1.0, %v436_v33  ;;  %v454_v47 = vadd.f32 1.0, %v2442_v39 }
  0xf0   :  { %v438_v36 = vmul.f32 %v2438_v6, %v437_v8  ;;  %2443 = vrcp.f32 %v454_v47  ;;  %v466_v59 = vand.u32 2147483648, %v454_v47  ;;  %vm460_vm6 = vweird.f32 %v454_v47 }
  0xf1   :  { %v464_v61 = vand.u32 2147483647, %v454_v47 }
  0xf2   :  { %v439_v15 = vadd.f32 %v2438_v6, %v438_v36  ;;  %v467_v40 = vor.u32 1.1754944e-38, %v466_v59 }
  0xf3   :  { %vm465_vm8 = vcmp.eq.f32.partialorder %v464_v61, 8.507059e+37 }
  0xf4   :  { %v443_v24 = vsel %vm442_vm3, %v2438_v6, %v439_v15 }
  0xf5   :  { %v448_v41 = vsel %vm445_vm4, %v447_v21, %v443_v24 }
  0xf6   :  { %v471_v37 = vmul.f32 %v2440_v27, %v448_v41  ;;  %v2444_v49 = vpop.eup %2443  ;;  %v470_v53 = vmul.f32 0.0, %v448_v41 }
  0xf7   :  { %v456_v51 = vmul.f32 %v2444_v49, %v454_v47  ;;  %vm461_vm5 = vweird.f32 %v2444_v49 }
  0xf8   :  { %473 = vrot.lane.b32.xlu0 %v471_v37, %s2736_s3  ;;  %vm462_vm7 = vmor %vm460_vm6, %vm461_vm5 }
  0xf9   :  { %v457_v52 = vsub.f32 1.0, %v456_v51 }
  0xfb   :  { %v458_v48 = vmul.f32 %v2444_v49, %v457_v52 }
  0xfd   :  { %v459_v58 = vadd.f32 %v2444_v49, %v458_v48 }
  0xff   :  { %v463_v62 = vsel %vm462_vm7, %v2444_v49, %v459_v58 }
 0x100   :  { %v468_v44 = vsel %vm465_vm8, %v467_v40, %v463_v62 }
 0x16a   :  { %v474_v54 = vpop.permute.xlu0 %473 }
 0x16b   :  { %v3080_v55 = vadd.f32 %v474_v54, %v470_v53 }
 0x16d   :  { %2445 = vtanh.f32 %v3080_v55 }
 0x173   :  { %v2446_v46 = vpop.eup %2445 }
 0x174   :  { %v478_v63 = vmul.f32 %v2446_v46, %v468_v44 }
 0x176   :  { %480 = vrot.lane.b32.xlu0 %v478_v63, %s2736_s3 }
 0x1e8   :  { %v481_v0 = vpop.permute.xlu0 %480 }
 0x1e9   :  { %483 = vst.msk [vmem:[#allocation3] sm:$0xff] %vm385_vm9, %v481_v0  ;;  %2333 = vmatmul.msk.f32.vlgmr.msrb.gmra.mxu2 %vm385_vm9, %v481_v0  ;;  %2334 = vmatmul.msk.f32.vlgmr.msrb.gmra.mxu3 %vm385_vm9, %v481_v0 }
 0x1ea   :  { %896 = vmatpush.msrb.mxu2 %v2829_v9  ;;  %916 = vmatpush.msrb.mxu3 %v2848_v12 }
 0x1ec   :  { %897 = vmatpush.msrb.mxu2 %v2842_v11  ;;  %917 = vmatpush.msrb.mxu3 %v2861_v14 }
 0x1ee   :  { %898 = vmatpush.msrb.mxu2 %v2853_v13  ;;  %918 = vmatpush.msrb.mxu3 %v2879_v17 }
 0x1f0   :  { %899 = vmatpush.msrb.mxu2 %v2873_v16  ;;  %919 = vmatpush.msrb.mxu3 %v2894_v19 }
 0x1f2   :  { %900 = vmatpush.msrb.mxu2 %v2889_v18  ;;  %920 = vmatpush.msrb.mxu3 %v2926_v23 }
 0x1f4   :  { %901 = vmatpush.msrb.mxu2 %v2901_v20  ;;  %921 = vmatpush.msrb.mxu3 %v2947_v26 }
 0x1f6   :  { %902 = vmatpush.msrb.mxu2 %v2921_v22  ;;  %922 = vmatpush.msrb.mxu3 %v2965_v28 }
 0x1f8   :  { %903 = vmatpush.msrb.mxu2 %v2942_v25  ;;  %923 = vmatpush.msrb.mxu3 %v2972_v29 }
 0x26c   :  { %v505_v1 = vpop.f32.mrf.mxu2  ;;  %v525_v38 = vpop.f32.mrf.mxu3 }
 0x26d   :  { %v528_v6 = vadd.f32 %v505_v1, %v3070_v45  ;;  %v529_v10 = vadd.f32 %v525_v38, %v3072_v50 }
 0x26f   :  { %v2335_v7 = vmul.f32 -1.442695, %v528_v6  ;;  %v2336_v51 = vmul.f32 -1.442695, %v529_v10 }
 0x271   :  { %2447 = vpow2.f32 %v2335_v7 }
 0x277   :  { %v2448_v33 = vpop.eup %2447 }
 0x278   :  { %v533_v8 = vadd.f32 1.0, %v2448_v33 }
 0x27a   :  { %2449 = vrcp.f32 %v533_v8  ;;  %v545_v24 = vand.u32 2147483648, %v533_v8  ;;  %v543_v41 = vand.u32 2147483647, %v533_v8  ;;  %vm539_vm11 = vweird.f32 %v533_v8 }
 0x27b   :  { %2451 = vtanh.f32 %v529_v10 }
 0x27c   :  { %v546_v45 = vor.u32 1.1754944e-38, %v545_v24  ;;  %vm544_vm13 = vcmp.eq.f32.partialorder %v543_v41, 8.507059e+37  ;;  %2453 = vpow2.f32 %v2336_v51 }
 0x280   :  { %v2450_v36 = vpop.eup %2449 }
 0x281   :  { %v535_v15 = vmul.f32 %v2450_v36, %v533_v8  ;;  %vm540_vm10 = vweird.f32 %v2450_v36  ;;  %v2452_v39 = vpop.eup %2451 }
 0x282   :  { %vm541_vm12 = vmor %vm539_vm11, %vm540_vm10  ;;  %v2454_v50 = vpop.eup %2453 }
 0x283   :  { %v536_v21 = vsub.f32 1.0, %v535_v15  ;;  %v553_v52 = vadd.f32 1.0, %v2454_v50 }
 0x285   :  { %v537_v27 = vmul.f32 %v2450_v36, %v536_v21  ;;  %2455 = vrcp.f32 %v553_v52  ;;  %v565_v46 = vand.u32 2147483648, %v553_v52  ;;  %vm559_vm15 = vweird.f32 %v553_v52 }
 0x286   :  { %v563_v44 = vand.u32 2147483647, %v553_v52 }
 0x287   :  { %v538_v37 = vadd.f32 %v2450_v36, %v537_v27  ;;  %v566_v0 = vor.u32 1.1754944e-38, %v565_v46 }
 0x288   :  { %vm564_vm1 = vcmp.eq.f32.partialorder %v563_v44, 8.507059e+37 }
 0x289   :  { %v542_v57 = vsel %vm541_vm12, %v2450_v36, %v538_v37 }
 0x28a   :  { %v547_v47 = vsel %vm544_vm13, %v546_v45, %v542_v57 }
 0x28b   :  { %v570_v49 = vmul.f32 %v2452_v39, %v547_v47  ;;  %v2456_v48 = vpop.eup %2455  ;;  %v569_v59 = vmul.f32 %v547_v47, %v3080_v55 }
 0x28c   :  { %v555_v53 = vmul.f32 %v2456_v48, %v553_v52  ;;  %vm560_vm14 = vweird.f32 %v2456_v48 }
 0x28d   :  { %572 = vrot.lane.b32.xlu1 %v570_v49, %s2736_s3  ;;  %vm561_vm0 = vmor %vm559_vm15, %vm560_vm14 }
 0x28e   :  { %v556_v54 = vsub.f32 1.0, %v555_v53 }
 0x290   :  { %v557_v58 = vmul.f32 %v2456_v48, %v556_v54 }
 0x292   :  { %v558_v40 = vadd.f32 %v2456_v48, %v557_v58 }
 0x294   :  { %v562_v63 = vsel %vm561_vm0, %v2456_v48, %v558_v40 }
 0x295   :  { %v567_v6 = vsel %vm564_vm1, %v566_v0, %v562_v63 }
 0x2ff   :  { %v573_v61 = vpop.permute.xlu1 %572 }
 0x300   :  { %v3107_v62 = vadd.f32 %v573_v61, %v569_v59 }
 0x302   :  { %2457 = vtanh.f32 %v3107_v62 }
 0x308   :  { %v2458_v1 = vpop.eup %2457 }
 0x309   :  { %v577_v7 = vmul.f32 %v2458_v1, %v567_v6 }
 0x30b   :  { %579 = vrot.lane.b32.xlu1 %v577_v7, %s2736_s3 }
 0x37d   :  { %v580_v55 = vpop.permute.xlu1 %579 }
 0x37e   :  { %583 = vst.msk [vmem:[#allocation3 + $0x8] sm:$0xff] %vm385_vm9, %v580_v55  ;;  %2337 = vmatmul.msk.f32.vlgmr.msra.gmra.mxu0 %vm385_vm9, %v580_v55  ;;  %2338 = vmatmul.msk.f32.vlgmr.msrb.gmra.mxu1 %vm385_vm9, %v580_v55 }
 0x37f   :  { %996 = vmatpush.msra.mxu0 %v2829_v9  ;;  %1016 = vmatpush.msrb.mxu1 %v2848_v12 }
 0x381   :  { %997 = vmatpush.msra.mxu0 %v2842_v11  ;;  %1017 = vmatpush.msrb.mxu1 %v2861_v14 }
 0x383   :  { %998 = vmatpush.msra.mxu0 %v2853_v13  ;;  %1018 = vmatpush.msrb.mxu1 %v2879_v17 }
 0x385   :  { %999 = vmatpush.msra.mxu0 %v2873_v16  ;;  %1019 = vmatpush.msrb.mxu1 %v2894_v19 }
 0x387   :  { %1000 = vmatpush.msra.mxu0 %v2889_v18  ;;  %1020 = vmatpush.msrb.mxu1 %v2926_v23 }
 0x389   :  { %1001 = vmatpush.msra.mxu0 %v2901_v20  ;;  %1021 = vmatpush.msrb.mxu1 %v2947_v26 }
 0x38b   :  { %1002 = vmatpush.msra.mxu0 %v2921_v22  ;;  %1022 = vmatpush.msrb.mxu1 %v2965_v28 }
 0x38d   :  { %1003 = vmatpush.msra.mxu0 %v2942_v25  ;;  %1023 = vmatpush.msrb.mxu1 %v2972_v29 }
 0x3fb   :  { %v605_v33 = vpop.f32.mrf.mxu0  ;;  %v625_v15 = vpop.f32.mrf.mxu1 }
 0x3fc   :  { %v628_v8 = vadd.f32 %v605_v33, %v3062_v30  ;;  %v629_v24 = vadd.f32 %v625_v15, %v3064_v31 }
 0x3fe   :  { %v2339_v38 = vmul.f32 -1.442695, %v628_v8  ;;  %v2340_v52 = vmul.f32 -1.442695, %v629_v24 }
 0x400   :  { %2459 = vpow2.f32 %v2339_v38 }
 0x406   :  { %v2460_v36 = vpop.eup %2459 }
 0x407   :  { %v633_v10 = vadd.f32 1.0, %v2460_v36 }
 0x409   :  { %2461 = vrcp.f32 %v633_v10  ;;  %v645_v37 = vand.u32 2147483648, %v633_v10  ;;  %v643_v57 = vand.u32 2147483647, %v633_v10  ;;  %vm639_vm3 = vweird.f32 %v633_v10 }
 0x40a   :  { %2463 = vtanh.f32 %v629_v24 }
 0x40b   :  { %v646_v30 = vor.u32 1.1754944e-38, %v645_v37  ;;  %vm644_vm5 = vcmp.eq.f32.partialorder %v643_v57, 8.507059e+37  ;;  %2465 = vpow2.f32 %v2340_v52 }
 0x40f   :  { %v2462_v21 = vpop.eup %2461 }
 0x410   :  { %v635_v27 = vmul.f32 %v2462_v21, %v633_v10  ;;  %vm640_vm2 = vweird.f32 %v2462_v21  ;;  %v2464_v49 = vpop.eup %2463 }
 0x411   :  { %vm641_vm4 = vmor %vm639_vm3, %vm640_vm2  ;;  %v2466_v31 = vpop.eup %2465 }
 0x412   :  { %v636_v41 = vsub.f32 1.0, %v635_v27  ;;  %v653_v48 = vadd.f32 1.0, %v2466_v31 }
 0x414   :  { %v637_v45 = vmul.f32 %v2462_v21, %v636_v41  ;;  %2467 = vrcp.f32 %v653_v48  ;;  %v665_v63 = vand.u32 2147483648, %v653_v48  ;;  %vm659_vm7 = vweird.f32 %v653_v48 }
 0x415   :  { %v663_v0 = vand.u32 2147483647, %v653_v48 }
 0x416   :  { %v638_v39 = vadd.f32 %v2462_v21, %v637_v45  ;;  %v666_v6 = vor.u32 1.1754944e-38, %v665_v63 }
 0x417   :  { %vm664_vm10 = vcmp.eq.f32.partialorder %v663_v0, 8.507059e+37 }
 0x418   :  { %v642_v47 = vsel %vm641_vm4, %v2462_v21, %v638_v39 }
 0x419   :  { %v647_v51 = vsel %vm644_vm5, %v646_v30, %v642_v47 }
 0x41a   :  { %v670_v50 = vmul.f32 %v2464_v49, %v647_v51  ;;  %v2468_v53 = vpop.eup %2467  ;;  %v669_v61 = vmul.f32 %v647_v51, %v3107_v62 }
 0x41b   :  { %v655_v54 = vmul.f32 %v2468_v53, %v653_v48  ;;  %vm660_vm6 = vweird.f32 %v2468_v53 }
 0x41c   :  { %672 = vrot.lane.b32.xlu2 %v670_v50, %s2736_s3  ;;  %vm661_vm8 = vmor %vm659_vm7, %vm660_vm6 }
 0x41d   :  { %v656_v58 = vsub.f32 1.0, %v655_v54 }
 0x41f   :  { %v657_v59 = vmul.f32 %v2468_v53, %v656_v58 }
 0x421   :  { %v658_v44 = vadd.f32 %v2468_v53, %v657_v59 }
 0x423   :  { %v662_v1 = vsel %vm661_vm8, %v2468_v53, %v658_v44 }
 0x424   :  { %v667_v55 = vsel %vm664_vm10, %v666_v6, %v662_v1 }
 0x476   :  { %v673_v40 = vpop.permute.xlu2 %672 }
 0x477   :  { %v3134_v46 = vadd.f32 %v673_v40, %v669_v61 }
 0x479   :  { %2469 = vtanh.f32 %v3134_v46 }
 0x47f   :  { %v2470_v7 = vpop.eup %2469 }
 0x480   :  { %v677_v33 = vmul.f32 %v2470_v7, %v667_v55 }
 0x482   :  { %679 = vrot.lane.b32.xlu2 %v677_v33, %s2736_s3 }
 0x4dc   :  { %v680_v62 = vpop.permute.xlu2 %679 }
 0x4dd   :  { %683 = vst.msk [vmem:[#allocation3 + $0x10] sm:$0xff] %vm385_vm9, %v680_v62  ;;  %2341 = vmatmul.msk.f32.vlgmr.msra.gmra.mxu2 %vm385_vm9, %v680_v62  ;;  %2342 = vmatmul.msk.f32.vlgmr.msra.gmra.mxu3 %vm385_vm9, %v680_v62 }
 0x4de   :  { %1096 = vmatpush.msra.mxu2 %v2829_v9  ;;  %1116 = vmatpush.msra.mxu3 %v2848_v12 }
 0x4e0   :  { %1097 = vmatpush.msra.mxu2 %v2842_v11  ;;  %1117 = vmatpush.msra.mxu3 %v2861_v14 }
 0x4e2   :  { %1098 = vmatpush.msra.mxu2 %v2853_v13  ;;  %1118 = vmatpush.msra.mxu3 %v2879_v17 }
 0x4e4   :  { %1099 = vmatpush.msra.mxu2 %v2873_v16  ;;  %1119 = vmatpush.msra.mxu3 %v2894_v19 }
 0x4e6   :  { %1100 = vmatpush.msra.mxu2 %v2889_v18  ;;  %1120 = vmatpush.msra.mxu3 %v2926_v23 }
 0x4e8   :  { %1101 = vmatpush.msra.mxu2 %v2901_v20  ;;  %1121 = vmatpush.msra.mxu3 %v2947_v26 }
 0x4ea   :  { %1102 = vmatpush.msra.mxu2 %v2921_v22  ;;  %1122 = vmatpush.msra.mxu3 %v2965_v28 }
 0x4ec   :  { %1103 = vmatpush.msra.mxu2 %v2942_v25  ;;  %1123 = vmatpush.msra.mxu3 %v2972_v29 }
 0x560   :  { %v705_v9 = vpop.f32.mrf.mxu2  ;;  %v725_v16 = vpop.f32.mrf.mxu3 }
 0x561   :  { %v728_v11 = vadd.f32 %v705_v9, %v3054_v2  ;;  %v729_v18 = vadd.f32 %v725_v16, %v3056_v3 }
 0x563   :  { %v2343_v12 = vmul.f32 -1.442695, %v728_v11  ;;  %v2344_v36 = vmul.f32 -1.442695, %v729_v18 }
 0x565   :  { %2471 = vpow2.f32 %v2343_v12 }
 0x56b   :  { %v2472_v13 = vpop.eup %2471 }
 0x56c   :  { %v733_v14 = vadd.f32 1.0, %v2472_v13 }
 0x56e   :  { %2473 = vrcp.f32 %v733_v14  ;;  %v745_v22 = vand.u32 2147483648, %v733_v14  ;;  %v743_v25 = vand.u32 2147483647, %v733_v14  ;;  %vm739_vm12 = vweird.f32 %v733_v14 }
 0x56f   :  { %2475 = vtanh.f32 %v729_v18 }
 0x570   :  { %v746_v28 = vor.u32 1.1754944e-38, %v745_v22  ;;  %vm744_vm14 = vcmp.eq.f32.partialorder %v743_v25, 8.507059e+37  ;;  %2477 = vpow2.f32 %v2344_v36 }
 0x574   :  { %v2474_v17 = vpop.eup %2473 }
 0x575   :  { %v735_v19 = vmul.f32 %v2474_v17, %v733_v14  ;;  %vm740_vm11 = vweird.f32 %v2474_v17  ;;  %v2476_v2 = vpop.eup %2475 }
 0x576   :  { %vm741_vm13 = vmor %vm739_vm12, %vm740_vm11  ;;  %v2478_v3 = vpop.eup %2477 }
 0x577   :  { %v736_v20 = vsub.f32 1.0, %v735_v19  ;;  %v753_v10 = vadd.f32 1.0, %v2478_v3 }
 0x579   :  { %v737_v23 = vmul.f32 %v2474_v17, %v736_v20  ;;  %2479 = vrcp.f32 %v753_v10  ;;  %v765_v39 = vand.u32 2147483648, %v753_v10  ;;  %vm759_vm0 = vweird.f32 %v753_v10 }
 0x57a   :  { %v763_v30 = vand.u32 2147483647, %v753_v10 }
 0x57b   :  { %v738_v26 = vadd.f32 %v2474_v17, %v737_v23  ;;  %v766_v49 = vor.u32 1.1754944e-38, %v765_v39 }
 0x57c   :  { %vm764_vm2 = vcmp.eq.f32.partialorder %v763_v30, 8.507059e+37 }
 0x57d   :  { %v742_v29 = vsel %vm741_vm13, %v2474_v17, %v738_v26 }
 0x57e   :  { %v747_v8 = vsel %vm744_vm14, %v746_v28, %v742_v29 }
 0x57f   :  { %v770_v38 = vmul.f32 %v2476_v2, %v747_v8  ;;  %v2480_v15 = vpop.eup %2479  ;;  %v769_v41 = vmul.f32 %v747_v8, %v3134_v46 }
 0x580   :  { %v755_v21 = vmul.f32 %v2480_v15, %v753_v10  ;;  %vm760_vm15 = vweird.f32 %v2480_v15 }
 0x581   :  { %772 = vrot.lane.b32.xlu0 %v770_v38, %s2736_s3  ;;  %vm761_vm1 = vmor %vm759_vm0, %vm760_vm15 }
 0x582   :  { %v756_v24 = vsub.f32 1.0, %v755_v21 }
 0x584   :  { %v757_v27 = vmul.f32 %v2480_v15, %v756_v24 }
 0x586   :  { %v758_v57 = vadd.f32 %v2480_v15, %v757_v27 }
 0x588   :  { %v762_v47 = vsel %vm761_vm1, %v2480_v15, %v758_v57 }
 0x589   :  { %v767_v50 = vsel %vm764_vm2, %v766_v49, %v762_v47 }
 0x5f3   :  { %v773_v37 = vpop.permute.xlu0 %772 }
 0x5f4   :  { %v775_v45 = vadd.f32 %v773_v37, %v769_v41 }
 0x5f6   :  { %2481 = vtanh.f32 %v775_v45 }
 0x5fc   :  { %v2482_v51 = vpop.eup %2481 }
 0x5fd   :  { %v777_v52 = vmul.f32 %v2482_v51, %v767_v50 }
 0x5ff   :  { %779 = vrot.lane.b32.xlu1 %v777_v52, %s2736_s3 }
 0x671   :  { %v780_v31 = vpop.permute.xlu1 %779 }
 0x672   :  { %783 = vst.msk [vmem:[#allocation3 + $0x18] sm:$0xff] %vm385_vm9, %v780_v31  ;;  %2345 = vmatmul.msk.f32.vlgmr.msrb.gmra.mxu0 %vm385_vm9, %v780_v31  ;;  %2346 = vmatmul.msk.f32.vlgmr.msra.gmra.mxu1 %vm385_vm9, %v780_v31 }
 0x6ef   :  { %v805_v48 = vpop.f32.mrf.mxu0  ;;  %v825_v61 = vpop.f32.mrf.mxu1 }
 0x6f0   :  { %v828_v53 = vadd.f32 %v805_v48, %v3052_v56  ;;  %v829_v46 = vadd.f32 %v825_v61, %v3058_v4  ;;  %v1203_v61 = vld [vmem:[#allocation6 + $0x50] sm:$0xff] }
 0x6f2   :  { %v2347_v54 = vmul.f32 -1.442695, %v828_v53  ;;  %v2348_v11 = vmul.f32 -1.442695, %v829_v46  ;;  %v1207_v53 = vld [vmem:[#allocation6 + $0x70] sm:$0xff] }
 0x6f3   :  { %1241 = vmatpush.msrb.mxu0 %v1207_v53  ;;  %v1330_v53 = vld [vmem:[#allocation8 + $0x78] sm:$0xff] }
 0x6f4   :  { %2483 = vpow2.f32 %v2347_v54  ;;  %v1208_v54 = vld [vmem:[#allocation6 + $0x78] sm:$0xff] }
 0x6f5   :  { %1282 = vmatpush.msra.mxu1 %v1208_v54  ;;  %v1327_v54 = vld [vmem:[#allocation8 + $0x60] sm:$0xff] }
 0x6fa   :  { %v2484_v58 = vpop.eup %2483 }
 0x6fb   :  { %v833_v59 = vadd.f32 1.0, %v2484_v58  ;;  %v1205_v58 = vld [vmem:[#allocation6 + $0x60] sm:$0xff] }
 0x6fc   :  { %1242 = vmatpush.msrb.mxu0 %v1205_v58  ;;  %v1328_v58 = vld [vmem:[#allocation8 + $0x68] sm:$0xff] }
 0x6fd   :  { %2485 = vrcp.f32 %v833_v59  ;;  %v845_v0 = vand.u32 2147483648, %v833_v59  ;;  %v843_v6 = vand.u32 2147483647, %v833_v59  ;;  %vm839_vm4 = vweird.f32 %v833_v59 }
 0x6fe   :  { %2487 = vtanh.f32 %v829_v46  ;;  %v1201_v46 = vld [vmem:[#allocation6 + $0x40] sm:$0xff]  ;;  %1243 = vmatpush.msrb.mxu0 %v1203_v61  ;;  %v1326_v61 = vld [vmem:[#allocation8 + $0x58] sm:$0xff] }
 0x6ff   :  { %v846_v56 = vor.u32 1.1754944e-38, %v845_v0  ;;  %vm844_vm6 = vcmp.eq.f32.partialorder %v843_v6, 8.507059e+37  ;;  %2489 = vpow2.f32 %v2348_v11 }
 0x700   :  { %1244 = vmatpush.msrb.mxu0 %v1201_v46  ;;  %v1324_v46 = vld [vmem:[#allocation8 + $0x48] sm:$0xff] }
 0x703   :  { %v2486_v40 = vpop.eup %2485 }
 0x704   :  { %v835_v44 = vmul.f32 %v2486_v40, %v833_v59  ;;  %vm840_vm3 = vweird.f32 %v2486_v40  ;;  %v2488_v33 = vpop.eup %2487  ;;  %v1206_v59 = vld [vmem:[#allocation6 + $0x68] sm:$0xff] }
 0x705   :  { %vm841_vm5 = vmor %vm839_vm4, %vm840_vm3  ;;  %v2490_v4 = vpop.eup %2489  ;;  %1283 = vmatpush.msra.mxu1 %v1206_v59  ;;  %v1325_v59 = vld [vmem:[#allocation8 + $0x50] sm:$0xff] }
 0x706   :  { %v836_v63 = vsub.f32 1.0, %v835_v44  ;;  %v853_v12 = vadd.f32 1.0, %v2490_v4  ;;  %v1202_v44 = vld [vmem:[#allocation6 + $0x48] sm:$0xff] }
 0x708   :  { %v837_v1 = vmul.f32 %v2486_v40, %v836_v63  ;;  %2491 = vrcp.f32 %v853_v12  ;;  %v865_v23 = vand.u32 2147483648, %v853_v12  ;;  %vm859_vm8 = vweird.f32 %v853_v12 }
 0x709   :  { %v863_v25 = vand.u32 2147483647, %v853_v12 }
 0x70a   :  { %v838_v7 = vadd.f32 %v2486_v40, %v837_v1  ;;  %v866_v28 = vor.u32 1.1754944e-38, %v865_v23  ;;  %v1193_v23 = vld [vmem:[#allocation6] sm:$0xff] }
 0x70b   :  { %vm864_vm11 = vcmp.eq.f32.partialorder %v863_v25, 8.507059e+37  ;;  %v1194_v25 = vld [vmem:[#allocation6 + $0x8] sm:$0xff] }
 0x70c   :  { %v842_v55 = vsel %vm841_vm5, %v2486_v40, %v838_v7  ;;  %v1204_v40 = vld [vmem:[#allocation6 + $0x58] sm:$0xff] }
 0x70d   :  { %v847_v62 = vsel %vm844_vm6, %v846_v56, %v842_v55  ;;  %1284 = vmatpush.msra.mxu1 %v1204_v40  ;;  %v1323_v40 = vld [vmem:[#allocation8 + $0x40] sm:$0xff] }
 0x70e   :  { %v870_v9 = vmul.f32 %v2488_v33, %v847_v62  ;;  %v2492_v13 = vpop.eup %2491  ;;  %v869_v18 = vmul.f32 %v847_v62, %v775_v45 }
 0x70f   :  { %v855_v14 = vmul.f32 %v2492_v13, %v853_v12  ;;  %vm860_vm7 = vweird.f32 %v2492_v13  ;;  %1285 = vmatpush.msra.mxu1 %v1202_v44 }
 0x710   :  { %872 = vrot.lane.b32.xlu2 %v870_v9, %s2736_s3  ;;  %vm861_vm10 = vmor %vm859_vm8, %vm860_vm7 }
 0x711   :  { %v856_v16 = vsub.f32 1.0, %v855_v14 }
 0x713   :  { %v857_v17 = vmul.f32 %v2492_v13, %v856_v16  ;;  %v1199_v16 = vld [vmem:[#allocation6 + $0x30] sm:$0xff] }
 0x714   :  { %1245 = vmatpush.msrb.mxu0 %v1199_v16  ;;  %v1322_v16 = vld [vmem:[#allocation8 + $0x38] sm:$0xff] }
 0x715   :  { %v858_v22 = vadd.f32 %v2492_v13, %v857_v17  ;;  %v1200_v17 = vld [vmem:[#allocation6 + $0x38] sm:$0xff] }
 0x716   :  { %1286 = vmatpush.msra.mxu1 %v1200_v17  ;;  %v1319_v17 = vld [vmem:[#allocation8 + $0x20] sm:$0xff] }
 0x717   :  { %v862_v26 = vsel %vm861_vm10, %v2492_v13, %v858_v22  ;;  %v1196_v22 = vld [vmem:[#allocation6 + $0x18] sm:$0xff] }
 0x718   :  { %v867_v2 = vsel %vm864_vm11, %v866_v28, %v862_v26  ;;  %v3186_v28 = vld [vmem:[#allocation3] sm:$0xff] }
 0x76a   :  { %v873_v19 = vpop.permute.xlu2 %872 }
 0x76b   :  { %v3168_v20 = vadd.f32 %v873_v19, %v869_v18  ;;  %v1197_v18 = vld [vmem:[#allocation6 + $0x20] sm:$0xff]  ;;  %v1198_v19 = vld [vmem:[#allocation6 + $0x28] sm:$0xff] }
 0x76c   :  { %1246 = vmatpush.msrb.mxu0 %v1197_v18  ;;  %1287 = vmatpush.msra.mxu1 %v1198_v19  ;;  %v1320_v18 = vld [vmem:[#allocation8 + $0x28] sm:$0xff]  ;;  %v1317_v19 = vld [vmem:[#allocation8 + $0x10] sm:$0xff] }
 0x76d   :  { %2493 = vtanh.f32 %v3168_v20 }
 0x76e   :  { %1288 = vmatpush.msra.mxu1 %v1196_v22  ;;  %v1315_v22 = vld [vmem:[#allocation8] sm:$0xff] }
 0x770   :  { %1289 = vmatpush.msra.mxu1 %v1194_v25 }
 0x773   :  { %v2494_v29 = vpop.eup %2493 }
 0x774   :  { %v877_v8 = vmul.f32 %v2494_v29, %v867_v2  ;;  %v3192_v29 = vld [vmem:[#allocation3 + $0x8] sm:$0xff]  ;;  %v3198_v2 = vld [vmem:[#allocation3 + $0x10] sm:$0xff] }
 0x776   :  { %879 = vrot.lane.b32.xlu0 %v877_v8, %s2736_s3  ;;  %v3204_v8 = vld [vmem:[#allocation3 + $0x18] sm:$0xff] }
 0x7e8   :  { %v880_v38 = vpop.permute.xlu0 %879 }
 0x7e9   :  { %883 = vst.msk [vmem:[#allocation3 + $0x20] sm:$0xff] %vm385_vm9, %v880_v38  ;;  %2349 = vmatmul.msk.f32.vlgmr.msrb.gmra.mxu2 %vm385_vm9, %v880_v38  ;;  %2350 = vmatmul.msk.f32.vlgmr.msrb.gmra.mxu3 %vm385_vm9, %v880_v38 }
 0x7ea   :  { %1380 = vmatpush.msrb.mxu3 %v1330_v53 }
 0x7ec   :  { %1381 = vmatpush.msrb.mxu3 %v1328_v58 }
 0x7ee   :  { %1382 = vmatpush.msrb.mxu3 %v1326_v61 }
 0x7f0   :  { %v3210_v38 = vld [vmem:[#allocation3 + $0x20] sm:$0xff]  ;;  %1383 = vmatpush.msrb.mxu3 %v1324_v46 }
 0x7f2   :  { %1384 = vmatpush.msrb.mxu3 %v1322_v16 }
 0x7f4   :  { %1385 = vmatpush.msrb.mxu3 %v1320_v18 }
 0x86c   :  { %v905_v36 = vpop.f32.mrf.mxu2  ;;  %v925_v24 = vpop.f32.mrf.mxu3 }
 0x86d   :  { %v928_v3 = vadd.f32 %v905_v36, %v3060_v5  ;;  %v929_v41 = vadd.f32 %v925_v24, %v3066_v34 }
 0x86f   :  { %v2351_v10 = vmul.f32 -1.442695, %v928_v3  ;;  %v2352_v31 = vmul.f32 -1.442695, %v929_v41 }
 0x871   :  { %2495 = vpow2.f32 %v2351_v10 }
 0x877   :  { %v2496_v15 = vpop.eup %2495 }
 0x878   :  { %v933_v21 = vadd.f32 1.0, %v2496_v15 }
 0x87a   :  { %2497 = vrcp.f32 %v933_v21  ;;  %v945_v57 = vand.u32 2147483648, %v933_v21  ;;  %v943_v30 = vand.u32 2147483647, %v933_v21  ;;  %vm939_vm13 = vweird.f32 %v933_v21 }
 0x87b   :  { %2499 = vtanh.f32 %v929_v41 }
 0x87c   :  { %v946_v5 = vor.u32 1.1754944e-38, %v945_v57  ;;  %vm944_vm15 = vcmp.eq.f32.partialorder %v943_v30, 8.507059e+37  ;;  %2501 = vpow2.f32 %v2352_v31 }
 0x880   :  { %v2498_v27 = vpop.eup %2497 }
 0x881   :  { %v935_v37 = vmul.f32 %v2498_v27, %v933_v21  ;;  %vm940_vm12 = vweird.f32 %v2498_v27  ;;  %v2500_v51 = vpop.eup %2499 }
 0x882   :  { %vm941_vm14 = vmor %vm939_vm13, %vm940_vm12  ;;  %v2502_v34 = vpop.eup %2501 }
 0x883   :  { %v936_v45 = vsub.f32 1.0, %v935_v37  ;;  %v953_v48 = vadd.f32 1.0, %v2502_v34 }
 0x885   :  { %v937_v39 = vmul.f32 %v2498_v27, %v936_v45  ;;  %2503 = vrcp.f32 %v953_v48  ;;  %v965_v62 = vand.u32 2147483648, %v953_v48  ;;  %vm959_vm1 = vweird.f32 %v953_v48 }
 0x886   :  { %v963_v9 = vand.u32 2147483647, %v953_v48 }
 0x887   :  { %v938_v47 = vadd.f32 %v2498_v27, %v937_v39  ;;  %v966_v4 = vor.u32 1.1754944e-38, %v965_v62 }
 0x888   :  { %vm964_vm3 = vcmp.eq.f32.partialorder %v963_v9, 8.507059e+37 }
 0x889   :  { %v942_v49 = vsel %vm941_vm14, %v2498_v27, %v938_v47 }
 0x88a   :  { %v947_v50 = vsel %vm944_vm15, %v946_v5, %v942_v49 }
 0x88b   :  { %v970_v52 = vmul.f32 %v2500_v51, %v947_v50  ;;  %v2504_v63 = vpop.eup %2503  ;;  %v969_v7 = vmul.f32 %v947_v50, %v3168_v20  ;;  %v1195_v20 = vld [vmem:[#allocation6 + $0x10] sm:$0xff] }
 0x88c   :  { %v955_v0 = vmul.f32 %v2504_v63, %v953_v48  ;;  %vm960_vm0 = vweird.f32 %v2504_v63  ;;  %1247 = vmatpush.msrb.mxu0 %v1195_v20  ;;  %v1329_v48 = vld [vmem:[#allocation8 + $0x70] sm:$0xff]  ;;  %v1318_v20 = vld [vmem:[#allocation8 + $0x18] sm:$0xff] }
 0x88d   :  { %972 = vrot.lane.b32.xlu1 %v970_v52, %s2736_s3  ;;  %vm961_vm2 = vmor %vm959_vm1, %vm960_vm0  ;;  %1339 = vmatpush.msrb.mxu2 %v1329_v48 }
 0x88e   :  { %v956_v1 = vsub.f32 1.0, %v955_v0  ;;  %1248 = vmatpush.msrb.mxu0 %v1193_v23  ;;  %v1316_v23 = vld [vmem:[#allocation8 + $0x8] sm:$0xff]  ;;  %1386 = vmatpush.msrb.mxu3 %v1318_v20 }
 0x88f   :  { %1340 = vmatpush.msrb.mxu2 %v1327_v54 }
 0x890   :  { %v957_v6 = vmul.f32 %v2504_v63, %v956_v1  ;;  %1387 = vmatpush.msrb.mxu3 %v1316_v23 }
 0x891   :  { %1341 = vmatpush.msrb.mxu2 %v1325_v59 }
 0x892   :  { %v958_v33 = vadd.f32 %v2504_v63, %v957_v6 }
 0x893   :  { %1342 = vmatpush.msrb.mxu2 %v1323_v40 }
 0x894   :  { %v962_v11 = vsel %vm961_vm2, %v2504_v63, %v958_v33 }
 0x895   :  { %v967_v13 = vsel %vm964_vm3, %v966_v4, %v962_v11 }
 0x8ff   :  { %v973_v56 = vpop.permute.xlu1 %972 }
 0x900   :  { %v3179_v55 = vadd.f32 %v973_v56, %v969_v7 }
 0x902   :  { %2505 = vtanh.f32 %v3179_v55 }
 0x908   :  { %v2506_v12 = vpop.eup %2505 }
 0x909   :  { %v977_v14 = vmul.f32 %v2506_v12, %v967_v13 }
 0x90b   :  { %979 = vrot.lane.b32.xlu2 %v977_v14, %s2736_s3 }
 0x965   :  { %v980_v26 = vpop.permute.xlu2 %979 }
 0x966   :  { %983 = vst.msk [vmem:[#allocation3 + $0x28] sm:$0xff] %vm385_vm9, %v980_v26  ;;  %2353 = vmatmul.msk.f32.vlgmr.msra.gmra.mxu0 %vm385_vm9, %v980_v26  ;;  %2354 = vmatmul.msk.f32.vlgmr.msrb.gmra.mxu1 %vm385_vm9, %v980_v26 }
 0x96d   :  { %v3216_v36 = vld [vmem:[#allocation3 + $0x28] sm:$0xff] }
 0x96e   :  { %2361 = vmatmul.msk.f32.vlgmr.msrb.gmra.mxu0 %vm385_vm9, %v3186_v28  ;;  %2369 = vmatmul.msk.f32.vlgmr.msra.gmra.mxu1 %vm385_vm9, %v3186_v28 }
 0x976   :  { %2362 = vmatmul.msk.f32.gmra.mxu0 %vm385_vm9, %v3192_v29  ;;  %2370 = vmatmul.msk.f32.gmra.mxu1 %vm385_vm9, %v3192_v29 }
 0x97e   :  { %2363 = vmatmul.msk.f32.gmra.mxu0 %vm385_vm9, %v3198_v2  ;;  %2371 = vmatmul.msk.f32.gmra.mxu1 %vm385_vm9, %v3198_v2 }
 0x986   :  { %2364 = vmatmul.msk.f32.gmra.mxu0 %vm385_vm9, %v3204_v8  ;;  %2372 = vmatmul.msk.f32.gmra.mxu1 %vm385_vm9, %v3204_v8 }
 0x98e   :  { %2365 = vmatmul.msk.f32.gmra.mxu0 %vm385_vm9, %v3210_v38  ;;  %2373 = vmatmul.msk.f32.gmra.mxu1 %vm385_vm9, %v3210_v38 }
 0x996   :  { %2366 = vmatmul.msk.f32.gmra.mxu0 %vm385_vm9, %v3216_v36  ;;  %2374 = vmatmul.msk.f32.gmra.mxu1 %vm385_vm9, %v3216_v36 }
 0x9e3   :  { %v1005_v3 = vpop.f32.mrf.mxu0  ;;  %v1025_v27 = vpop.f32.mrf.mxu1 }
 0x9e4   :  { %v1028_v10 = vadd.f32 %v1005_v3, %v3068_v35  ;;  %v1029_v37 = vadd.f32 %v1025_v27, %v3074_v43 }
 0x9e6   :  { %v2355_v15 = vmul.f32 -1.442695, %v1028_v10  ;;  %v2356_v31 = vmul.f32 -1.442695, %v1029_v37 }
 0x9e8   :  { %2507 = vpow2.f32 %v2355_v15 }
 0x9ee   :  { %v2508_v21 = vpop.eup %2507 }
 0x9ef   :  { %v1033_v24 = vadd.f32 1.0, %v2508_v21 }
 0x9f1   :  { %2509 = vrcp.f32 %v1033_v24  ;;  %v1045_v39 = vand.u32 2147483648, %v1033_v24  ;;  %v1043_v47 = vand.u32 2147483647, %v1033_v24  ;;  %vm1039_vm5 = vweird.f32 %v1033_v24 }
 0x9f2   :  { %2511 = vtanh.f32 %v1029_v37 }
 0x9f3   :  { %v1046_v35 = vor.u32 1.1754944e-38, %v1045_v39  ;;  %vm1044_vm7 = vcmp.eq.f32.partialorder %v1043_v47, 8.507059e+37  ;;  %2513 = vpow2.f32 %v2356_v31 }
 0x9f7   :  { %v2510_v41 = vpop.eup %2509 }
 0x9f8   :  { %v1035_v45 = vmul.f32 %v2510_v41, %v1033_v24  ;;  %vm1040_vm4 = vweird.f32 %v2510_v41  ;;  %v2512_v51 = vpop.eup %2511 }
 0x9f9   :  { %vm1041_vm6 = vmor %vm1039_vm5, %vm1040_vm4  ;;  %v2514_v43 = vpop.eup %2513 }
 0x9fa   :  { %v1036_v57 = vsub.f32 1.0, %v1035_v45  ;;  %v1053_v34 = vadd.f32 1.0, %v2514_v43 }
 0x9fc   :  { %v1037_v30 = vmul.f32 %v2510_v41, %v1036_v57  ;;  %2515 = vrcp.f32 %v1053_v34  ;;  %v1065_v62 = vand.u32 2147483648, %v1053_v34  ;;  %vm1059_vm10 = vweird.f32 %v1053_v34 }
 0x9fd   :  { %v1063_v9 = vand.u32 2147483647, %v1053_v34 }
 0x9fe   :  { %v1038_v5 = vadd.f32 %v2510_v41, %v1037_v30  ;;  %v1066_v4 = vor.u32 1.1754944e-38, %v1065_v62  ;;  %v3303_v62 = vld [vmem:[#allocation9 + $0x68] sm:$0xff] }
 0x9ff   :  { %vm1064_vm12 = vcmp.eq.f32.partialorder %v1063_v9, 8.507059e+37  ;;  %v3306_v9 = vld [vmem:[#allocation9 + $0x50] sm:$0xff] }
 0xa00   :  { %v1042_v49 = vsel %vm1041_vm6, %v2510_v41, %v1038_v5 }
 0xa01   :  { %v1047_v50 = vsel %vm1044_vm7, %v1046_v35, %v1042_v49 }
 0xa02   :  { %v1070_v52 = vmul.f32 %v2512_v51, %v1047_v50  ;;  %v2516_v44 = vpop.eup %2515  ;;  %v1069_v6 = vmul.f32 %v1047_v50, %v3179_v55  ;;  %v1321_v55 = vld [vmem:[#allocation8 + $0x30] sm:$0xff] }
 0xa03   :  { %v1055_v63 = vmul.f32 %v2516_v44, %v1053_v34  ;;  %vm1060_vm8 = vweird.f32 %v2516_v44  ;;  %1343 = vmatpush.msrb.mxu2 %v1321_v55  ;;  %v3328_v55 = vld [vmem:[#allocation9 + $0x20] sm:$0xff] }
 0xa04   :  { %1072 = vrot.lane.b32.xlu0 %v1070_v52, %s2736_s3  ;;  %vm1061_vm11 = vmor %vm1059_vm10, %vm1060_vm8 }
 0xa05   :  { %v1056_v0 = vsub.f32 1.0, %v1055_v63  ;;  %1344 = vmatpush.msrb.mxu2 %v1319_v17 }
 0xa07   :  { %v1057_v1 = vmul.f32 %v2516_v44, %v1056_v0  ;;  %1345 = vmatpush.msrb.mxu2 %v1317_v19 }
 0xa09   :  { %v1058_v33 = vadd.f32 %v2516_v44, %v1057_v1  ;;  %1346 = vmatpush.msrb.mxu2 %v1315_v22 }
 0xa0b   :  { %v1062_v11 = vsel %vm1061_vm11, %v2516_v44, %v1058_v33  ;;  %v3301_v33 = vld [vmem:[#allocation9 + $0x78] sm:$0xff] }
 0xa0c   :  { %v1067_v13 = vsel %vm1064_vm12, %v1066_v4, %v1062_v11  ;;  %1512 = vmatpush.msrb.mxu1 %v3301_v33  ;;  %v3311_v11 = vld [vmem:[#allocation9 + $0x58] sm:$0xff]  ;;  %v3314_v4 = vld [vmem:[#allocation9 + $0x40] sm:$0xff] }
 0xa0e   :  { %1513 = vmatpush.msrb.mxu1 %v3303_v62 }
 0xa10   :  { %1514 = vmatpush.msrb.mxu1 %v3311_v11 }
 0xa76   :  { %v1073_v7 = vpop.permute.xlu0 %1072 }
 0xa77   :  { %v3226_v56 = vadd.f32 %v1073_v7, %v1069_v6  ;;  %v3296_v6 = vld [vmem:[#allocation9 + $0x70] sm:$0xff]  ;;  %v3298_v7 = vld [vmem:[#allocation9 + $0x60] sm:$0xff] }
 0xa78   :  { %1492 = vmatpush.msra.mxu0 %v3296_v6 }
 0xa79   :  { %2517 = vtanh.f32 %v3226_v56 }
 0xa7a   :  { %1493 = vmatpush.msra.mxu0 %v3298_v7 }
 0xa7c   :  { %1494 = vmatpush.msra.mxu0 %v3306_v9 }
 0xa7e   :  { %1495 = vmatpush.msra.mxu0 %v3314_v4 }
 0xa7f   :  { %v2518_v12 = vpop.eup %2517 }
 0xa80   :  { %v1077_v14 = vmul.f32 %v2518_v12, %v1067_v13  ;;  %v3319_v12 = vld [vmem:[#allocation9 + $0x48] sm:$0xff]  ;;  %v3322_v13 = vld [vmem:[#allocation9 + $0x30] sm:$0xff] }
 0xa81   :  { %1515 = vmatpush.msrb.mxu1 %v3319_v12  ;;  %1496 = vmatpush.msra.mxu0 %v3322_v13 }
 0xa82   :  { %1079 = vrot.lane.b32.xlu1 %v1077_v14, %s2736_s3 }
 0xa83   :  { %1497 = vmatpush.msra.mxu0 %v3328_v55 }
 0xaf4   :  { %v1080_v25 = vpop.permute.xlu1 %1079 }
 0xaf5   :  { %1083 = vst.msk [vmem:[#allocation3 + $0x30] sm:$0xff] %vm385_vm9, %v1080_v25  ;;  %2357 = vmatmul.msk.f32.vlgmr.msra.gmra.mxu2 %vm385_vm9, %v1080_v25  ;;  %2358 = vmatmul.msk.f32.vlgmr.msra.gmra.mxu3 %vm385_vm9, %v1080_v25 }
 0xaf6   :  { %1589 = vmatpush.msra.mxu2 %v3296_v6  ;;  %1609 = vmatpush.msra.mxu3 %v3301_v33 }
 0xaf8   :  { %1590 = vmatpush.msra.mxu2 %v3298_v7  ;;  %1610 = vmatpush.msra.mxu3 %v3303_v62 }
 0xafa   :  { %1591 = vmatpush.msra.mxu2 %v3306_v9  ;;  %1611 = vmatpush.msra.mxu3 %v3311_v11 }
 0xafc   :  { %v1190_v26 = vld [vmem:[#allocation3 + $0x30] sm:$0xff]  ;;  %1592 = vmatpush.msra.mxu2 %v3314_v4  ;;  %1612 = vmatpush.msra.mxu3 %v3319_v12 }
 0xafd   :  { %2367 = vmatmul.msk.f32.gmra.mxu0 %vm385_vm9, %v1190_v26  ;;  %2375 = vmatmul.msk.f32.gmra.mxu1 %vm385_vm9, %v1190_v26 }
 0xafe   :  { %2377 = vmatmul.msk.f32.vlgmr.msrb.gmra.mxu2 %vm385_vm9, %v3186_v28  ;;  %2385 = vmatmul.msk.f32.vlgmr.msrb.gmra.mxu3 %vm385_vm9, %v3186_v28  ;;  %v3261_v28 = vpop.f32.mrf.mxu0 }
 0xaff   :  { %1593 = vmatpush.msra.mxu2 %v3322_v13 }
 0xb01   :  { %1594 = vmatpush.msra.mxu2 %v3328_v55 }
 0xb06   :  { %2378 = vmatmul.msk.f32.gmra.mxu2 %vm385_vm9, %v3192_v29  ;;  %2386 = vmatmul.msk.f32.gmra.mxu3 %vm385_vm9, %v3192_v29  ;;  %v3263_v29 = vpop.f32.mrf.mxu1 }
 0xb0e   :  { %2379 = vmatmul.msk.f32.gmra.mxu2 %vm385_vm9, %v3198_v2  ;;  %2387 = vmatmul.msk.f32.gmra.mxu3 %vm385_vm9, %v3198_v2  ;;  %v3265_v2 = vpop.f32.mrf.mxu0 }
 0xb16   :  { %2380 = vmatmul.msk.f32.gmra.mxu2 %vm385_vm9, %v3204_v8  ;;  %2388 = vmatmul.msk.f32.gmra.mxu3 %vm385_vm9, %v3204_v8  ;;  %v3267_v8 = vpop.f32.mrf.mxu1  ;;  %v3269_v3 = vpop.f32.mrf.mxu0 }
 0xb1e   :  { %2381 = vmatmul.msk.f32.gmra.mxu2 %vm385_vm9, %v3210_v38  ;;  %2389 = vmatmul.msk.f32.gmra.mxu3 %vm385_vm9, %v3210_v38  ;;  %v3271_v38 = vpop.f32.mrf.mxu1  ;;  %v3274_v24 = vpop.f32.mrf.mxu0 }
 0xb26   :  { %2382 = vmatmul.msk.f32.gmra.mxu2 %vm385_vm9, %v3216_v36  ;;  %2390 = vmatmul.msk.f32.gmra.mxu3 %vm385_vm9, %v3216_v36  ;;  %v3276_v27 = vpop.f32.mrf.mxu1  ;;  %v3282_v39 = vpop.f32.mrf.mxu0 }
 0xb2e   :  { %2383 = vmatmul.msk.f32.gmra.mxu2 %vm385_vm9, %v1190_v26  ;;  %2391 = vmatmul.msk.f32.gmra.mxu3 %vm385_vm9, %v1190_v26  ;;  %v3284_v30 = vpop.f32.mrf.mxu1  ;;  %v1265_v50 = vpop.f32.mrf.mxu0 }
 0xb36   :  { %v1306_v52 = vpop.f32.mrf.mxu1 }
 0xb78   :  { %v1105_v10 = vpop.f32.mrf.mxu2  ;;  %v1125_v15 = vpop.f32.mrf.mxu3 }
 0xb79   :  { %v1128_v36 = vadd.f32 %v1105_v10, %v3050_v42  ;;  %v1129_v35 = vadd.f32 %v1125_v15, %v3076_v60 }
 0xb7b   :  { %v2359_v21 = vmul.f32 -1.442695, %v1128_v36  ;;  %v2360_v63 = vmul.f32 -1.442695, %v1129_v35 }
 0xb7d   :  { %2519 = vpow2.f32 %v2359_v21 }
 0xb81   :  { %v3278_v41 = vpop.f32.mrf.mxu2  ;;  %v3280_v37 = vpop.f32.mrf.mxu3 }
 0xb83   :  { %v2520_v45 = vpop.eup %2519 }
 0xb84   :  { %v1133_v57 = vadd.f32 1.0, %v2520_v45 }
 0xb86   :  { %2521 = vrcp.f32 %v1133_v57  ;;  %v1145_v31 = vand.u32 2147483648, %v1133_v57  ;;  %v1143_v53 = vand.u32 2147483647, %v1133_v57  ;;  %vm1139_vm14 = vweird.f32 %v1133_v57 }
 0xb87   :  { %2523 = vtanh.f32 %v1129_v35  ;;  %v3348_v35 = vld [vmem:[#allocation9 + $0x28] sm:$0xff] }
 0xb88   :  { %v1146_v61 = vor.u32 1.1754944e-38, %v1145_v31  ;;  %vm1144_vm0 = vcmp.eq.f32.partialorder %v1143_v53, 8.507059e+37  ;;  %2525 = vpow2.f32 %v2360_v63  ;;  %v3427_v53 = vpop.f32.mrf.mxu0 }
 0xb89   :  { %v3286_v47 = vpop.f32.mrf.mxu2  ;;  %v3288_v42 = vpop.f32.mrf.mxu3 }
 0xb8c   :  { %v2522_v5 = vpop.eup %2521 }
 0xb8d   :  { %v1135_v49 = vmul.f32 %v2522_v5, %v1133_v57  ;;  %vm1140_vm13 = vweird.f32 %v2522_v5  ;;  %v2524_v40 = vpop.eup %2523  ;;  %v3338_v57 = vld [vmem:[#allocation9 + $0x10] sm:$0xff] }
 0xb8e   :  { %vm1141_vm15 = vmor %vm1139_vm14, %vm1140_vm13  ;;  %v2526_v0 = vpop.eup %2525  ;;  %1498 = vmatpush.msra.mxu0 %v3338_v57  ;;  %1595 = vmatpush.msra.mxu2 %v3338_v57 }
 0xb8f   :  { %v1136_v51 = vsub.f32 1.0, %v1135_v49  ;;  %v1153_v1 = vadd.f32 1.0, %v2526_v0  ;;  %v3350_v49 = vld [vmem:[#allocation9 + $0x18] sm:$0xff] }
 0xb91   :  { %v1354_v43 = vpop.f32.mrf.mxu2  ;;  %v1395_v34 = vpop.f32.mrf.mxu3  ;;  %v1137_v48 = vmul.f32 %v2522_v5, %v1136_v51  ;;  %2527 = vrcp.f32 %v1153_v1  ;;  %v1165_v25 = vand.u32 2147483648, %v1153_v1  ;;  %vm1159_vm2 = vweird.f32 %v1153_v1  ;;  %v3354_v51 = vld [vmem:[#allocation9 + $0x8] sm:$0xff] }
 0xb92   :  { %v3291_v54 = vadd.f32 %v1354_v43, %v1265_v50  ;;  %v3293_v58 = vadd.f32 %v1395_v34, %v1306_v52  ;;  %v1163_v26 = vand.u32 2147483647, %v1153_v1 }
 0xb93   :  { %v1138_v59 = vadd.f32 %v2522_v5, %v1137_v48  ;;  %v1166_v15 = vor.u32 1.1754944e-38, %v1165_v25 }
 0xb94   :  { %vm1164_vm4 = vcmp.eq.f32.partialorder %v1163_v26, 8.507059e+37 }
 0xb95   :  { %v1142_v60 = vsel %vm1141_vm15, %v2522_v5, %v1138_v59  ;;  %v3346_v5 = vld [vmem:[#allocation9] sm:$0xff] }
 0xb96   :  { %v1147_v46 = vsel %vm1144_vm0, %v1146_v61, %v1142_v60  ;;  %1499 = vmatpush.msra.mxu0 %v3346_v5  ;;  %1596 = vmatpush.msra.mxu2 %v3346_v5 }
 0xb97   :  { %v1170_v44 = vmul.f32 %v2524_v40, %v1147_v46  ;;  %v2528_v14 = vpop.eup %2527  ;;  %v1169_v19 = vmul.f32 %v1147_v46, %v3226_v56  ;;  %v3340_v56 = vld [vmem:[#allocation9 + $0x38] sm:$0xff]  ;;  %v1192_v40 = vld [vmem:[%s3624_s7] sm:$0x3] }
 0xb98   :  { %v1155_v16 = vmul.f32 %v2528_v14, %v1153_v1  ;;  %vm1160_vm1 = vweird.f32 %v2528_v14  ;;  %1516 = vmatpush.msrb.mxu1 %v3340_v56  ;;  %1613 = vmatpush.msra.mxu3 %v3340_v56  ;;  %v3439_v63 = vperm.slane %v1192_v40, 0 }
 0xb99   :  { %1172 = vrot.lane.b32.xlu2 %v1170_v44, %s2736_s3  ;;  %vm1161_vm3 = vmor %vm1159_vm2, %vm1160_vm1  ;;  %1686 = vmatpush.msrb.mxu0 %v3296_v6  ;;  %v3421_v43 = vpop.f32.mrf.mxu3 }
 0xb9a   :  { %v1156_v17 = vsub.f32 1.0, %v1155_v16  ;;  %1517 = vmatpush.msrb.mxu1 %v3348_v35  ;;  %1614 = vmatpush.msra.mxu3 %v3348_v35 }
 0xb9b   :  { %1783 = vmatpush.msrb.mxu2 %v3296_v6  ;;  %1687 = vmatpush.msrb.mxu0 %v3298_v7 }
 0xb9c   :  { %v1157_v18 = vmul.f32 %v2528_v14, %v1156_v17  ;;  %1518 = vmatpush.msrb.mxu1 %v3350_v49  ;;  %1615 = vmatpush.msra.mxu3 %v3350_v49 }
 0xb9d   :  { %1688 = vmatpush.msrb.mxu0 %v3306_v9  ;;  %1784 = vmatpush.msrb.mxu2 %v3298_v7 }
 0xb9e   :  { %v1158_v23 = vadd.f32 %v2528_v14, %v1157_v18  ;;  %1519 = vmatpush.msrb.mxu1 %v3354_v51  ;;  %1616 = vmatpush.msra.mxu3 %v3354_v51 }
 0xb9f   :  { %1689 = vmatpush.msrb.mxu0 %v3314_v4  ;;  %1785 = vmatpush.msrb.mxu2 %v3306_v9 }
 0xba0   :  { %v1162_v10 = vsel %vm1161_vm3, %v2528_v14, %v1158_v23  ;;  %1706 = vmatpush.msra.mxu1 %v3301_v33  ;;  %1803 = vmatpush.msrb.mxu3 %v3301_v33  ;;  %v3442_v14 = vpop.f32.mrf.mxu1 }
 0xba1   :  { %v1167_v21 = vsel %vm1164_vm4, %v1166_v15, %v1162_v10  ;;  %1690 = vmatpush.msrb.mxu0 %v3322_v13  ;;  %1786 = vmatpush.msrb.mxu2 %v3314_v4  ;;  %v3425_v48 = vpop.f32.mrf.mxu3 }
 0xba2   :  { %1707 = vmatpush.msra.mxu1 %v3303_v62  ;;  %1804 = vmatpush.msrb.mxu3 %v3303_v62 }
 0xba3   :  { %1691 = vmatpush.msrb.mxu0 %v3328_v55  ;;  %1787 = vmatpush.msrb.mxu2 %v3322_v13 }
 0xba4   :  { %1708 = vmatpush.msra.mxu1 %v3311_v11  ;;  %1805 = vmatpush.msrb.mxu3 %v3311_v11 }
 0xba5   :  { %1692 = vmatpush.msrb.mxu0 %v3338_v57  ;;  %1788 = vmatpush.msrb.mxu2 %v3328_v55 }
 0xba6   :  { %1709 = vmatpush.msra.mxu1 %v3319_v12  ;;  %1806 = vmatpush.msrb.mxu3 %v3319_v12 }
 0xba7   :  { %1693 = vmatpush.msrb.mxu0 %v3346_v5  ;;  %1789 = vmatpush.msrb.mxu2 %v3338_v57 }
 0xba8   :  { %1710 = vmatpush.msra.mxu1 %v3340_v56  ;;  %1807 = vmatpush.msrb.mxu3 %v3340_v56 }
 0xba9   :  { %1790 = vmatpush.msrb.mxu2 %v3346_v5  ;;  %v3433_v60 = vpop.f32.mrf.mxu3 }
 0xbaa   :  { %1711 = vmatpush.msra.mxu1 %v3348_v35  ;;  %1808 = vmatpush.msrb.mxu3 %v3348_v35 }
 0xbac   :  { %1712 = vmatpush.msra.mxu1 %v3350_v49  ;;  %1809 = vmatpush.msrb.mxu3 %v3350_v49 }
 0xbae   :  { %1713 = vmatpush.msra.mxu1 %v3354_v51  ;;  %1810 = vmatpush.msrb.mxu3 %v3354_v51 }
 0xbb1   :  { %v3444_v16 = vpop.f32.mrf.mxu3 }
 0xbf3   :  { %v1173_v20 = vpop.permute.xlu2 %1172 }
 0xbf4   :  { %v1175_v22 = vadd.f32 %v1173_v20, %v1169_v19 }
 0xbf6   :  { %2529 = vtanh.f32 %v1175_v22 }
 0xbfc   :  { %v2530_v36 = vpop.eup %2529 }
 0xbfd   :  { %v1177_v45 = vmul.f32 %v2530_v36, %v1167_v21 }
 0xbff   :  { %1179 = vrot.lane.b32.xlu0 %v1177_v45, %s2736_s3 }
 0xc71   :  { %v1180_v50 = vpop.permute.xlu0 %1179 }
 0xc72   :  { %1183 = vst.msk [vmem:[#allocation3 + $0x38] sm:$0xff] %vm385_vm9, %v1180_v50 }
 0xc79   :  { %v1191_v52 = vld [vmem:[#allocation3 + $0x38] sm:$0xff] }
 0xc7a   :  { %2368 = vmatmul.msk.f32.gmra.mxu0 %vm385_vm9, %v1191_v52  ;;  %2376 = vmatmul.msk.f32.gmra.mxu1 %vm385_vm9, %v1191_v52 }
 0xc7b   :  { %2384 = vmatmul.msk.f32.gmra.mxu2 %vm385_vm9, %v1191_v52  ;;  %2392 = vmatmul.msk.f32.gmra.mxu3 %vm385_vm9, %v1191_v52 }
 0xc82   :  { %1500 = vmatmul.f32.vlgmr.msra.gmra.mxu0 %v2735_v32  ;;  %1520 = vmatmul.f32.vlgmr.msrb.gmra.mxu1 %v2735_v32  ;;  %v3417_v32 = vpop.f32.mrf.mxu2 }
 0xc83   :  { %1880 = vmatpush.msra.mxu0 %v3296_v6  ;;  %1900 = vmatpush.msrb.mxu1 %v3301_v33 }
 0xc85   :  { %1881 = vmatpush.msra.mxu0 %v3298_v7  ;;  %1901 = vmatpush.msrb.mxu1 %v3303_v62 }
 0xc87   :  { %1882 = vmatpush.msra.mxu0 %v3306_v9  ;;  %1902 = vmatpush.msrb.mxu1 %v3311_v11 }
 0xc89   :  { %1883 = vmatpush.msra.mxu0 %v3314_v4  ;;  %1903 = vmatpush.msrb.mxu1 %v3319_v12 }
 0xc8a   :  { %v3419_v31 = vpop.f32.mrf.mxu2 }
 0xc8b   :  { %1884 = vmatpush.msra.mxu0 %v3322_v13  ;;  %1904 = vmatpush.msrb.mxu1 %v3340_v56 }
 0xc8d   :  { %1885 = vmatpush.msra.mxu0 %v3328_v55  ;;  %1905 = vmatpush.msrb.mxu1 %v3348_v35 }
 0xc8f   :  { %1886 = vmatpush.msra.mxu0 %v3338_v57  ;;  %1906 = vmatpush.msrb.mxu1 %v3350_v49 }
 0xc91   :  { %1887 = vmatpush.msra.mxu0 %v3346_v5  ;;  %1907 = vmatpush.msrb.mxu1 %v3354_v51 }
 0xc92   :  { %v3423_v34 = vpop.f32.mrf.mxu2 }
 0xc9a   :  { %v3429_v59 = vpop.f32.mrf.mxu2 }
 0xcf7   :  { %v3431_v61 = vpop.f32.mrf.mxu0  ;;  %v3446_v19 = vpop.f32.mrf.mxu1 }
 0xcfe   :  { %v1369_v46 = vpop.f32.mrf.mxu2  ;;  %v1410_v20 = vpop.f32.mrf.mxu3 }
 0xcff   :  { %v1413_v44 = vadd.f32 %v1369_v46, %v3261_v28  ;;  %v1501_v0 = vpop.f32.mrf.mxu0  ;;  %v1414_v23 = vadd.f32 %v1410_v20, %v3263_v29  ;;  %v3449_v28 = vperm.slane %v1192_v40, 1  ;;  %v1521_v10 = vpop.f32.mrf.mxu1 }
 0xd01   :  { %v1420_v1 = vadd.f32 %v3439_v63, %v1413_v44  ;;  %v1421_v26 = vadd.f32 %v3449_v28, %v1414_v23 }
 0xd03   :  { %v1524_v17 = vadd.f32 %v1501_v0, %v1420_v1  ;;  %v1525_v36 = vadd.f32 %v1521_v10, %v1421_v26 }
 0xd05   :  { %v2393_v18 = vmul.f32 -1.442695, %v1524_v17 }
 0xd07   :  { %2531 = vpow2.f32 %v2393_v18  ;;  %v2394_v18 = vmul.f32 -1.442695, %v1525_v36 }
 0xd0d   :  { %v2532_v22 = vpop.eup %2531 }
 0xd0e   :  { %v1529_v25 = vadd.f32 1.0, %v2532_v22 }
 0xd10   :  { %2533 = vrcp.f32 %v1529_v25  ;;  %v1541_v50 = vand.u32 2147483648, %v1529_v25  ;;  %v1539_v46 = vand.u32 2147483647, %v1529_v25  ;;  %vm1535_vm6 = vweird.f32 %v1529_v25 }
 0xd11   :  { %2535 = vtanh.f32 %v1525_v36 }
 0xd12   :  { %v1542_v29 = vor.u32 1.1754944e-38, %v1541_v50  ;;  %vm1540_vm8 = vcmp.eq.f32.partialorder %v1539_v46, 8.507059e+37  ;;  %2537 = vpow2.f32 %v2394_v18 }
 0xd16   :  { %v2534_v15 = vpop.eup %2533 }
 0xd17   :  { %v1531_v21 = vmul.f32 %v2534_v15, %v1529_v25  ;;  %vm1536_vm5 = vweird.f32 %v2534_v15  ;;  %v2536_v40 = vpop.eup %2535 }
 0xd18   :  { %vm1537_vm7 = vmor %vm1535_vm6, %vm1536_vm5  ;;  %v2538_v20 = vpop.eup %2537 }
 0xd19   :  { %v1532_v45 = vsub.f32 1.0, %v1531_v21  ;;  %v1549_v22 = vadd.f32 1.0, %v2538_v20 }
 0xd1b   :  { %v1533_v52 = vmul.f32 %v2534_v15, %v1532_v45  ;;  %2539 = vrcp.f32 %v1549_v22  ;;  %v1561_v50 = vand.u32 2147483648, %v1549_v22  ;;  %vm1555_vm11 = vweird.f32 %v1549_v22 }
 0xd1c   :  { %v1559_v46 = vand.u32 2147483647, %v1549_v22 }
 0xd1d   :  { %v1534_v44 = vadd.f32 %v2534_v15, %v1533_v52 }
 0xd1e   :  { %vm1560_vm13 = vcmp.eq.f32.partialorder %v1559_v46, 8.507059e+37 }
 0xd1f   :  { %v1538_v0 = vsel %vm1537_vm7, %v2534_v15, %v1534_v44  ;;  %v1562_v44 = vor.u32 1.1754944e-38, %v1561_v50 }
 0xd20   :  { %v1543_v1 = vsel %vm1540_vm8, %v1542_v29, %v1538_v0 }
 0xd21   :  { %v1566_v17 = vmul.f32 %v2536_v40, %v1543_v1  ;;  %v2540_v23 = vpop.eup %2539  ;;  %v1565_v45 = vmul.f32 0.0, %v1543_v1 }
 0xd22   :  { %v1551_v26 = vmul.f32 %v2540_v23, %v1549_v22  ;;  %vm1556_vm10 = vweird.f32 %v2540_v23 }
 0xd23   :  { %1568 = vrot.lane.b32.xlu1 %v1566_v17, %s2736_s3  ;;  %vm1557_vm12 = vmor %vm1555_vm11, %vm1556_vm10  ;;  %v1424_v17 = vadd.f32 %v3429_v59, %v3265_v2 }
 0xd24   :  { %v1552_v10 = vsub.f32 1.0, %v1551_v26 }
 0xd25   :  { %v1426_v18 = vadd.f32 %v1424_v17, %v3439_v63 }
 0xd26   :  { %v1553_v21 = vmul.f32 %v2540_v23, %v1552_v10 }
 0xd28   :  { %v1554_v15 = vadd.f32 %v2540_v23, %v1553_v21  ;;  %v1425_v21 = vadd.f32 %v3444_v16, %v3267_v8 }
 0xd2a   :  { %v1558_v36 = vsel %vm1557_vm12, %v2540_v23, %v1554_v15 }
 0xd2b   :  { %v1563_v0 = vsel %vm1560_vm13, %v1562_v44, %v1558_v36 }
 0xd95   :  { %v1569_v25 = vpop.permute.xlu1 %1568 }
 0xd96   :  { %v3453_v52 = vadd.f32 %v1569_v25, %v1565_v45  ;;  %v1427_v25 = vadd.f32 %v1425_v21, %v3449_v28 }
 0xd98   :  { %2541 = vtanh.f32 %v3453_v52 }
 0xd9e   :  { %v2542_v29 = vpop.eup %2541 }
 0xd9f   :  { %v1573_v40 = vmul.f32 %v2542_v29, %v1563_v0 }
 0xda1   :  { %1577 = vrot.lane.b32.xlu2 %v1573_v40, %s2736_s3 }
 0xdfb   :  { %v1578_v1 = vpop.permute.xlu2 %1577 }
 0xdfc   :  { %2395 = vmatmul.msk.f32.vlgmr.msra.gmra.mxu2 %vm385_vm9, %v1578_v1  ;;  %2396 = vmatmul.msk.f32.vlgmr.msra.gmra.mxu3 %vm385_vm9, %v1578_v1 }
 0xdfd   :  { %1977 = vmatpush.msra.mxu2 %v3296_v6  ;;  %1997 = vmatpush.msra.mxu3 %v3301_v33 }
 0xdff   :  { %1978 = vmatpush.msra.mxu2 %v3298_v7  ;;  %1998 = vmatpush.msra.mxu3 %v3303_v62 }
 0xe01   :  { %1979 = vmatpush.msra.mxu2 %v3306_v9  ;;  %1999 = vmatpush.msra.mxu3 %v3311_v11 }
 0xe03   :  { %1980 = vmatpush.msra.mxu2 %v3314_v4  ;;  %2000 = vmatpush.msra.mxu3 %v3319_v12 }
 0xe05   :  { %1981 = vmatpush.msra.mxu2 %v3322_v13  ;;  %2001 = vmatpush.msra.mxu3 %v3340_v56 }
 0xe07   :  { %1982 = vmatpush.msra.mxu2 %v3328_v55  ;;  %2002 = vmatpush.msra.mxu3 %v3348_v35 }
 0xe09   :  { %1983 = vmatpush.msra.mxu2 %v3338_v57  ;;  %2003 = vmatpush.msra.mxu3 %v3350_v49 }
 0xe0b   :  { %1984 = vmatpush.msra.mxu2 %v3346_v5  ;;  %2004 = vmatpush.msra.mxu3 %v3354_v51 }
 0xe7f   :  { %v1598_v20 = vpop.f32.mrf.mxu2  ;;  %v1618_v45 = vpop.f32.mrf.mxu3 }
 0xe80   :  { %v1621_v22 = vadd.f32 %v1598_v20, %v1426_v18  ;;  %v1622_v50 = vadd.f32 %v1618_v45, %v1427_v25 }
 0xe82   :  { %v2397_v23 = vmul.f32 -1.442695, %v1621_v22  ;;  %v2398_v17 = vmul.f32 -1.442695, %v1622_v50 }
 0xe84   :  { %2543 = vpow2.f32 %v2397_v23 }
 0xe8a   :  { %v2544_v26 = vpop.eup %2543 }
 0xe8b   :  { %v1626_v10 = vadd.f32 1.0, %v2544_v26 }
 0xe8d   :  { %2545 = vrcp.f32 %v1626_v10  ;;  %v1638_v2 = vand.u32 2147483648, %v1626_v10  ;;  %v1636_v44 = vand.u32 2147483647, %v1626_v10  ;;  %vm1632_vm15 = vweird.f32 %v1626_v10 }
 0xe8e   :  { %2547 = vtanh.f32 %v1622_v50 }
 0xe8f   :  { %v1639_v0 = vor.u32 1.1754944e-38, %v1638_v2  ;;  %vm1637_vm1 = vcmp.eq.f32.partialorder %v1636_v44, 8.507059e+37  ;;  %2549 = vpow2.f32 %v2398_v17 }
 0xe93   :  { %v2546_v15 = vpop.eup %2545 }
 0xe94   :  { %v1628_v46 = vmul.f32 %v2546_v15, %v1626_v10  ;;  %vm1633_vm14 = vweird.f32 %v2546_v15  ;;  %v2548_v8 = vpop.eup %2547 }
 0xe95   :  { %vm1634_vm0 = vmor %vm1632_vm15, %vm1633_vm14  ;;  %v2550_v18 = vpop.eup %2549 }
 0xe96   :  { %v1629_v36 = vsub.f32 1.0, %v1628_v46  ;;  %v1646_v20 = vadd.f32 1.0, %v2550_v18 }
 0xe98   :  { %v1630_v59 = vmul.f32 %v2546_v15, %v1629_v36  ;;  %2551 = vrcp.f32 %v1646_v20  ;;  %v1658_v46 = vand.u32 2147483648, %v1646_v20  ;;  %vm1652_vm3 = vweird.f32 %v1646_v20 }
 0xe99   :  { %v1656_v50 = vand.u32 2147483647, %v1646_v20 }
 0xe9a   :  { %v1631_v29 = vadd.f32 %v2546_v15, %v1630_v59  ;;  %v1659_v2 = vor.u32 1.1754944e-38, %v1658_v46 }
 0xe9b   :  { %vm1657_vm5 = vcmp.eq.f32.partialorder %v1656_v50, 8.507059e+37 }
 0xe9c   :  { %v1635_v40 = vsel %vm1634_vm0, %v2546_v15, %v1631_v29 }
 0xe9d   :  { %v1640_v16 = vsel %vm1637_vm1, %v1639_v0, %v1635_v40  ;;  %v1430_v0 = vadd.f32 %v3423_v34, %v3269_v3 }
 0xe9e   :  { %v1663_v1 = vmul.f32 %v2548_v8, %v1640_v16  ;;  %v2552_v22 = vpop.eup %2551  ;;  %v1662_v10 = vmul.f32 %v1640_v16, %v3453_v52 }
 0xe9f   :  { %v1648_v23 = vmul.f32 %v2552_v22, %v1646_v20  ;;  %vm1653_vm2 = vweird.f32 %v2552_v22  ;;  %v1432_v40 = vadd.f32 %v1430_v0, %v3439_v63  ;;  %v1431_v20 = vadd.f32 %v3433_v60, %v3271_v38 }
 0xea0   :  { %1665 = vrot.lane.b32.xlu0 %v1663_v1, %s2736_s3  ;;  %vm1654_vm4 = vmor %vm1652_vm3, %vm1653_vm2 }
 0xea1   :  { %v1649_v26 = vsub.f32 1.0, %v1648_v23  ;;  %v1433_v23 = vadd.f32 %v1431_v20, %v3449_v28 }
 0xea3   :  { %v1650_v21 = vmul.f32 %v2552_v22, %v1649_v26 }
 0xea5   :  { %v1651_v15 = vadd.f32 %v2552_v22, %v1650_v21 }
 0xea7   :  { %v1655_v36 = vsel %vm1654_vm4, %v2552_v22, %v1651_v15 }
 0xea8   :  { %v1660_v44 = vsel %vm1657_vm5, %v1659_v2, %v1655_v36 }
 0xf12   :  { %v1666_v45 = vpop.permute.xlu0 %1665 }
 0xf13   :  { %v3483_v25 = vadd.f32 %v1666_v45, %v1662_v10 }
 0xf15   :  { %2553 = vtanh.f32 %v3483_v25 }
 0xf1b   :  { %v2554_v59 = vpop.eup %2553 }
 0xf1c   :  { %v1670_v29 = vmul.f32 %v2554_v59, %v1660_v44 }
 0xf1e   :  { %1674 = vrot.lane.b32.xlu1 %v1670_v29, %s2736_s3 }
 0xf90   :  { %v1675_v52 = vpop.permute.xlu1 %1674 }
 0xf91   :  { %2399 = vmatmul.msk.f32.vlgmr.msrb.gmra.mxu0 %vm385_vm9, %v1675_v52  ;;  %2400 = vmatmul.msk.f32.vlgmr.msra.gmra.mxu1 %vm385_vm9, %v1675_v52 }
 0xf92   :  { %2074 = vmatpush.msrb.mxu0 %v3296_v6  ;;  %2094 = vmatpush.msra.mxu1 %v3301_v33 }
 0xf94   :  { %2075 = vmatpush.msrb.mxu0 %v3298_v7  ;;  %2095 = vmatpush.msra.mxu1 %v3303_v62 }
 0xf96   :  { %2076 = vmatpush.msrb.mxu0 %v3306_v9  ;;  %2096 = vmatpush.msra.mxu1 %v3311_v11 }
 0xf98   :  { %2077 = vmatpush.msrb.mxu0 %v3314_v4  ;;  %2097 = vmatpush.msra.mxu1 %v3319_v12 }
 0xf9a   :  { %2078 = vmatpush.msrb.mxu0 %v3322_v13  ;;  %2098 = vmatpush.msra.mxu1 %v3340_v56 }
 0xf9c   :  { %2079 = vmatpush.msrb.mxu0 %v3328_v55  ;;  %2099 = vmatpush.msra.mxu1 %v3348_v35 }
 0xf9e   :  { %2080 = vmatpush.msrb.mxu0 %v3338_v57  ;;  %2100 = vmatpush.msra.mxu1 %v3350_v49 }
 0xfa0   :  { %2081 = vmatpush.msrb.mxu0 %v3346_v5  ;;  %2101 = vmatpush.msra.mxu1 %v3354_v51 }
0x100e   :  { %v1695_v8 = vpop.f32.mrf.mxu0  ;;  %v1715_v22 = vpop.f32.mrf.mxu1 }
0x100f   :  { %v1718_v16 = vadd.f32 %v1695_v8, %v1432_v40  ;;  %v1719_v21 = vadd.f32 %v1715_v22, %v1433_v23 }
0x1011   :  { %v2401_v1 = vmul.f32 -1.442695, %v1718_v16  ;;  %v2402_v59 = vmul.f32 -1.442695, %v1719_v21 }
0x1013   :  { %2555 = vpow2.f32 %v2401_v1 }
0x1019   :  { %v2556_v17 = vpop.eup %2555 }
0x101a   :  { %v1723_v18 = vadd.f32 1.0, %v2556_v17 }
0x101c   :  { %2557 = vrcp.f32 %v1723_v18  ;;  %v1735_v3 = vand.u32 2147483648, %v1723_v18  ;;  %v1733_v15 = vand.u32 2147483647, %v1723_v18  ;;  %vm1729_vm7 = vweird.f32 %v1723_v18 }
0x101d   :  { %2559 = vtanh.f32 %v1719_v21 }
0x101e   :  { %v1736_v50 = vor.u32 1.1754944e-38, %v1735_v3  ;;  %vm1734_vm10 = vcmp.eq.f32.partialorder %v1733_v15, 8.507059e+37  ;;  %2561 = vpow2.f32 %v2402_v59 }
0x1022   :  { %v2558_v26 = vpop.eup %2557 }
0x1023   :  { %v1725_v10 = vmul.f32 %v2558_v26, %v1723_v18  ;;  %vm1730_vm6 = vweird.f32 %v2558_v26  ;;  %v2560_v38 = vpop.eup %2559 }
0x1024   :  { %vm1731_vm8 = vmor %vm1729_vm7, %vm1730_vm6  ;;  %v2562_v44 = vpop.eup %2561 }
0x1025   :  { %v1726_v45 = vsub.f32 1.0, %v1725_v10  ;;  %v1743_v29 = vadd.f32 1.0, %v2562_v44 }
0x1027   :  { %v1727_v34 = vmul.f32 %v2558_v26, %v1726_v45  ;;  %2563 = vrcp.f32 %v1743_v29  ;;  %v1755_v20 = vand.u32 2147483648, %v1743_v29  ;;  %vm1749_vm12 = vweird.f32 %v1743_v29 }
0x1028   :  { %v1753_v22 = vand.u32 2147483647, %v1743_v29 }
0x1029   :  { %v1728_v46 = vadd.f32 %v2558_v26, %v1727_v34 }
0x102a   :  { %vm1754_vm14 = vcmp.eq.f32.partialorder %v1753_v22, 8.507059e+37 }
0x102b   :  { %v1732_v36 = vsel %vm1731_vm8, %v2558_v26, %v1728_v46  ;;  %v1756_v26 = vor.u32 1.1754944e-38, %v1755_v20 }
0x102c   :  { %v1737_v60 = vsel %vm1734_vm10, %v1736_v50, %v1732_v36 }
0x102d   :  { %v1760_v2 = vmul.f32 %v2560_v38, %v1737_v60  ;;  %v2564_v52 = vpop.eup %2563  ;;  %v1759_v16 = vmul.f32 %v1737_v60, %v3483_v25 }
0x102e   :  { %v1745_v0 = vmul.f32 %v2564_v52, %v1743_v29  ;;  %vm1750_vm11 = vweird.f32 %v2564_v52 }
0x102f   :  { %1762 = vrot.lane.b32.xlu2 %v1760_v2, %s2736_s3  ;;  %vm1751_vm13 = vmor %vm1749_vm12, %vm1750_vm11 }
0x1030   :  { %v1746_v40 = vsub.f32 1.0, %v1745_v0 }
0x1032   :  { %v1747_v8 = vmul.f32 %v2564_v52, %v1746_v40 }
0x1034   :  { %v1748_v18 = vadd.f32 %v2564_v52, %v1747_v8 }
0x1036   :  { %v1752_v23 = vsel %vm1751_vm13, %v2564_v52, %v1748_v18 }
0x1037   :  { %v1757_v10 = vsel %vm1754_vm14, %v1756_v26, %v1752_v23 }
0x1089   :  { %v1763_v1 = vpop.permute.xlu2 %1762 }
0x108a   :  { %v3513_v17 = vadd.f32 %v1763_v1, %v1759_v16 }
0x108c   :  { %2565 = vtanh.f32 %v3513_v17 }
0x1092   :  { %v2566_v21 = vpop.eup %2565 }
0x1093   :  { %v1767_v45 = vmul.f32 %v2566_v21, %v1757_v10 }
0x1095   :  { %1771 = vrot.lane.b32.xlu0 %v1767_v45, %s2736_s3 }
0x1107   :  { %v1772_v25 = vpop.permute.xlu0 %1771 }
0x1108   :  { %2403 = vmatmul.msk.f32.vlgmr.msrb.gmra.mxu2 %vm385_vm9, %v1772_v25  ;;  %2404 = vmatmul.msk.f32.vlgmr.msrb.gmra.mxu3 %vm385_vm9, %v1772_v25 }
0x1109   :  { %2171 = vmatpush.msrb.mxu2 %v3296_v6  ;;  %2191 = vmatpush.msrb.mxu3 %v3301_v33  ;;  %v1436_v6 = vadd.f32 %v3419_v31, %v3274_v24 }
0x110b   :  { %2172 = vmatpush.msrb.mxu2 %v3298_v7  ;;  %2192 = vmatpush.msrb.mxu3 %v3303_v62  ;;  %v1438_v7 = vadd.f32 %v1436_v6, %v3439_v63 }
0x110d   :  { %2173 = vmatpush.msrb.mxu2 %v3306_v9  ;;  %2193 = vmatpush.msrb.mxu3 %v3311_v11 }
0x110f   :  { %2174 = vmatpush.msrb.mxu2 %v3314_v4  ;;  %2194 = vmatpush.msrb.mxu3 %v3319_v12  ;;  %v1437_v12 = vadd.f32 %v3425_v48, %v3276_v27 }
0x1111   :  { %2175 = vmatpush.msrb.mxu2 %v3322_v13  ;;  %2195 = vmatpush.msrb.mxu3 %v3340_v56 }
0x1113   :  { %2176 = vmatpush.msrb.mxu2 %v3328_v55  ;;  %2196 = vmatpush.msrb.mxu3 %v3348_v35  ;;  %v1439_v55 = vadd.f32 %v1437_v12, %v3449_v28 }
0x1115   :  { %2177 = vmatpush.msrb.mxu2 %v3338_v57  ;;  %2197 = vmatpush.msrb.mxu3 %v3350_v49 }
0x1117   :  { %2178 = vmatpush.msrb.mxu2 %v3346_v5  ;;  %2198 = vmatpush.msrb.mxu3 %v3354_v51 }
0x118b   :  { %v1792_v33 = vpop.f32.mrf.mxu2  ;;  %v1812_v13 = vpop.f32.mrf.mxu3 }
0x118c   :  { %v1815_v62 = vadd.f32 %v1792_v33, %v1438_v7  ;;  %v1816_v56 = vadd.f32 %v1812_v13, %v1439_v55  ;;  %v1443_v7 = vadd.f32 %v3421_v43, %v3284_v30 }
0x118e   :  { %v2405_v9 = vmul.f32 -1.442695, %v1815_v62  ;;  %v2406_v46 = vmul.f32 -1.442695, %v1816_v56  ;;  %v1445_v62 = vadd.f32 %v1443_v7, %v3449_v28 }
0x1190   :  { %2567 = vpow2.f32 %v2405_v9 }
0x1196   :  { %v2568_v11 = vpop.eup %2567 }
0x1197   :  { %v1820_v4 = vadd.f32 1.0, %v2568_v11 }
0x1199   :  { %2569 = vrcp.f32 %v1820_v4  ;;  %v1832_v24 = vand.u32 2147483648, %v1820_v4  ;;  %v1830_v51 = vand.u32 2147483647, %v1820_v4  ;;  %vm1826_vm0 = vweird.f32 %v1820_v4 }
0x119a   :  { %2571 = vtanh.f32 %v1816_v56 }
0x119b   :  { %v1833_v3 = vor.u32 1.1754944e-38, %v1832_v24  ;;  %vm1831_vm2 = vcmp.eq.f32.partialorder %v1830_v51, 8.507059e+37  ;;  %2573 = vpow2.f32 %v2406_v46 }
0x119f   :  { %v2570_v57 = vpop.eup %2569 }
0x11a0   :  { %v1822_v5 = vmul.f32 %v2570_v57, %v1820_v4  ;;  %vm1827_vm15 = vweird.f32 %v2570_v57  ;;  %v2572_v27 = vpop.eup %2571 }
0x11a1   :  { %vm1828_vm1 = vmor %vm1826_vm0, %vm1827_vm15  ;;  %v2574_v50 = vpop.eup %2573 }
0x11a2   :  { %v1823_v35 = vsub.f32 1.0, %v1822_v5  ;;  %v1840_v36 = vadd.f32 1.0, %v2574_v50 }
0x11a4   :  { %v1824_v49 = vmul.f32 %v2570_v57, %v1823_v35  ;;  %2575 = vrcp.f32 %v1840_v36  ;;  %v1852_v40 = vand.u32 2147483648, %v1840_v36  ;;  %vm1846_vm4 = vweird.f32 %v1840_v36 }
0x11a5   :  { %v1850_v8 = vand.u32 2147483647, %v1840_v36 }
0x11a6   :  { %v1825_v31 = vadd.f32 %v2570_v57, %v1824_v49  ;;  %v1853_v1 = vor.u32 1.1754944e-38, %v1852_v40 }
0x11a7   :  { %vm1851_vm6 = vcmp.eq.f32.partialorder %v1850_v8, 8.507059e+37 }
0x11a8   :  { %v1829_v34 = vsel %vm1828_vm1, %v2570_v57, %v1825_v31 }
0x11a9   :  { %v1834_v48 = vsel %vm1831_vm2, %v1833_v3, %v1829_v34 }
0x11aa   :  { %v1857_v15 = vmul.f32 %v2572_v27, %v1834_v48  ;;  %v2576_v38 = vpop.eup %2575  ;;  %v1856_v44 = vmul.f32 %v1834_v48, %v3513_v17  ;;  %v1442_v17 = vadd.f32 %v3417_v32, %v3282_v39 }
0x11ab   :  { %v1842_v60 = vmul.f32 %v2576_v38, %v1840_v36  ;;  %vm1847_vm3 = vweird.f32 %v2576_v38 }
0x11ac   :  { %1859 = vrot.lane.b32.xlu1 %v1857_v15, %s2736_s3  ;;  %vm1848_vm5 = vmor %vm1846_vm4, %vm1847_vm3  ;;  %v1444_v26 = vadd.f32 %v1442_v17, %v3439_v63 }
0x11ad   :  { %v1843_v2 = vsub.f32 1.0, %v1842_v60 }
0x11af   :  { %v1844_v59 = vmul.f32 %v2576_v38, %v1843_v2 }
0x11b1   :  { %v1845_v0 = vadd.f32 %v2576_v38, %v1844_v59 }
0x11b3   :  { %v1849_v16 = vsel %vm1848_vm5, %v2576_v38, %v1845_v0 }
0x11b4   :  { %v1854_v20 = vsel %vm1851_vm6, %v1853_v1, %v1849_v16 }
0x121e   :  { %v1860_v29 = vpop.permute.xlu1 %1859 }
0x121f   :  { %v1862_v52 = vadd.f32 %v1860_v29, %v1856_v44 }
0x1221   :  { %2577 = vtanh.f32 %v1862_v52 }
0x1227   :  { %v2578_v18 = vpop.eup %2577 }
0x1228   :  { %v1864_v22 = vmul.f32 %v2578_v18, %v1854_v20  ;;  %v1451_v20 = vadd.f32 %v3293_v58, %v3449_v28 }
0x122a   :  { %1868 = vrot.lane.b32.xlu2 %v1864_v22, %s2736_s3 }
0x1284   :  { %v1869_v23 = vpop.permute.xlu2 %1868 }
0x1285   :  { %2407 = vmatmul.msk.f32.vlgmr.msra.gmra.mxu0 %vm385_vm9, %v1869_v23  ;;  %2408 = vmatmul.msk.f32.vlgmr.msrb.gmra.mxu1 %vm385_vm9, %v1869_v23 }
0x1302   :  { %v1889_v21 = vpop.f32.mrf.mxu0  ;;  %v1909_v33 = vpop.f32.mrf.mxu1 }
0x1303   :  { %v1912_v10 = vadd.f32 %v1889_v21, %v1444_v26  ;;  %v1913_v11 = vadd.f32 %v1909_v33, %v1445_v62 }
0x1305   :  { %v2409_v45 = vmul.f32 -1.442695, %v1912_v10  ;;  %v2410_v35 = vmul.f32 -1.442695, %v1913_v11 }
0x1307   :  { %2579 = vpow2.f32 %v2409_v45 }
0x130d   :  { %v2580_v25 = vpop.eup %2579 }
0x130e   :  { %v1917_v6 = vadd.f32 1.0, %v2580_v25 }
0x1310   :  { %2581 = vrcp.f32 %v1917_v6  ;;  %v1929_v39 = vand.u32 2147483648, %v1917_v6  ;;  %v1927_v13 = vand.u32 2147483647, %v1917_v6  ;;  %vm1923_vm8 = vweird.f32 %v1917_v6 }
0x1311   :  { %2583 = vtanh.f32 %v1913_v11 }
0x1312   :  { %v1930_v57 = vor.u32 1.1754944e-38, %v1929_v39  ;;  %vm1928_vm11 = vcmp.eq.f32.partialorder %v1927_v13, 8.507059e+37  ;;  %2585 = vpow2.f32 %v2410_v35 }
0x1316   :  { %v2582_v9 = vpop.eup %2581 }
0x1317   :  { %v1919_v4 = vmul.f32 %v2582_v9, %v1917_v6  ;;  %vm1924_vm7 = vweird.f32 %v2582_v9  ;;  %v2584_v30 = vpop.eup %2583 }
0x1318   :  { %vm1925_vm10 = vmor %vm1923_vm8, %vm1924_vm7  ;;  %v2586_v24 = vpop.eup %2585 }
0x1319   :  { %v1920_v12 = vsub.f32 1.0, %v1919_v4  ;;  %v1937_v49 = vadd.f32 1.0, %v2586_v24 }
0x131b   :  { %v1921_v32 = vmul.f32 %v2582_v9, %v1920_v12  ;;  %2587 = vrcp.f32 %v1937_v49  ;;  %v1949_v50 = vand.u32 2147483648, %v1937_v49  ;;  %vm1943_vm13 = vweird.f32 %v1937_v49 }
0x131c   :  { %v1947_v36 = vand.u32 2147483647, %v1937_v49 }
0x131d   :  { %v1922_v55 = vadd.f32 %v2582_v9, %v1921_v32  ;;  %v1950_v60 = vor.u32 1.1754944e-38, %v1949_v50 }
0x131e   :  { %vm1948_vm15 = vcmp.eq.f32.partialorder %v1947_v36, 8.507059e+37  ;;  %v1455_v36 = vadd.f32 %v3288_v42, %v3442_v14 }
0x131f   :  { %v1926_v56 = vsel %vm1925_vm10, %v2582_v9, %v1922_v55 }
0x1320   :  { %v1931_v43 = vsel %vm1928_vm11, %v1930_v57, %v1926_v56 }
0x1321   :  { %v1954_v5 = vmul.f32 %v2584_v30, %v1931_v43  ;;  %v2588_v51 = vpop.eup %2587  ;;  %v1953_v27 = vmul.f32 %v1931_v43, %v1862_v52  ;;  %v1450_v52 = vadd.f32 %v3291_v54, %v3439_v63 }
0x1322   :  { %v1939_v31 = vmul.f32 %v2588_v51, %v1937_v49  ;;  %vm1944_vm12 = vweird.f32 %v2588_v51 }
0x1323   :  { %1956 = vrot.lane.b32.xlu0 %v1954_v5, %s2736_s3  ;;  %vm1945_vm14 = vmor %vm1943_vm13, %vm1944_vm12 }
0x1324   :  { %v1940_v3 = vsub.f32 1.0, %v1939_v31 }
0x1326   :  { %v1941_v34 = vmul.f32 %v2588_v51, %v1940_v3  ;;  %v1454_v3 = vadd.f32 %v3286_v47, %v3427_v53 }
0x1328   :  { %v1942_v46 = vadd.f32 %v2588_v51, %v1941_v34  ;;  %v1456_v34 = vadd.f32 %v1454_v3, %v3439_v63 }
0x132a   :  { %v1946_v38 = vsel %vm1945_vm14, %v2588_v51, %v1942_v46 }
0x132b   :  { %v1951_v59 = vsel %vm1948_vm15, %v1950_v60, %v1946_v38  ;;  %v1457_v60 = vadd.f32 %v1455_v36, %v3449_v28  ;;  %v2257_v36 = vld [vmem:[%s3626_s9 + $0x20] sm:$0xff] }
0x1395   :  { %v1957_v48 = vpop.permute.xlu0 %1956 }
0x1396   :  { %v1959_v15 = vadd.f32 %v1957_v48, %v1953_v27 }
0x1398   :  { %2589 = vtanh.f32 %v1959_v15 }
0x139e   :  { %v2590_v2 = vpop.eup %2589 }
0x139f   :  { %v1961_v44 = vmul.f32 %v2590_v2, %v1951_v59 }
0x13a1   :  { %1965 = vrot.lane.b32.xlu1 %v1961_v44, %s2736_s3 }
0x1413   :  { %v1966_v29 = vpop.permute.xlu1 %1965 }
0x1414   :  { %2411 = vmatmul.msk.f32.vlgmr.msra.gmra.mxu2 %vm385_vm9, %v1966_v29  ;;  %2412 = vmatmul.msk.f32.vlgmr.msra.gmra.mxu3 %vm385_vm9, %v1966_v29 }
0x1497   :  { %v1986_v0 = vpop.f32.mrf.mxu2  ;;  %v2006_v18 = vpop.f32.mrf.mxu3 }
0x1498   :  { %v2009_v40 = vadd.f32 %v1986_v0, %v1450_v52  ;;  %v2010_v23 = vadd.f32 %v2006_v18, %v1451_v20 }
0x149a   :  { %v2413_v8 = vmul.f32 -1.442695, %v2009_v40  ;;  %v2414_v58 = vmul.f32 -1.442695, %v2010_v23 }
0x149c   :  { %2591 = vpow2.f32 %v2413_v8 }
0x14a2   :  { %v2592_v16 = vpop.eup %2591 }
0x14a3   :  { %v2014_v1 = vadd.f32 1.0, %v2592_v16 }
0x14a5   :  { %2593 = vrcp.f32 %v2014_v1  ;;  %v2026_v21 = vand.u32 2147483648, %v2014_v1  ;;  %v2024_v54 = vand.u32 2147483647, %v2014_v1  ;;  %vm2020_vm1 = vweird.f32 %v2014_v1 }
0x14a6   :  { %2595 = vtanh.f32 %v2010_v23 }
0x14a7   :  { %v2027_v25 = vor.u32 1.1754944e-38, %v2026_v21  ;;  %vm2025_vm3 = vcmp.eq.f32.partialorder %v2024_v54, 8.507059e+37  ;;  %2597 = vpow2.f32 %v2414_v58 }
0x14ab   :  { %v2594_v22 = vpop.eup %2593 }
0x14ac   :  { %v2016_v17 = vmul.f32 %v2594_v22, %v2014_v1  ;;  %vm2021_vm0 = vweird.f32 %v2594_v22  ;;  %v2596_v7 = vpop.eup %2595 }
0x14ad   :  { %vm2022_vm2 = vmor %vm2020_vm1, %vm2021_vm0  ;;  %v2598_v9 = vpop.eup %2597 }
0x14ae   :  { %v2017_v26 = vsub.f32 1.0, %v2016_v17  ;;  %v2034_v11 = vadd.f32 1.0, %v2598_v9 }
0x14b0   :  { %v2018_v10 = vmul.f32 %v2594_v22, %v2017_v26  ;;  %2599 = vrcp.f32 %v2034_v11  ;;  %v2046_v30 = vand.u32 2147483648, %v2034_v11  ;;  %vm2040_vm5 = vweird.f32 %v2034_v11 }
0x14b1   :  { %v2044_v43 = vand.u32 2147483647, %v2034_v11 }
0x14b2   :  { %v2019_v45 = vadd.f32 %v2594_v22, %v2018_v10  ;;  %v2047_v35 = vor.u32 1.1754944e-38, %v2046_v30 }
0x14b3   :  { %vm2045_vm7 = vcmp.eq.f32.partialorder %v2044_v43, 8.507059e+37 }
0x14b4   :  { %v2023_v6 = vsel %vm2022_vm2, %v2594_v22, %v2019_v45 }
0x14b5   :  { %v2028_v33 = vsel %vm2025_vm3, %v2027_v25, %v2023_v6 }
0x14b6   :  { %v2051_v62 = vmul.f32 %v2596_v7, %v2028_v33  ;;  %v2600_v4 = vpop.eup %2599  ;;  %v2050_v13 = vmul.f32 %v2028_v33, %v1959_v15 }
0x14b7   :  { %v2036_v12 = vmul.f32 %v2600_v4, %v2034_v11  ;;  %vm2041_vm4 = vweird.f32 %v2600_v4 }
0x14b8   :  { %2053 = vrot.lane.b32.xlu2 %v2051_v62, %s2736_s3  ;;  %vm2042_vm6 = vmor %vm2040_vm5, %vm2041_vm4 }
0x14b9   :  { %v2037_v39 = vsub.f32 1.0, %v2036_v12 }
0x14bb   :  { %v2038_v32 = vmul.f32 %v2600_v4, %v2037_v39 }
0x14bd   :  { %v2039_v56 = vadd.f32 %v2600_v4, %v2038_v32 }
0x14bf   :  { %v2043_v5 = vsel %vm2042_vm6, %v2600_v4, %v2039_v56  ;;  %v1460_v4 = vadd.f32 %v3278_v41, %v3431_v61  ;;  %v1461_v56 = vadd.f32 %v3280_v37, %v3446_v19 }
0x14c0   :  { %v2048_v49 = vsel %vm2045_vm7, %v2047_v35, %v2043_v5 }
0x14c1   :  { %v1462_v12 = vadd.f32 %v1460_v4, %v3439_v63  ;;  %v1463_v43 = vadd.f32 %v1461_v56, %v3449_v28 }
0x1512   :  { %v2054_v55 = vpop.permute.xlu2 %2053 }
0x1513   :  { %v2056_v57 = vadd.f32 %v2054_v55, %v2050_v13 }
0x1515   :  { %2601 = vtanh.f32 %v2056_v57 }
0x151b   :  { %v2602_v24 = vpop.eup %2601 }
0x151c   :  { %v2058_v51 = vmul.f32 %v2602_v24, %v2048_v49 }
0x151e   :  { %2062 = vrot.lane.b32.xlu0 %v2058_v51, %s2736_s3 }
0x1590   :  { %v2063_v31 = vpop.permute.xlu0 %2062 }
0x1591   :  { %2415 = vmatmul.msk.f32.vlgmr.msrb.gmra.mxu0 %vm385_vm9, %v2063_v31  ;;  %2416 = vmatmul.msk.f32.vlgmr.msra.gmra.mxu1 %vm385_vm9, %v2063_v31 }
0x160e   :  { %v2083_v27 = vpop.f32.mrf.mxu0  ;;  %v2103_v38 = vpop.f32.mrf.mxu1 }
0x160f   :  { %v2106_v48 = vadd.f32 %v2083_v27, %v1456_v34  ;;  %v2107_v59 = vadd.f32 %v2103_v38, %v1457_v60  ;;  %v2256_v38 = vld [vmem:[%s3626_s9 + $0x18] sm:$0xff] }
0x1611   :  { %v2417_v15 = vmul.f32 -1.442695, %v2106_v48  ;;  %v2418_v1 = vmul.f32 -1.442695, %v2107_v59 }
0x1613   :  { %2603 = vpow2.f32 %v2417_v15  ;;  %v2260_v15 = vld [vmem:[%s3626_s9 + $0x38] sm:$0xff] }
0x1614   :  { %2278 = vmatpush.msra.mxu0 %v2260_v15 }
0x1619   :  { %v2604_v46 = vpop.eup %2603 }
0x161a   :  { %v2111_v50 = vadd.f32 1.0, %v2604_v46  ;;  %v2259_v46 = vld [vmem:[%s3626_s9 + $0x30] sm:$0xff] }
0x161b   :  { %2279 = vmatpush.msra.mxu0 %v2259_v46 }
0x161c   :  { %2605 = vrcp.f32 %v2111_v50  ;;  %v2123_v47 = vand.u32 2147483648, %v2111_v50  ;;  %v2121_v52 = vand.u32 2147483647, %v2111_v50  ;;  %vm2117_vm10 = vweird.f32 %v2111_v50 }
0x161d   :  { %2607 = vtanh.f32 %v2107_v59 }
0x161e   :  { %v2124_v40 = vor.u32 1.1754944e-38, %v2123_v47  ;;  %vm2122_vm12 = vcmp.eq.f32.partialorder %v2121_v52, 8.507059e+37  ;;  %2609 = vpow2.f32 %v2418_v1 }
0x1622   :  { %v2606_v2 = vpop.eup %2605 }
0x1623   :  { %v2113_v44 = vmul.f32 %v2606_v2, %v2111_v50  ;;  %vm2118_vm8 = vweird.f32 %v2606_v2  ;;  %v2608_v42 = vpop.eup %2607  ;;  %v2258_v50 = vld [vmem:[%s3626_s9 + $0x28] sm:$0xff] }
0x1624   :  { %vm2119_vm11 = vmor %vm2117_vm10, %vm2118_vm8  ;;  %v2610_v18 = vpop.eup %2609  ;;  %2280 = vmatpush.msra.mxu0 %v2258_v50  ;;  %vm2290_vm10 = vcmask 15360  }
0x1625   :  { %v2114_v29 = vsub.f32 1.0, %v2113_v44  ;;  %v2131_v20 = vadd.f32 1.0, %v2610_v18  ;;  %v2254_v44 = vld [vmem:[%s3626_s9 + $0x8] sm:$0xff] }
0x1626   :  { %2281 = vmatpush.msra.mxu0 %v2257_v36 }
0x1627   :  { %v2115_v53 = vmul.f32 %v2606_v2, %v2114_v29  ;;  %2611 = vrcp.f32 %v2131_v20  ;;  %v2143_v25 = vand.u32 2147483648, %v2131_v20  ;;  %vm2137_vm14 = vweird.f32 %v2131_v20  ;;  %v2253_v29 = vld [vmem:[%s3626_s9] sm:$0xff] }
0x1628   :  { %v2141_v6 = vand.u32 2147483647, %v2131_v20  ;;  %2282 = vmatpush.msra.mxu0 %v2256_v38 }
0x1629   :  { %v2116_v0 = vadd.f32 %v2606_v2, %v2115_v53  ;;  %v2144_v33 = vor.u32 1.1754944e-38, %v2143_v25 }
0x162a   :  { %vm2142_vm0 = vcmp.eq.f32.partialorder %v2141_v6, 8.507059e+37 }
0x162b   :  { %v2120_v8 = vsel %vm2119_vm11, %v2606_v2, %v2116_v0  ;;  %v2255_v2 = vld [vmem:[%s3626_s9 + $0x10] sm:$0xff] }
0x162c   :  { %v2125_v14 = vsel %vm2122_vm12, %v2124_v40, %v2120_v8  ;;  %2283 = vmatpush.msra.mxu0 %v2255_v2 }
0x162d   :  { %v2148_v16 = vmul.f32 %v2608_v42, %v2125_v14  ;;  %v2612_v22 = vpop.eup %2611  ;;  %v2147_v21 = vmul.f32 %v2125_v14, %v2056_v57 }
0x162e   :  { %v2133_v23 = vmul.f32 %v2612_v22, %v2131_v20  ;;  %vm2138_vm13 = vweird.f32 %v2612_v22  ;;  %2284 = vmatpush.msra.mxu0 %v2254_v44 }
0x162f   :  { %2150 = vrot.lane.b32.xlu1 %v2148_v16, %s2736_s3  ;;  %vm2139_vm15 = vmor %vm2137_vm14, %vm2138_vm13 }
0x1630   :  { %v2134_v17 = vsub.f32 1.0, %v2133_v23  ;;  %2285 = vmatpush.msra.mxu0 %v2253_v29 }
0x1632   :  { %v2135_v26 = vmul.f32 %v2612_v22, %v2134_v17  ;;  %v2434_v17 = vld [vmem:[%s3627_s10] ss:$0 sm:$0xff] }
0x1634   :  { %v2136_v45 = vadd.f32 %v2612_v22, %v2135_v26 }
0x1636   :  { %v2140_v7 = vsel %vm2139_vm15, %v2612_v22, %v2136_v45 }
0x1637   :  { %v2145_v58 = vsel %vm2142_vm0, %v2144_v33, %v2140_v7 }
0x16a1   :  { %v2151_v10 = vpop.permute.xlu1 %2150 }
0x16a2   :  { %v3571_v54 = vadd.f32 %v2151_v10, %v2147_v21 }
0x16a4   :  { %2613 = vtanh.f32 %v3571_v54 }
0x16aa   :  { %v2614_v62 = vpop.eup %2613 }
0x16ab   :  { %v2155_v9 = vmul.f32 %v2614_v62, %v2145_v58 }
0x16ad   :  { %2159 = vrot.lane.b32.xlu2 %v2155_v9, %s2736_s3 }
0x1707   :  { %v2160_v11 = vpop.permute.xlu2 %2159 }
0x1708   :  { %2419 = vmatmul.msk.f32.vlgmr.msrb.gmra.mxu2 %vm385_vm9, %v2160_v11  ;;  %2420 = vmatmul.msk.f32.vlgmr.msrb.gmra.mxu3 %vm385_vm9, %v2160_v11 }
0x178b   :  { %v2180_v39 = vpop.f32.mrf.mxu2  ;;  %v2200_v30 = vpop.f32.mrf.mxu3 }
0x178c   :  { %v2203_v32 = vadd.f32 %v2180_v39, %v1462_v12  ;;  %v2204_v35 = vadd.f32 %v2200_v30, %v1463_v43 }
0x178e   :  { %v2421_v13 = vmul.f32 -1.442695, %v2203_v32  ;;  %v2422_v28 = vmul.f32 -1.442695, %v2204_v35 }
0x1790   :  { %2615 = vpow2.f32 %v2421_v13 }
0x1796   :  { %v2616_v55 = vpop.eup %2615 }
0x1797   :  { %v2208_v57 = vadd.f32 1.0, %v2616_v55 }
0x1799   :  { %2617 = vrcp.f32 %v2208_v57  ;;  %v2220_v41 = vand.u32 2147483648, %v2208_v57  ;;  %v2218_v63 = vand.u32 2147483647, %v2208_v57  ;;  %vm2214_vm2 = vweird.f32 %v2208_v57 }
0x179a   :  { %2619 = vtanh.f32 %v2204_v35 }
0x179b   :  { %v2221_v31 = vor.u32 1.1754944e-38, %v2220_v41  ;;  %vm2219_vm4 = vcmp.eq.f32.partialorder %v2218_v63, 8.507059e+37  ;;  %2621 = vpow2.f32 %v2422_v28 }
0x179f   :  { %v2618_v5 = vpop.eup %2617 }
0x17a0   :  { %v2210_v24 = vmul.f32 %v2618_v5, %v2208_v57  ;;  %vm2215_vm1 = vweird.f32 %v2618_v5  ;;  %v2620_v37 = vpop.eup %2619 }
0x17a1   :  { %vm2216_vm3 = vmor %vm2214_vm2, %vm2215_vm1  ;;  %v2622_v27 = vpop.eup %2621 }
0x17a2   :  { %v2211_v49 = vsub.f32 1.0, %v2210_v24  ;;  %v2228_v48 = vadd.f32 1.0, %v2622_v27 }
0x17a4   :  { %v2212_v61 = vmul.f32 %v2618_v5, %v2211_v49  ;;  %2623 = vrcp.f32 %v2228_v48  ;;  %v2240_v42 = vand.u32 2147483648, %v2228_v48  ;;  %vm2234_vm6 = vweird.f32 %v2228_v48 }
0x17a5   :  { %v2238_v14 = vand.u32 2147483647, %v2228_v48 }
0x17a6   :  { %v2213_v51 = vadd.f32 %v2618_v5, %v2212_v61  ;;  %v2241_v1 = vor.u32 1.1754944e-38, %v2240_v42 }
0x17a7   :  { %vm2239_vm8 = vcmp.eq.f32.partialorder %v2238_v14, 8.507059e+37 }
0x17a8   :  { %v2217_v3 = vsel %vm2216_vm3, %v2618_v5, %v2213_v51 }
0x17a9   :  { %v2222_v19 = vsel %vm2219_vm4, %v2221_v31, %v2217_v3 }
0x17aa   :  { %v2245_v34 = vmul.f32 %v2620_v37, %v2222_v19  ;;  %v2624_v60 = vpop.eup %2623  ;;  %v2244_v52 = vmul.f32 %v2222_v19, %v3571_v54 }
0x17ab   :  { %v2230_v59 = vmul.f32 %v2624_v60, %v2228_v48  ;;  %vm2235_vm5 = vweird.f32 %v2624_v60 }
0x17ac   :  { %2247 = vrot.lane.b32.xlu0 %v2245_v34, %s2736_s3  ;;  %vm2236_vm7 = vmor %vm2234_vm6, %vm2235_vm5 }
0x17ad   :  { %v2231_v47 = vsub.f32 1.0, %v2230_v59 }
0x17af   :  { %v2232_v53 = vmul.f32 %v2624_v60, %v2231_v47 }
0x17b1   :  { %v2233_v8 = vadd.f32 %v2624_v60, %v2232_v53 }
0x17b3   :  { %v2237_v16 = vsel %vm2236_vm7, %v2624_v60, %v2233_v8 }
0x17b4   :  { %v2242_v20 = vsel %vm2239_vm8, %v2241_v1, %v2237_v16 }
0x181e   :  { %v2248_v0 = vpop.permute.xlu0 %2247 }
0x181f   :  { %v2250_v40 = vadd.f32 %v2248_v0, %v2244_v52 }
0x1821   :  { %2625 = vtanh.f32 %v2250_v40 }
0x1827   :  { %v2626_v18 = vpop.eup %2625 }
0x1828   :  { %v2252_v22 = vmul.f32 %v2626_v18, %v2242_v20 }
0x182a   :  { %2266 = vrot.lane.b32.xlu1 %v2252_v22, %s2736_s3 }
0x189c   :  { %v2267_v23 = vpop.permute.xlu1 %2266 }
0x189d   :  { %2423 = vmatmul.msk.f32.vlgmr.msra.gmra.mxu0 %vm385_vm9, %v2267_v23 }
0x191a   :  { %v2287_v26 = vpop.f32.mrf.mxu0 }
0x191b   :  { %v2288_v21 = vadd.f32 %v2434_v17, %v2287_v26 }
0x191d   :  { %2291 = vst.msk [vmem:[%s3628_s11] sm:$0xff] %vm2290_vm10, %v2288_v21 }
0x191e   :  { %2296 = vsyncpa [#allocation5], 1 }
0x191f   :  { %2297 = vsyncpa [#allocation7], 1 }
0x1920   :  { %2298 = vsyncpa [#allocation10], 1 }

</bundles_post_ra>
